<compile_context>
chip_gen: v6e
topology: v6e:2x2x1
jax: 0.10.0
libtpu: 0.0.40
codegen_flags: <defaults>
</compile_context>

<pallas_src>
import functools
import math

import jax
import jax.numpy as jnp
import numpy as np
from jax.experimental import pallas as pl
from jax.experimental.pallas import tpu as pltpu


def _round_up(a, b):
    return (a + b - 1) // b * b


def _vmem_capacity_bytes():
    """Physical per-core VMEM; conservative 64 MiB fallback (v7x-safe)."""
    try:
        info = pltpu.get_tpu_info()
        for attr in ("vmem_capacity_bytes", "vmem_size_bytes", "vmem_bytes"):
            v = getattr(info, attr, None)
            if v:
                return int(v)
    except Exception:
        pass
    return 64 * 2 ** 20


def _block_kernel(p_ref, w_ref, b_ref, mask_ref, gmask_ref, es_ref, eb_ref,
                  o_ref, lhs_ref, acc_ref, *,
                  wp, m_out, m_ext, npix, inv_denom, eps, c_store, bf16_tail):
    """Fused 3x3 conv (3 GEMMs, K=3*Cin) + GroupNorm + folded affine + SiLU.

    p_ref:     (Lp, Cin)       bf16  flattened zero-padded NHWC image (one batch elem)
    w_ref:     (3, 3*Cin, Ct)  bf16  conv weights, kh-major / kw-concat on K
    b_ref:     (1, Ct)         f32   conv bias
    mask_ref:  (1, M)          f32   1.0 on valid pixels, 0.0 on wrap/pad columns
    gmask_ref: (Ct, Ct)        f32   group-membership mask (resident across steps)
    es_ref:    (1, Ct)         f32   gamma * (scale + 1)
    eb_ref:    (1, Ct)         f32   beta * (scale + 1) + shift
    o_ref:     (M, c_store)    out dtype
    lhs_ref:   (M + 2*wp, 3*Cin) bf16 scratch -- lane-concat of kw-shifted slabs
    acc_ref:   (M, Ct)         f32 scratch -- conv accumulator
    """
    # ---- build the kw-concatenated LHS once (implicit im2col in VMEM) ----
    # Only the kw=1 and kw=2 reads are sublane-misaligned, and they happen once per
    # step here instead of once per tap.
    lhs_ref[...] = jnp.concatenate(
        [p_ref[pl.ds(0, m_ext), :],
         p_ref[pl.ds(1, m_ext), :],
         p_ref[pl.ds(2, m_ext), :]], axis=-1)

    # ---- 3x3 conv as 3 GEMMs with K = 3*Cin; kh*wp starts are sublane-aligned ----
    acc_ref[...] = jnp.dot(lhs_ref[pl.ds(0, m_out), :], w_ref[0],
                           preferred_element_type=jnp.float32)
    acc_ref[...] += jnp.dot(lhs_ref[pl.ds(wp, m_out), :], w_ref[1],
                            preferred_element_type=jnp.float32)
    acc_ref[...] += jnp.dot(lhs_ref[pl.ds(2 * wp, m_out), :], w_ref[2],
                            preferred_element_type=jnp.float32)
    y0 = acc_ref[...]                                     # conv WITHOUT bias (M, Ct) f32

    # ---- GroupNorm stats via masked MXU reductions; bias folded analytically ----
    msk = mask_ref[...]                                   # (1, M)
    cs0 = jnp.dot(msk, y0, preferred_element_type=jnp.float32)        # (1, Ct)
    cq0 = jnp.dot(msk, y0 * y0, preferred_element_type=jnp.float32)   # (1, Ct)
    bvec = b_ref[...]                                     # (1, Ct)
    npx = jnp.float32(npix)
    cs = cs0 + npx * bvec                                 # sum(y0 + b)
    cq = cq0 + 2.0 * bvec * cs0 + npx * bvec * bvec       # sum((y0 + b)^2)
    gm = gmask_ref[...]                                   # (Ct, Ct)
    inv_d = jnp.float32(inv_denom)
    mean = jnp.dot(cs, gm, preferred_element_type=jnp.float32) * inv_d
    ex2 = jnp.dot(cq, gm, preferred_element_type=jnp.float32) * inv_d
    var = jnp.maximum(ex2 - mean * mean, 0.0)             # guard cancellation
    inv = jax.lax.rsqrt(var + jnp.float32(eps))

    # ---- bias + GroupNorm affine + optional (scale+1)/shift folded into one FMA ----
    k = inv * es_ref[...]                                 # (1, Ct)
    c = (bvec - mean) * k + eb_ref[...]                   # (1, Ct)
    y = y0 * k + c

    # ---- SiLU (bf16 tail only when the output is bf16; v5e stays f32) ----
    if bf16_tail:
        y = y.astype(jnp.bfloat16)
    y = y * jax.nn.sigmoid(y)
    o_ref[...] = y[:, :c_store].astype(o_ref.dtype)


def block_forward(x_nchw, params, scale_shift=None, *, groups=8, eps=1e-5):
    """Pallas implementation of Block.forward.  x_nchw: (N, Cin, H, W) -> (N, Cout, H, W)."""
    w, b, gamma, beta = params["w"], params["b"], params["gamma"], params["beta"]
    n, cin, h, wdt = x_nchw.shape
    cout = w.shape[0]
    assert cout % groups == 0
    cg = cout // groups

    lane = 128
    cout_pad = _round_up(cout, lane)

    wp = _round_up(wdt + 2, 8)            # sublane-aligned padded row width
    m_out = h * wp                        # rows computed per step (incl. wrap/pad cols)
    m_ext = m_out + 2 * wp                # LHS scratch rows (covers kh = 0..2)
    lp = (h + 3) * wp                     # flattened padded image length (+guard rows)

    out_dtype = x_nchw.dtype
    out_bytes = jnp.dtype(out_dtype).itemsize

    # --- per-chip VMEM budget (v7x: 64 MiB, v5e/v6e: 128 MiB) ---
    vmem_cap = _vmem_capacity_bytes()
    budget = int(0.5 * vmem_cap)

    def step_bytes(ct_):
        return int(2 * lp * cin * 2                      # image slab (bf16, dbl-buffered)
                   + 2 * 9 * cin * ct_ * 2               # conv weights (bf16, dbl-buffered)
                   + 2 * m_out * ct_ * out_bytes         # output blocks
                   + m_ext * 3 * cin * 2                 # lhs scratch
                   + m_out * ct_ * 4                     # acc scratch
                   + 3 * m_out * ct_ * 4                 # live f32 temporaries headroom
                   + (m_out + ct_ * ct_ + 8 * ct_) * 4)  # masks / per-channel vectors

    # --- group-aligned, lane-aligned Cout tile fitting the VMEM budget ---
    base = (cg * lane) // math.gcd(cg, lane)             # lcm(cg, 128)
    cands = {cout_pad}
    d = base
    while d < cout_pad:
        if cout_pad % d == 0:
            cands.add(d)
        d += base
    cands = sorted(cands)
    fits = [c for c in cands if step_bytes(c) <= budget]
    if not fits:
        # TODO(synk): add a row-band grid axis + two-phase GroupNorm when even the
        # smallest group-aligned Cout tile exceeds the per-chip VMEM budget.
        fits = [cands[0]]
    ct = max(fits)
    if n * (cout_pad // ct) < 2:                         # give v7x megacore >=2 steps
        multi = [c for c in fits if cout_pad // c >= 2]
        if multi:
            ct = max(multi)
    n_ct = cout_pad // ct
    assert n_ct == 1 or ct % cg == 0                     # never split a group across tiles

    # --- store only valid channels when the 128-pad waste is large (>=4x) ---
    narrow_out = (n_ct == 1) and (cout_pad >= 4 * cout)
    c_total = cout if narrow_out else cout_pad
    c_store = c_total // n_ct

    # --- glue: NCHW -> flattened, zero-padded NHWC slab in bf16 (no im2col in HBM) ---
    # TODO(synk): in a full model keep activations NHWC end-to-end so this
    # transpose/pad/cast and the final slice/transpose HBM passes disappear.
    x = jnp.transpose(x_nchw, (0, 2, 3, 1))                              # NHWC
    xpad = jnp.pad(x, ((0, 0), (1, 2), (1, wp - wdt - 1), (0, 0)))       # (N, H+3, wp, Cin)
    pflat = xpad.reshape(n, lp, cin).astype(jnp.bfloat16)

    # conv weights (Cout, Cin, 3, 3) -> (kh, kw*Cin, Cout_pad) bf16, matching the
    # lane-concatenated LHS layout.
    w3 = jnp.transpose(w, (2, 3, 1, 0)).reshape(3, 3 * cin, cout)
    w3 = jnp.pad(w3, ((0, 0), (0, 0), (0, cout_pad - cout))).astype(jnp.bfloat16)

    bias = jnp.pad(b.astype(jnp.float32), (0, cout_pad - cout)).reshape(1, cout_pad)
    gamma_p = jnp.pad(gamma.astype(jnp.float32), (0, cout_pad - cout))
    beta_p = jnp.pad(beta.astype(jnp.float32), (0, cout_pad - cout))

    # fold GroupNorm affine with the optional scale_shift
    if scale_shift is None:
        eff_scale = gamma_p.reshape(1, 1, cout_pad)
        eff_shift = beta_p.reshape(1, 1, cout_pad)
        per_batch = False
    else:
        s, sh = scale_shift                                              # (N, Cout, 1, 1)
        s = jnp.pad(s.reshape(n, cout).astype(jnp.float32),
                    ((0, 0), (0, cout_pad - cout)))
        sh = jnp.pad(sh.reshape(n, cout).astype(jnp.float32),
                     ((0, 0), (0, cout_pad - cout)))
        eff_scale = (gamma_p[None, :] * (s + 1.0)).reshape(n, 1, cout_pad)
        eff_shift = (beta_p[None, :] * (s + 1.0) + sh).reshape(n, 1, cout_pad)
        per_batch = True

    # valid-pixel mask over the (H, wp) rows (zeros the wrap/pad columns)
    col_valid = (jnp.arange(wp) < wdt).astype(jnp.float32)
    mask = jnp.broadcast_to(col_valid, (h, wp)).reshape(1, m_out)

    # group-membership mask; identical for every group-aligned Cout tile
    loc = jnp.arange(ct)
    gmask = (loc[:, None] // cg == loc[None, :] // cg).astype(jnp.float32)

    # --- grid order: avoid redundant weight DMA across the batch axis ---
    w_bytes = 9 * cin * cout_pad * 2
    img_bytes = lp * cin * 2
    hbm_batch_outer = (w_bytes if n_ct == 1 else n * w_bytes) + n * img_bytes
    hbm_tile_outer = w_bytes + (img_bytes if n == 1 else n * n_ct * img_bytes)
    batch_outer = hbm_batch_outer <= hbm_tile_outer

    def b_of(a, c):
        return a if batch_outer else c

    def c_of(a, c):
        return c if batch_outer else a

    grid = (n, n_ct) if batch_outer else (n_ct, n)

    es_map = ((lambda a, c: (b_of(a, c), 0, c_of(a, c))) if per_batch
              else (lambda a, c: (0, 0, c_of(a, c))))

    fp = step_bytes(ct)
    vmem_limit = int(min(int(0.85 * vmem_cap), max(int(1.6 * fp), 32 * 2 ** 20)))

    kern = functools.partial(
        _block_kernel, wp=wp, m_out=m_out, m_ext=m_ext,
        npix=float(h * wdt), inv_denom=1.0 / float(h * wdt * cg), eps=float(eps),
        c_store=c_store, bf16_tail=(out_dtype == jnp.bfloat16))

    out = pl.pallas_call(
        kern,
        out_shape=jax.ShapeDtypeStruct((n, m_out, c_total), out_dtype),
        grid_spec=pltpu.PrefetchScalarGridSpec(
            num_scalar_prefetch=0,
            grid=grid,
            in_specs=[
                pl.BlockSpec((None, lp, cin), lambda a, c: (b_of(a, c), 0, 0)),    # image
                pl.BlockSpec((3, 3 * cin, ct), lambda a, c: (0, 0, c_of(a, c))),   # weights
                pl.BlockSpec((1, ct), lambda a, c: (0, c_of(a, c))),               # bias
                pl.BlockSpec((1, m_out), lambda a, c: (0, 0)),                     # pixel mask
                pl.BlockSpec((ct, ct), lambda a, c: (0, 0)),                       # group mask
                pl.BlockSpec((None, 1, ct), es_map),                               # eff scale
                pl.BlockSpec((None, 1, ct), es_map),                               # eff shift
            ],
            out_specs=pl.BlockSpec((None, m_out, c_store),
                                   lambda a, c: (b_of(a, c), 0, c_of(a, c))),
            scratch_shapes=[
                pltpu.VMEM((m_ext, 3 * cin), jnp.bfloat16),   # kw-concat LHS
                pltpu.VMEM((m_out, ct), jnp.float32),         # conv accumulator
            ]),
        compiler_params=pltpu.CompilerParams(
            dimension_semantics=("parallel", "parallel"),
            vmem_limit_bytes=vmem_limit),
    )(pflat, w3, bias, mask, gmask, eff_scale, eff_shift)

    # TODO(synk): for very small Cin (e.g. first layer) pack pixels/taps into the lane
    # dimension of the slab to fill the MXU K dimension and the vreg lanes.
    out = out.reshape(n, h, wp, c_total)[:, :, :wdt, :cout]
    return jnp.transpose(out, (0, 3, 1, 2))


def block_reference(x, params, scale_shift=None, *, groups=8, eps=1e-5):
    """Pure-JAX reference of the PyTorch Block.forward (NCHW)."""
    w, b, gamma, beta = params["w"], params["b"], params["gamma"], params["beta"]
    y = jax.lax.conv_general_dilated(
        x, w, window_strides=(1, 1), padding=((1, 1), (1, 1)),
        dimension_numbers=("NCHW", "OIHW", "NCHW"))
    y = y + b.reshape(1, -1, 1, 1)
    n, c, h, wdt = y.shape
    yg = y.reshape(n, groups, c // groups, h, wdt)
    mean = jnp.mean(yg, axis=(2, 3, 4), keepdims=True)
    var = jnp.mean((yg - mean) ** 2, axis=(2, 3, 4), keepdims=True)
    yg = (yg - mean) / jnp.sqrt(var + eps)
    y = yg.reshape(n, c, h, wdt) * gamma.reshape(1, -1, 1, 1) + beta.reshape(1, -1, 1, 1)
    if scale_shift is not None:
        s, sh = scale_shift
        y = y * (s + 1.0) + sh
    return y * jax.nn.sigmoid(y)


if __name__ == "__main__":
    # small shapes consistent with the module
    N, CIN, COUT, H, W, GROUPS = 2, 4, 8, 16, 16, 4

    key = jax.random.PRNGKey(0)
    kx, kw, kb, kg, kbt, ks, ksh = jax.random.split(key, 7)

    x = jax.random.normal(kx, (N, CIN, H, W), jnp.float32)
    params = {
        "w": 0.1 * jax.random.normal(kw, (COUT, CIN, 3, 3), jnp.float32),
        "b": 0.1 * jax.random.normal(kb, (COUT,), jnp.float32),
        "gamma": 1.0 + 0.1 * jax.random.normal(kg, (COUT,), jnp.float32),
        "beta": 0.1 * jax.random.normal(kbt, (COUT,), jnp.float32),
    }
    scale = 0.5 * jax.random.normal(ks, (N, COUT, 1, 1), jnp.float32)
    shift = 0.5 * jax.random.normal(ksh, (N, COUT, 1, 1), jnp.float32)

    # with scale_shift
    out = block_forward(x, params, scale_shift=(scale, shift), groups=GROUPS)
    out = jax.block_until_ready(out)
    ref = jax.block_until_ready(
        block_reference(x, params, scale_shift=(scale, shift), groups=GROUPS))
    assert out.shape == (N, COUT, H, W)
    assert np.allclose(np.asarray(out), np.asarray(ref), rtol=5e-2, atol=5e-2)

    # without scale_shift (None path)
    out2 = jax.block_until_ready(block_forward(x, params, None, groups=GROUPS))
    ref2 = jax.block_until_ready(block_reference(x, params, None, groups=GROUPS))
    assert np.allclose(np.asarray(out2), np.asarray(ref2), rtol=5e-2, atol=5e-2)

    print("KERNEL_OK")
</pallas_src>

<mosaic_0001>
module attributes {stable_mosaic.version = 11 : i64} {
  func.func @_block_kernel(%arg0: i32, %arg1: i32, %arg2: memref<1x456x4xbf16, #tpu.memory_space<vmem>>, %arg3: memref<3x12x128xbf16, #tpu.memory_space<vmem>>, %arg4: memref<1x128xf32, #tpu.memory_space<vmem>>, %arg5: memref<1x384xf32, #tpu.memory_space<vmem>>, %arg6: memref<128x128xf32, #tpu.memory_space<vmem>>, %arg7: memref<1x1x128xf32, #tpu.memory_space<vmem>>, %arg8: memref<1x1x128xf32, #tpu.memory_space<vmem>>, %arg9: memref<1x384x8xf32, #tpu.memory_space<vmem>>, %arg10: memref<432x12xbf16, #tpu.memory_space<vmem>>, %arg11: memref<384x128xf32, #tpu.memory_space<vmem>>) attributes {dimension_semantics = [#tpu.dimension_semantics<parallel>, #tpu.dimension_semantics<parallel>], iteration_bounds = array<i64: 2, 1>, scalar_prefetch = 0 : i64, scratch_operands = 2 : i64, tpu.core_type = #tpu.core_type<tc>, window_params = [{transform_indices = @transform_0, window_bounds = array<i64: 1, 456, 4>}, {transform_indices = @transform_1, window_bounds = array<i64: 3, 12, 128>}, {transform_indices = @transform_2, window_bounds = array<i64: 1, 128>}, {pipeline_mode = #tpu.pipeline_mode<synchronous>, transform_indices = @transform_3, window_bounds = array<i64: 1, 384>}, {pipeline_mode = #tpu.pipeline_mode<synchronous>, transform_indices = @transform_4, window_bounds = array<i64: 128, 128>}, {transform_indices = @transform_5, window_bounds = array<i64: 1, 1, 128>}, {transform_indices = @transform_6, window_bounds = array<i64: 1, 1, 128>}, {transform_indices = @transform_7, window_bounds = array<i64: 1, 384, 8>}]} {
    %c0 = arith.constant 0 : index
    %c0_0 = arith.constant 0 : index
    %c0_1 = arith.constant 0 : index
    %0 = vector.load %arg2[%c0, %c0_0, %c0_1] : memref<1x456x4xbf16, #tpu.memory_space<vmem>>, vector<1x432x4xbf16>
    %1 = vector.shape_cast %0 : vector<1x432x4xbf16> to vector<432x4xbf16>
    %c0_2 = arith.constant 0 : index
    %c1 = arith.constant 1 : index
    %c0_3 = arith.constant 0 : index
    %2 = vector.load %arg2[%c0_2, %c1, %c0_3] : memref<1x456x4xbf16, #tpu.memory_space<vmem>>, vector<1x432x4xbf16>
    %3 = vector.shape_cast %2 : vector<1x432x4xbf16> to vector<432x4xbf16>
    %c0_4 = arith.constant 0 : index
    %c2 = arith.constant 2 : index
    %c0_5 = arith.constant 0 : index
    %4 = vector.load %arg2[%c0_4, %c2, %c0_5] : memref<1x456x4xbf16, #tpu.memory_space<vmem>>, vector<1x432x4xbf16>
    %5 = vector.shape_cast %4 : vector<1x432x4xbf16> to vector<432x4xbf16>
    %6 = tpu.concatenate %1, %3, %5 in 1 : vector<432x4xbf16>, vector<432x4xbf16>, vector<432x4xbf16> -> vector<432x12xbf16>
    %c0_6 = arith.constant 0 : index
    %c0_7 = arith.constant 0 : index
    %7 = vector.load %arg10[%c0_6, %c0_7] : memref<432x12xbf16, #tpu.memory_space<vmem>>, vector<432x12xbf16>
    tpu.vector_store %arg10[%c0_6, %c0_7], %6 {strides = array<i32>} : memref<432x12xbf16, #tpu.memory_space<vmem>>, vector<432x12xbf16>,
    %c0_8 = arith.constant 0 : index
    %c0_9 = arith.constant 0 : index
    %8 = vector.load %arg10[%c0_8, %c0_9] : memref<432x12xbf16, #tpu.memory_space<vmem>>, vector<384x12xbf16>
    %c0_10 = arith.constant 0 : index
    %c0_11 = arith.constant 0 : index
    %c0_12 = arith.constant 0 : index
    %9 = vector.load %arg3[%c0_10, %c0_11, %c0_12] : memref<3x12x128xbf16, #tpu.memory_space<vmem>>, vector<1x12x128xbf16>
    %10 = vector.shape_cast %9 : vector<1x12x128xbf16> to vector<12x128xbf16>
    %cst = arith.constant dense<0.000000e+00> : vector<384x128xf32>
    %11 = tpu.matmul %8, %10, %cst {dimension_numbers = #tpu.dot_dimension_numbers<[1], [0], [0], [1], [0, 0, 1, 1], [], []>} : vector<384x12xbf16>, vector<12x128xbf16>, vector<384x128xf32> -> vector<384x128xf32>
    %c0_13 = arith.constant 0 : index
    %c0_14 = arith.constant 0 : index
    %12 = vector.load %arg11[%c0_13, %c0_14] : memref<384x128xf32, #tpu.memory_space<vmem>>, vector<384x128xf32>
    tpu.vector_store %arg11[%c0_13, %c0_14], %11 {strides = array<i32>} : memref<384x128xf32, #tpu.memory_space<vmem>>, vector<384x128xf32>,
    %c0_15 = arith.constant 0 : index
    %c0_16 = arith.constant 0 : index
    %13 = vector.load %arg11[%c0_15, %c0_16] : memref<384x128xf32, #tpu.memory_space<vmem>>, vector<384x128xf32>
    %c24 = arith.constant 24 : index
    %c0_17 = arith.constant 0 : index
    %14 = vector.load %arg10[%c24, %c0_17] : memref<432x12xbf16, #tpu.memory_space<vmem>>, vector<384x12xbf16>
    %c1_18 = arith.constant 1 : index
    %c0_19 = arith.constant 0 : index
    %c0_20 = arith.constant 0 : index
    %15 = vector.load %arg3[%c1_18, %c0_19, %c0_20] : memref<3x12x128xbf16, #tpu.memory_space<vmem>>, vector<1x12x128xbf16>
    %16 = vector.shape_cast %15 : vector<1x12x128xbf16> to vector<12x128xbf16>
    %cst_21 = arith.constant dense<0.000000e+00> : vector<384x128xf32>
    %17 = tpu.matmul %14, %16, %cst_21 {dimension_numbers = #tpu.dot_dimension_numbers<[1], [0], [0], [1], [0, 0, 1, 1], [], []>} : vector<384x12xbf16>, vector<12x128xbf16>, vector<384x128xf32> -> vector<384x128xf32>
    %18 = arith.addf %13, %17 : vector<384x128xf32>
    %c0_22 = arith.constant 0 : index
    %c0_23 = arith.constant 0 : index
    %19 = vector.load %arg11[%c0_22, %c0_23] : memref<384x128xf32, #tpu.memory_space<vmem>>, vector<384x128xf32>
    tpu.vector_store %arg11[%c0_22, %c0_23], %18 {strides = array<i32>} : memref<384x128xf32, #tpu.memory_space<vmem>>, vector<384x128xf32>,
    %c0_24 = arith.constant 0 : index
    %c0_25 = arith.constant 0 : index
    %20 = vector.load %arg11[%c0_24, %c0_25] : memref<384x128xf32, #tpu.memory_space<vmem>>, vector<384x128xf32>
    %c48 = arith.constant 48 : index
    %c0_26 = arith.constant 0 : index
    %21 = vector.load %arg10[%c48, %c0_26] : memref<432x12xbf16, #tpu.memory_space<vmem>>, vector<384x12xbf16>
    %c2_27 = arith.constant 2 : index
    %c0_28 = arith.constant 0 : index
    %c0_29 = arith.constant 0 : index
    %22 = vector.load %arg3[%c2_27, %c0_28, %c0_29] : memref<3x12x128xbf16, #tpu.memory_space<vmem>>, vector<1x12x128xbf16>
    %23 = vector.shape_cast %22 : vector<1x12x128xbf16> to vector<12x128xbf16>
    %cst_30 = arith.constant dense<0.000000e+00> : vector<384x128xf32>
    %24 = tpu.matmul %21, %23, %cst_30 {dimension_numbers = #tpu.dot_dimension_numbers<[1], [0], [0], [1], [0, 0, 1, 1], [], []>} : vector<384x12xbf16>, vector<12x128xbf16>, vector<384x128xf32> -> vector<384x128xf32>
    %25 = arith.addf %20, %24 : vector<384x128xf32>
    %c0_31 = arith.constant 0 : index
    %c0_32 = arith.constant 0 : index
    %26 = vector.load %arg11[%c0_31, %c0_32] : memref<384x128xf32, #tpu.memory_space<vmem>>, vector<384x128xf32>
    tpu.vector_store %arg11[%c0_31, %c0_32], %25 {strides = array<i32>} : memref<384x128xf32, #tpu.memory_space<vmem>>, vector<384x128xf32>,
    %c0_33 = arith.constant 0 : index
    %c0_34 = arith.constant 0 : index
    %27 = vector.load %arg11[%c0_33, %c0_34] : memref<384x128xf32, #tpu.memory_space<vmem>>, vector<384x128xf32>
    %c0_35 = arith.constant 0 : index
    %c0_36 = arith.constant 0 : index
    %28 = vector.load %arg5[%c0_35, %c0_36] : memref<1x384xf32, #tpu.memory_space<vmem>>, vector<1x384xf32>
    %cst_37 = arith.constant dense<0.000000e+00> : vector<1x128xf32>
    %29 = tpu.matmul %28, %27, %cst_37 {dimension_numbers = #tpu.dot_dimension_numbers<[1], [0], [0], [1], [0, 0, 1, 1], [], []>} : vector<1x384xf32>, vector<384x128xf32>, vector<1x128xf32> -> vector<1x128xf32>
    %30 = arith.mulf %27, %27 : vector<384x128xf32>
    %cst_38 = arith.constant dense<0.000000e+00> : vector<1x128xf32>
    %31 = tpu.matmul %28, %30, %cst_38 {dimension_numbers = #tpu.dot_dimension_numbers<[1], [0], [0], [1], [0, 0, 1, 1], [], []>} : vector<1x384xf32>, vector<384x128xf32>, vector<1x128xf32> -> vector<1x128xf32>
    %c0_39 = arith.constant 0 : index
    %c0_40 = arith.constant 0 : index
    %32 = vector.load %arg4[%c0_39, %c0_40] : memref<1x128xf32, #tpu.memory_space<vmem>>, vector<1x128xf32>
    %cst_41 = arith.constant 2.560000e+02 : f32
    %33 = vector.broadcast %cst_41 : f32 to vector<1x128xf32>
    %34 = arith.mulf %33, %32 : vector<1x128xf32>
    %35 = arith.addf %29, %34 : vector<1x128xf32>
    %cst_42 = arith.constant 2.000000e+00 : f32
    %36 = vector.broadcast %cst_42 : f32 to vector<1x128xf32>
    %37 = arith.mulf %36, %32 : vector<1x128xf32>
    %38 = arith.mulf %37, %29 : vector<1x128xf32>
    %39 = arith.addf %31, %38 : vector<1x128xf32>
    %cst_43 = arith.constant 2.560000e+02 : f32
    %40 = vector.broadcast %cst_43 : f32 to vector<1x128xf32>
    %41 = arith.mulf %40, %32 : vector<1x128xf32>
    %42 = arith.mulf %41, %32 : vector<1x128xf32>
    %43 = arith.addf %39, %42 : vector<1x128xf32>
    %c0_44 = arith.constant 0 : index
    %c0_45 = arith.constant 0 : index
    %44 = vector.load %arg6[%c0_44, %c0_45] : memref<128x128xf32, #tpu.memory_space<vmem>>, vector<128x128xf32>
    %cst_46 = arith.constant dense<0.000000e+00> : vector<1x128xf32>
    %45 = tpu.matmul %35, %44, %cst_46 {dimension_numbers = #tpu.dot_dimension_numbers<[1], [0], [0], [1], [0, 0, 1, 1], [], []>} : vector<1x128xf32>, vector<128x128xf32>, vector<1x128xf32> -> vector<1x128xf32>
    %cst_47 = arith.constant 0.001953125 : f32
    %46 = vector.broadcast %cst_47 : f32 to vector<1x128xf32>
    %47 = arith.mulf %45, %46 : vector<1x128xf32>
    %cst_48 = arith.constant dense<0.000000e+00> : vector<1x128xf32>
    %48 = tpu.matmul %43, %44, %cst_48 {dimension_numbers = #tpu.dot_dimension_numbers<[1], [0], [0], [1], [0, 0, 1, 1], [], []>} : vector<1x128xf32>, vector<128x128xf32>, vector<1x128xf32> -> vector<1x128xf32>
    %cst_49 = arith.constant 0.001953125 : f32
    %49 = vector.broadcast %cst_49 : f32 to vector<1x128xf32>
    %50 = arith.mulf %48, %49 : vector<1x128xf32>
    %51 = arith.mulf %47, %47 : vector<1x128xf32>
    %52 = arith.subf %50, %51 : vector<1x128xf32>
    %cst_50 = arith.constant 0.000000e+00 : f32
    %53 = vector.broadcast %cst_50 : f32 to vector<1x128xf32>
    %54 = arith.maximumf %52, %53 : vector<1x128xf32>
    %cst_51 = arith.constant 9.99999974E-6 : f32
    %55 = vector.broadcast %cst_51 : f32 to vector<1x128xf32>
    %56 = arith.addf %54, %55 : vector<1x128xf32>
    %57 = math.rsqrt %56 : vector<1x128xf32>
    %c0_52 = arith.constant 0 : index
    %c0_53 = arith.constant 0 : index
    %c0_54 = arith.constant 0 : index
    %58 = vector.load %arg7[%c0_52, %c0_53, %c0_54] : memref<1x1x128xf32, #tpu.memory_space<vmem>>, vector<1x1x128xf32>
    %59 = vector.shape_cast %58 : vector<1x1x128xf32> to vector<1x128xf32>
    %60 = arith.mulf %57, %59 : vector<1x128xf32>
    %61 = arith.subf %32, %47 : vector<1x128xf32>
    %62 = arith.mulf %61, %60 : vector<1x128xf32>
    %c0_55 = arith.constant 0 : index
    %c0_56 = arith.constant 0 : index
    %c0_57 = arith.constant 0 : index
    %63 = vector.load %arg8[%c0_55, %c0_56, %c0_57] : memref<1x1x128xf32, #tpu.memory_space<vmem>>, vector<1x1x128xf32>
    %64 = vector.shape_cast %63 : vector<1x1x128xf32> to vector<1x128xf32>
    %65 = arith.addf %62, %64 : vector<1x128xf32>
    %66 = vector.broadcast %60 : vector<1x128xf32> to vector<384x128xf32>
    %67 = arith.mulf %27, %66 : vector<384x128xf32>
    %68 = vector.broadcast %65 : vector<1x128xf32> to vector<384x128xf32>
    %69 = arith.addf %67, %68 : vector<384x128xf32>
    %70 = arith.negf %69 : vector<384x128xf32>
    %71 = math.exp %70 : vector<384x128xf32>
    %cst_58 = arith.constant 1.000000e+00 : f32
    %72 = vector.broadcast %cst_58 : f32 to vector<384x128xf32>
    %73 = arith.addf %72, %71 : vector<384x128xf32>
    %74 = arith.divf %72, %73 : vector<384x128xf32>
    %75 = arith.mulf %69, %74 : vector<384x128xf32>
    %76 = vector.extract_strided_slice %75 {offsets = [0, 0], sizes = [384, 8], strides = [1, 1]} : vector<384x128xf32> to vector<384x8xf32>
    %c0_59 = arith.constant 0 : index
    %c0_60 = arith.constant 0 : index
    %c0_61 = arith.constant 0 : index
    %77 = vector.load %arg9[%c0_59, %c0_60, %c0_61] : memref<1x384x8xf32, #tpu.memory_space<vmem>>, vector<1x384x8xf32>
    %78 = vector.shape_cast %77 : vector<1x384x8xf32> to vector<384x8xf32>
    %79 = vector.shape_cast %76 : vector<384x8xf32> to vector<1x384x8xf32>
    tpu.vector_store %arg9[%c0_59, %c0_60, %c0_61], %79 {strides = array<i32>} : memref<1x384x8xf32, #tpu.memory_space<vmem>>, vector<1x384x8xf32>,
    return
  }
  func.func @transform_0(%arg0: i32, %arg1: i32) -> (i32, i32, i32) {
    %c0_i32 = arith.constant 0 : i32
    %c0_i32_0 = arith.constant 0 : i32
    %c0_i32_1 = arith.constant 0 : i32
    return %arg0, %c0_i32, %c0_i32_0 : i32, i32, i32
  }
  func.func @transform_1(%arg0: i32, %arg1: i32) -> (i32, i32, i32) {
    %c0_i32 = arith.constant 0 : i32
    %c0_i32_0 = arith.constant 0 : i32
    %c0_i32_1 = arith.constant 0 : i32
    return %c0_i32, %c0_i32_0, %arg1 : i32, i32, i32
  }
  func.func @transform_2(%arg0: i32, %arg1: i32) -> (i32, i32) {
    %c0_i32 = arith.constant 0 : i32
    %c0_i32_0 = arith.constant 0 : i32
    return %c0_i32, %arg1 : i32, i32
  }
  func.func @transform_3(%arg0: i32, %arg1: i32) -> (i32, i32) {
    %c0_i32 = arith.constant 0 : i32
    %c0_i32_0 = arith.constant 0 : i32
    %c0_i32_1 = arith.constant 0 : i32
    return %c0_i32, %c0_i32_0 : i32, i32
  }
  func.func @transform_4(%arg0: i32, %arg1: i32) -> (i32, i32) {
    %c0_i32 = arith.constant 0 : i32
    %c0_i32_0 = arith.constant 0 : i32
    %c0_i32_1 = arith.constant 0 : i32
    return %c0_i32, %c0_i32_0 : i32, i32
  }
  func.func @transform_5(%arg0: i32, %arg1: i32) -> (i32, i32, i32) {
    %c0_i32 = arith.constant 0 : i32
    %c0_i32_0 = arith.constant 0 : i32
    return %arg0, %c0_i32, %arg1 : i32, i32, i32
  }
  func.func @transform_6(%arg0: i32, %arg1: i32) -> (i32, i32, i32) {
    %c0_i32 = arith.constant 0 : i32
    %c0_i32_0 = arith.constant 0 : i32
    return %arg0, %c0_i32, %arg1 : i32, i32, i32
  }
  func.func @transform_7(%arg0: i32, %arg1: i32) -> (i32, i32, i32) {
    %c0_i32 = arith.constant 0 : i32
    %c0_i32_0 = arith.constant 0 : i32
    return %arg0, %c0_i32, %arg1 : i32, i32, i32
  }
}

</mosaic_0001>

<bundles_post_ra>
// kernel: tpu_custom_call.1
= control target key start
LH: loop header
LB: loop body
LE: loop exit
PB: predicated region body
PF: predicated region fallthrough
CT: control target
= control target key end

     0   :  { %s5469_s24 = smov 0   ;;  %s5471_s25 = smov 0   ;;  %s7325_s0 = inlined_call_operand.vmem [shape: bf16[2,456,4], index: 0, kind: input, shape index: {}]   ;;  %s7326_s1 = inlined_call_operand.vmem [shape: bf16[3,12,128], index: 1, kind: input, shape index: {}]   ;;  %s7327_s2 = inlined_call_operand.vmem [shape: f32[1,128], index: 2, kind: input, shape index: {}]   ;;  %s7328_s3 = inlined_call_operand.vmem [shape: f32[1,384], index: 3, kind: input, shape index: {}]   ;;  %s7329_s4 = inlined_call_operand.vmem [shape: f32[128,128], index: 4, kind: input, shape index: {}]   ;;  %s7330_s5 = inlined_call_operand.vmem [shape: f32[2,1,128], index: 5, kind: input, shape index: {}]   ;;  %s7331_s6 = inlined_call_operand.vmem [shape: f32[2,1,128], index: 6, kind: input, shape index: {}]   ;;  %s7332_s7 = inlined_call_operand.vmem [shape: f32[2,384,8], index: 7, kind: output, shape index: {}]  }
   0x1   :  { %s5473_s26 = smov 0  }
   0x2 LB: > { %s29_s27 = sadd.s32 1, %s5419_s25  ;;  %p4276_p0 = scmp.ge.s32.totalorder %s5423_s26, 1  ;;  %s5423_s26 = sphi %s5473_s26, %s17_s26   ;;  %s5419_s25 = sphi %s5471_s25, %s7576_s25   ;;  %s5415_s24 = sphi %s5469_s24, %s7575_s24  }
   0x3   : > { %p31_p1 = scmp.ge.s32.totalorder %s29_s27, 2  ;;  %p294_p2 = scmp.lt.s32.totalorder %s5423_s26, 3 }
   0x5   : > { %s7578_s27 = smov (%p31_p1, %s29_s27), 0  ;;  %p295_p3 = pnand %p4276_p0, %p294_p2 }
   0x7   : > { %298 = sbr.rel (%p295_p3) target bundleno = 1148 (0x47c), region = 48 }
   0xc   : > { %p348_p4 = scmp.lt.s32.totalorder %s5415_s24, 1  ;;  %vm853_vm0 = vcmask 1046528   ;;  %s5425_s9 = smov 8   ;;  %vm575_vm1 = vsmask.f32 7424  ;;  %vm1565_vm2 = vcmask 1045504  }
   0xd   : > { %s5426_s10 = smov 4   ;;  %vm963_vm3 = vcmask 31744   ;;  %vm1018_vm4 = vcmask 64512   ;;  %vm1262_vm5 = vcmask 93184   ;;  %vm1492_vm6 = vcmask 97280  }
   0xe   : > { %s7580_s24 = smov (!%p348_p4, %s5415_s24), 1  ;;  %vm5428_vm7 = vmmov 0  }
   0xf   : > { %s5072_s28 = smul.u32 228, %s7580_s24  ;;  %s365_s17 = scalar_lea.vmem %s7330_s5, %s7580_s24 }
  0x10   : > { %s371_s20 = scalar_lea.vmem %s7331_s6, %s7580_s24  ;;  %s5073_s21 = smul.u32 384, %s7580_s24 }
  0x11   : > { %s5493_s8 = scalar_lea.vmem %s7325_s0, %s5072_s28 }
  0x12   : > { %v5496_v0 = vld [vmem:[%s5493_s8 + $0x10] sm:$0xff]   ;;  %v5499_v1 = vld [vmem:[%s5493_s8 + $0x18] sm:$0xff]   ;;  %v382_v2 = vld [vmem:[%s5493_s8 + $0x4] sm:$0xf]  ;;  %s7139_s23 = scalar_lea.vmem %s7332_s7, %s5073_s21 }
  0x13   : > { %v857_v3 = vrot.slane %v5496_v0, 1  ;;  %v859_v4 = vrot.slane %v5499_v1, 1  ;;  %v436_v5 = vld [vmem:[%s5493_s8] sm:$0xe]  ;;  %v5506_v6 = vld [vmem:[%s5493_s8 + $0x8] sm:$0xff]   ;;  %v592_v18 = vshll.u32 %v5496_v0, 16 }
  0x14   : > { %v5509_v7 = vld [vmem:[%s5493_s8 + $0x20] sm:$0xff]   ;;  %v4307_v8 = vcombine.low %v436_v5, %v382_v2  ;;  %v855_v11 = vrot.slane %v5506_v6, 1  ;;  %v584_v13 = vshll.u32 %v5506_v6, 16  ;;  %v588_v15 = vshrl.u32 %v5506_v6, 16  ;;  %v5523_v19 = vld [vmem:[%s5493_s8 + $0x28] sm:$0xff]   ;;  %v5533_v29 = vld [vmem:[%s5493_s8 + $0x30] sm:$0xff]  }
  0x15   : > { %v381_v9 = vld [vmem:[%s5493_s8] sm:$0xf]  ;;  %v860_v10 = vsel %vm853_vm0, %v857_v3, %v859_v4  ;;  %v600_v21 = vshll.u32 %v5499_v1, 16  ;;  %v861_v24 = vrot.slane %v5509_v7, 1  ;;  %v608_v25 = vshll.u32 %v5509_v7, 16  ;;  %v5541_v38 = vld [vmem:[%s5493_s8 + $0x38] sm:$0xff]  }
  0x16   : > { %v5514_v12 = vcombine.low %v381_v9, %v382_v2  ;;  %913 = vrot.lane.b32.xlu0 %v860_v10, %s5425_s9  ;;  %v854_v14 = vrot.slane %v4307_v8, 1  ;;  %v586_v23 = vrot.slane %v584_v13, 1  ;;  %v858_v26 = vsel %vm853_vm0, %v855_v11, %v857_v3  ;;  %v5552_v49 = vld [vmem:[%s5493_s8 + $0x40] sm:$0xff]   ;;  %v5564_v59 = vld [vmem:[%s5493_s8 + $0x48] sm:$0xff]   ;;  %v5572_v3 = vld [vmem:[%s5493_s8 + $0x50] sm:$0xff]  }
  0x17   : > { %v602_v27 = vrot.slane %v600_v21, 1  ;;  %v604_v28 = vshrl.u32 %v5499_v1, 16  ;;  %v616_v30 = vshll.u32 %v5523_v19, 16  ;;  %v594_v33 = vrot.slane %v592_v18, 1  ;;  %v5578_v10 = vld [vmem:[%s5493_s8 + $0x58] sm:$0xff]  }
  0x18   : > { %v577_v16 = vshrl.u32 %v5514_v12, 16  ;;  %v579_v17 = vshll.u32 %v5514_v12, 16  ;;  %v856_v20 = vsel %vm853_vm0, %v854_v14, %v855_v11  ;;  %v590_v32 = vor.u32 %v588_v15, %v586_v23 }
  0x19   : > { %909 = vrot.lane.b32.xlu1 %v856_v20, %s5425_s9  ;;  %v596_v34 = vshrl.u32 %v5496_v0, 16  ;;  %v610_v36 = vrot.slane %v608_v25, 1  ;;  %v620_v37 = vshrl.u32 %v5523_v19, 16  ;;  %v862_v39 = vsel %vm853_vm0, %v859_v4, %v861_v24 }
  0x1a   : > { %v581_v22 = vrot.slane %v579_v17, 1  ;;  %v606_v40 = vor.u32 %v604_v28, %v602_v27  ;;  %v618_v41 = vrot.slane %v616_v30, 1  ;;  %v624_v42 = vshll.u32 %v5533_v29, 16 }
  0x1b   : > { %v595_v43 = vsel %vm575_vm1, %v590_v32, %v594_v33  ;;  %v598_v44 = vor.u32 %v596_v34, %v594_v33  ;;  %v612_v45 = vshrl.u32 %v5509_v7, 16  ;;  %v632_v50 = vshll.u32 %v5541_v38, 16  ;;  %v5604_v34 = vld [vmem:[%s5493_s8 + $0x68] sm:$0xff]  }
  0x1c   : > { %v582_v31 = vor.u32 %v581_v22, %v577_v16  ;;  %v611_v46 = vsel %vm575_vm1, %v606_v40, %v610_v36  ;;  %v622_v47 = vor.u32 %v620_v37, %v618_v41  ;;  %v626_v48 = vrot.slane %v624_v42, 1 }
  0x1d   : > { %911 = vrot.lane.b32.xlu1 %v858_v26, %s5425_s9  ;;  %v603_v51 = vsel %vm575_vm1, %v598_v44, %v602_v27  ;;  %v614_v52 = vor.u32 %v612_v45, %v610_v36  ;;  %v863_v53 = vrot.slane %v5523_v19, 1  ;;  %v865_v54 = vrot.slane %v5533_v29, 1 }
  0x1e   : > { %v587_v35 = vsel %vm575_vm1, %v582_v31, %v586_v23  ;;  %v627_v55 = vsel %vm575_vm1, %v622_v47, %v626_v48  ;;  %v634_v56 = vrot.slane %v632_v50, 1  ;;  %v636_v57 = vshrl.u32 %v5541_v38, 16  ;;  %v5592_v23 = vld [vmem:[%s5493_s8 + $0x60] sm:$0xff]  }
  0x1f   : > { %796 = vrot.lane.b32.xlu0 %v587_v35, %s5426_s10  ;;  %v640_v58 = vshll.u32 %v5552_v49, 16  ;;  %v619_v60 = vsel %vm575_vm1, %v614_v52, %v618_v41  ;;  %v628_v61 = vshrl.u32 %v5533_v29, 16  ;;  %v866_v62 = vsel %vm853_vm0, %v863_v53, %v865_v54  ;;  %v5612_v41 = vld [vmem:[%s5493_s8 + $0x70] sm:$0xff]   ;;  %v5129_v47 = vld [vmem:[%s7326_s1] sm:$0x3f]  }
  0x20   : > { %v638_v63 = vor.u32 %v636_v57, %v634_v56  ;;  %v648_v4 = vshll.u32 %v5564_v59, 16  ;;  %v864_v5 = vsel %vm853_vm0, %v861_v24, %v863_v53  ;;  %v867_v9 = vrot.slane %v5541_v38, 1  ;;  %v5627_v53 = vld [vmem:[%s5493_s8 + $0x78] sm:$0xff]   ;;  %5068 = vmatprep.subr.msk.bf16.mxu0 %vm1565_vm2, %v5129_v47  ;;  %5069 = vmatprep.subr.msk.bf16.mxu1 %vm1565_vm2, %v5129_v47 }
  0x21   : > { %915 = vrot.lane.b32.xlu1 %v862_v39, %s5425_s9  ;;  %v642_v2 = vrot.slane %v640_v58, 1  ;;  %v630_v8 = vor.u32 %v628_v61, %v626_v48  ;;  %v869_v11 = vrot.slane %v5552_v49, 1  ;;  %v652_v13 = vshrl.u32 %v5564_v59, 16  ;;  %v5637_v61 = vld [vmem:[%s5493_s8 + $0x80] sm:$0xff]  }
  0x22   : > { %v650_v15 = vrot.slane %v648_v4, 1  ;;  %v656_v16 = vshll.u32 %v5572_v3, 16  ;;  %v644_v18 = vshrl.u32 %v5552_v49, 16  ;;  %v664_v24 = vshll.u32 %v5578_v10, 16 }
  0x23   : > { %798 = vrot.lane.b32.xlu0 %v595_v43, %s5426_s10  ;;  %v643_v14 = vsel %vm575_vm1, %v638_v63, %v642_v2  ;;  %v635_v17 = vsel %vm575_vm1, %v630_v8, %v634_v56  ;;  %v870_v20 = vsel %vm853_vm0, %v867_v9, %v869_v11  ;;  %v868_v25 = vsel %vm853_vm0, %v865_v54, %v867_v9 }
  0x24   : > { %v654_v21 = vor.u32 %v652_v13, %v650_v15  ;;  %v658_v22 = vrot.slane %v656_v16, 1  ;;  %v646_v26 = vor.u32 %v644_v18, %v642_v2  ;;  %v871_v27 = vrot.slane %v5564_v59, 1  ;;  %v5659_v18 = vld [vmem:[%s5493_s8 + $0xd0] sm:$0xff]  }
  0x25   : > { %802 = vrot.lane.b32.xlu1 %v611_v46, %s5426_s10  ;;  %v873_v28 = vrot.slane %v5572_v3, 1  ;;  %v666_v31 = vrot.slane %v664_v24, 1  ;;  %v668_v32 = vshrl.u32 %v5578_v10, 16  ;;  %v672_v33 = vshll.u32 %v5592_v23, 16  ;;  %v5664_v24 = vld [vmem:[%s5493_s8 + $0xb0] sm:$0xff]  }
  0x26   : > { %v659_v30 = vsel %vm575_vm1, %v654_v21, %v658_v22  ;;  %v651_v35 = vsel %vm575_vm1, %v646_v26, %v650_v15  ;;  %v660_v36 = vshrl.u32 %v5572_v3, 16  ;;  %v680_v42 = vshll.u32 %v5604_v34, 16 }
  0x27   : > { %800 = vrot.lane.b32.xlu0 %v603_v51, %s5426_s10  ;;  %v874_v37 = vsel %vm853_vm0, %v871_v27, %v873_v28  ;;  %v670_v39 = vor.u32 %v668_v32, %v666_v31  ;;  %v674_v40 = vrot.slane %v672_v33, 1  ;;  %v872_v43 = vsel %vm853_vm0, %v869_v11, %v871_v27 }
  0x28   : > { %v662_v44 = vor.u32 %v660_v36, %v658_v22  ;;  %v875_v45 = vrot.slane %v5578_v10, 1  ;;  %v877_v46 = vrot.slane %v5592_v23, 1  ;;  %v682_v50 = vrot.slane %v680_v42, 1 }
  0x29   : > { %806 = vrot.lane.b32.xlu1 %v627_v55, %s5426_s10  ;;  %v675_v48 = vsel %vm575_vm1, %v670_v39, %v674_v40  ;;  %v684_v51 = vshrl.u32 %v5604_v34, 16  ;;  %v688_v52 = vshll.u32 %v5612_v41, 16  ;;  %v676_v55 = vshrl.u32 %v5592_v23, 16  ;;  %v5678_v39 = vld [vmem:[%s5493_s8 + $0x88] sm:$0xff]  }
  0x2a   : > { %v667_v54 = vsel %vm575_vm1, %v662_v44, %v666_v31  ;;  %v1567_v56 = vsel %vm1565_vm2, %v5129_v47, 0  ;;  %v878_v57 = vsel %vm853_vm0, %v875_v45, %v877_v46  ;;  %v876_v63 = vsel %vm853_vm0, %v873_v28, %v875_v45  ;;  %v5685_v44 = vld [vmem:[%s5493_s8 + $0xd8] ss:$0 sps:$4 sm:$0x11]  }
  0x2b   : > { %804 = vrot.lane.b32.xlu0 %v619_v60, %s5426_s10  ;;  %v686_v58 = vor.u32 %v684_v51, %v682_v50  ;;  %v690_v60 = vrot.slane %v688_v52, 1  ;;  %4777 = vmatpush3.bf16.msra.mxu0 %v1567_v56  ;;  %v678_v2 = vor.u32 %v676_v55, %v674_v40  ;;  %v879_v4 = vrot.slane %v5604_v34, 1  ;;  %v5699_v55 = vld [vmem:[%s5493_s8 + $0x90] sm:$0xff]  }
  0x2c   : > { %5067 = vmatpush3.bf16.msra.mxu1 %v1567_v56  ;;  %v700_v11 = vshrl.u32 %v5627_v53, 16  ;;  %v704_v13 = vshll.u32 %v5637_v61, 16  ;;  %v692_v16 = vshrl.u32 %v5612_v41, 16  ;;  %v885_v31 = vrot.slane %v5637_v61, 1 }
  0x2d   : > { %919 = vrot.lane.b32.xlu1 %v866_v62, %s5425_s9  ;;  %v696_v62 = vshll.u32 %v5627_v53, 16  ;;  %v691_v8 = vsel %vm575_vm1, %v686_v58, %v690_v60  ;;  %v683_v15 = vsel %vm575_vm1, %v678_v2, %v682_v50  ;;  %v880_v26 = vsel %vm853_vm0, %v877_v46, %v879_v4 }
  0x2e   : > { %v706_v22 = vrot.slane %v704_v13, 1  ;;  %v694_v27 = vor.u32 %v692_v16, %v690_v60  ;;  %v784_v32 = vshll.u32 %v5659_v18, 16  ;;  %v788_v47 = vshrl.u32 %v5659_v18, 16 }
  0x2f   : > { %917 = vrot.lane.b32.xlu0 %v864_v5, %s5425_s9  ;;  %v881_v5 = vrot.slane %v5612_v41, 1  ;;  %v698_v9 = vrot.slane %v696_v62, 1  ;;  %v708_v52 = vshrl.u32 %v5637_v61, 16  ;;  %v716_v62 = vshrl.u32 %v5678_v39, 16 }
  0x30   : > { %v5691_v46 = vrot.slane %v784_v32, 1 }
  0x31   : > { %810 = vrot.lane.b32.xlu1 %v643_v14, %s5426_s10  ;;  %v5650_v14 = vld [vmem:[%s5493_s8 + $0xa8] sm:$0xff]   ;;  %v702_v21 = vor.u32 %v700_v11, %v698_v9  ;;  %v699_v40 = vsel %vm575_vm1, %v694_v27, %v698_v9  ;;  %v5713_v9 = vld [vmem:[%s5493_s8 + $0xb8] sm:$0xff]   ;;  %v897_v27 = vrot.slane %v5664_v24, 1 }
  0x32   : > { %v748_v36 = vshrl.u32 %v5650_v14, 16  ;;  %v790_v58 = vor.u32 %v788_v47, %v5691_v46 }
  0x33   : > { %808 = vrot.lane.b32.xlu0 %v635_v17, %s5426_s10  ;;  %v5655_v17 = vld [vmem:[%s5493_s8 + $0xa0] sm:$0xff]   ;;  %v707_v33 = vsel %vm575_vm1, %v702_v21, %v706_v22 }
  0x34   : > { %v736_v28 = vshll.u32 %v5655_v17, 16  ;;  %v893_v13 = vrot.slane %v5655_v17, 1 }
  0x35   : > { %923 = vrot.lane.b32.xlu1 %v870_v20, %s5425_s9  ;;  %v882_v20 = vsel %vm853_vm0, %v879_v4, %v881_v5  ;;  %v710_v4 = vor.u32 %v708_v52, %v706_v22  ;;  %v5722_v22 = vld [vmem:[%s5493_s8 + $0xc0] sm:$0xff]  }
  0x36   : > { %v5681_v42 = vrot.slane %v736_v28, 1  ;;  %v887_v28 = vrot.slane %v5678_v39, 1 }
  0x37   : > { %921 = vrot.lane.b32.xlu0 %v868_v25, %s5425_s9  ;;  %v744_v25 = vshll.u32 %v5650_v14, 16 }
  0x39   : > { %814 = vrot.lane.b32.xlu1 %v659_v30, %s5426_s10  ;;  %v883_v30 = vrot.slane %v5627_v53, 1 }
  0x3b   : > { %812 = vrot.lane.b32.xlu0 %v651_v35, %s5426_s10  ;;  %v746_v35 = vrot.slane %v744_v25, 1  ;;  %v886_v45 = vsel %vm853_vm0, %v883_v30, %v885_v31  ;;  %v884_v56 = vsel %vm853_vm0, %v881_v5, %v883_v30  ;;  %v720_v5 = vshll.u32 %v5699_v55, 16 }
  0x3c   : > { %v760_v25 = vshll.u32 %v5713_v9, 16  ;;  %v889_v30 = vrot.slane %v5699_v55, 1 }
  0x3d   : > { %927 = vrot.lane.b32.xlu1 %v874_v37, %s5425_s9  ;;  %v752_v37 = vshll.u32 %v5664_v24, 16  ;;  %v750_v50 = vor.u32 %v748_v36, %v746_v35  ;;  %v722_v21 = vrot.slane %v720_v5, 1  ;;  %v768_v36 = vshll.u32 %v5722_v22, 16 }
  0x3e   : > { %v901_v5 = vrot.slane %v5722_v22, 1 }
  0x3f   : > { %925 = vrot.lane.b32.xlu0 %v872_v43, %s5425_s9  ;;  %v740_v43 = vshrl.u32 %v5655_v17, 16  ;;  %v754_v51 = vrot.slane %v752_v37, 1  ;;  %v5735_v37 = vld [vmem:[%s5493_s8 + $0x98] sm:$0xff]  }
  0x40   : > { %v728_v52 = vshll.u32 %v5735_v37, 16 }
  0x41   : > { %818 = vrot.lane.b32.xlu1 %v675_v48, %s5426_s10  ;;  %v792_v48 = vshll.u32 %v5685_v44, 16  ;;  %v755_v2 = vsel %vm575_vm1, %v750_v50, %v754_v51  ;;  %v724_v50 = vshrl.u32 %v5699_v55, 16 }
  0x43   : > { %816 = vrot.lane.b32.xlu0 %v667_v54, %s5426_s10  ;;  %v712_v54 = vshll.u32 %v5678_v39, 16  ;;  %v794_v60 = vrot.slane %v792_v48, 1  ;;  %v770_v48 = vrot.slane %v768_v36, 1  ;;  %v5157_v36 = vld [vmem:[%s7326_s1 + $0x8] sm:$0x3f]  }
  0x44   : > { %5070 = vmatprep.subr.msk.bf16.mxu1 %vm1565_vm2, %v5157_v36 }
  0x45   : > { %931 = vrot.lane.b32.xlu1 %v878_v57, %s5425_s9  ;;  %v742_v57 = vor.u32 %v740_v43, %v5681_v42  ;;  %v756_v43 = vshrl.u32 %v5664_v24, 16 }
  0x47   : > { %929 = vrot.lane.b32.xlu0 %v876_v63, %s5425_s9  ;;  %v5707_v63 = vsel %vm575_vm1, %v790_v58, %v794_v60  ;;  %v747_v11 = vsel %vm575_vm1, %v742_v57, %v746_v35  ;;  %v764_v35 = vshrl.u32 %v5713_v9, 16  ;;  %v726_v58 = vor.u32 %v724_v50, %v722_v21 }
  0x48   : > { %v730_v60 = vrot.slane %v728_v52, 1 }
  0x49   : > { %822 = vrot.lane.b32.xlu1 %v691_v8, %s5426_s10  ;;  %v714_v8 = vrot.slane %v712_v54, 1  ;;  %v888_v54 = vsel %vm853_vm0, %v885_v31, %v887_v28 }
  0x4a   : > { %v731_v31 = vsel %vm575_vm1, %v726_v58, %v730_v60 }
  0x4b   : > { %820 = vrot.lane.b32.xlu0 %v683_v15, %s5426_s10  ;;  %v895_v15 = vrot.slane %v5650_v14, 1  ;;  %v715_v16 = vsel %vm575_vm1, %v710_v4, %v714_v8  ;;  %v899_v4 = vrot.slane %v5713_v9, 1 }
  0x4d   : > { %935 = vrot.lane.b32.xlu1 %v882_v20, %s5425_s9  ;;  %v718_v20 = vor.u32 %v716_v62, %v714_v8  ;;  %v732_v62 = vshrl.u32 %v5735_v37, 16  ;;  %v900_v8 = vsel %vm853_vm0, %v897_v27, %v899_v4 }
  0x4f   : > { %933 = vrot.lane.b32.xlu0 %v880_v26, %s5425_s9  ;;  %v896_v26 = vsel %vm853_vm0, %v893_v13, %v895_v15  ;;  %v723_v32 = vsel %vm575_vm1, %v718_v20, %v722_v21  ;;  %v902_v20 = vsel %vm853_vm0, %v899_v4, %v901_v5  ;;  %v772_v21 = vshrl.u32 %v5722_v22, 16 }
  0x51   : > { %826 = vrot.lane.b32.xlu1 %v707_v33, %s5426_s10  ;;  %v762_v33 = vrot.slane %v760_v25, 1 }
  0x53   : > { %824 = vrot.lane.b32.xlu0 %v699_v40, %s5426_s10  ;;  %v898_v40 = vsel %vm853_vm0, %v895_v15, %v897_v27  ;;  %v766_v47 = vor.u32 %v764_v35, %v762_v33 }
  0x55   : > { %939 = vrot.lane.b32.xlu1 %v886_v45, %s5425_s9  ;;  %v890_v45 = vsel %vm853_vm0, %v887_v28, %v889_v30  ;;  %v771_v57 = vsel %vm575_vm1, %v766_v47, %v770_v48 }
  0x57   : > { %937 = vrot.lane.b32.xlu0 %v884_v56, %s5425_s9  ;;  %v758_v56 = vor.u32 %v756_v43, %v754_v51  ;;  %v734_v51 = vor.u32 %v732_v62, %v730_v60 }
  0x59   : > { %838 = vrot.lane.b32.xlu1 %v755_v2, %s5426_s10  ;;  %v763_v2 = vsel %vm575_vm1, %v758_v56, %v762_v33  ;;  %v739_v15 = vsel %vm575_vm1, %v734_v51, %v5681_v42 }
  0x5b   : > { %836 = vrot.lane.b32.xlu0 %v747_v11, %s5426_s10  ;;  %v5759_v11 = vld [vmem:[%s5493_s8 + $0xc8] sm:$0xff]  }
  0x5c   : > { %v776_v25 = vshll.u32 %v5759_v11, 16  ;;  %v903_v42 = vrot.slane %v5759_v11, 1  ;;  %v780_v35 = vshrl.u32 %v5759_v11, 16 }
  0x5d   : > { %828 = vrot.lane.b32.xlu1 %v715_v16, %s5426_s10  ;;  %v891_v16 = vrot.slane %v5735_v37, 1 }
  0x5e   : > { %v778_v33 = vrot.slane %v776_v25, 1 }
  0x5f   : > { %949 = vrot.lane.b32.xlu0 %v896_v26, %s5425_s9  ;;  %v5773_v26 = vld [vmem:[%s7326_s1 + $0x10] sm:$0x3f]   ;;  %v894_v27 = vsel %vm853_vm0, %v891_v16, %v893_v13  ;;  %v892_v28 = vsel %vm853_vm0, %v889_v30, %v891_v16  ;;  %v904_v13 = vsel %vm853_vm0, %v901_v5, %v903_v42  ;;  %v5791_v30 = vsel %vm1565_vm2, %v5157_v36, 0 }
  0x60   : > { %5071 = vmatprep.subr.msk.bf16.mxu0 %vm1565_vm2, %v5773_v26 }
  0x61   : > { %830 = vrot.lane.b32.xlu1 %v723_v32, %s5426_s10  ;;  %v774_v32 = vor.u32 %v772_v21, %v770_v48  ;;  %v907_v48 = vrot.slane %v5685_v44, 1 }
  0x63   : > { %951 = vrot.lane.b32.xlu0 %v898_v40, %s5425_s9  ;;  %v905_v40 = vrot.slane %v5659_v18, 1  ;;  %v779_v43 = vsel %vm575_vm1, %v774_v32, %v778_v33 }
  0x65   : > { %943 = vrot.lane.b32.xlu1 %v890_v45, %s5425_s9  ;;  %v782_v45 = vor.u32 %v780_v35, %v778_v33  ;;  %v906_v47 = vsel %vm853_vm0, %v903_v42, %v905_v40  ;;  %v908_v18 = vsel %vm853_vm0, %v905_v40, %v907_v48  ;;  %v2759_v40 = vsel %vm1565_vm2, %v5773_v26, 0 }
  0x67   : > { %941 = vrot.lane.b32.xlu0 %v888_v54, %s5425_s9  ;;  %v787_v50 = vsel %vm575_vm1, %v782_v45, %v5691_v46 }
  0x69   : > { %842 = vrot.lane.b32.xlu1 %v771_v57, %s5426_s10 }
  0x6b   : > { %840 = vrot.lane.b32.xlu0 %v763_v2, %s5426_s10 }
  0x6d   : > { %832 = vrot.lane.b32.xlu1 %v731_v31, %s5426_s10 }
  0x6f   : > { %953 = vrot.lane.b32.xlu0 %v900_v8, %s5425_s9 }
  0x71   : > { %834 = vrot.lane.b32.xlu1 %v739_v15, %s5426_s10 }
  0x73   : > { %955 = vrot.lane.b32.xlu0 %v902_v20, %s5425_s9 }
  0x75   : > { %947 = vrot.lane.b32.xlu1 %v894_v27, %s5425_s9 }
  0x77   : > { %945 = vrot.lane.b32.xlu0 %v892_v28, %s5425_s9 }
  0x79   : > { %957 = vrot.lane.b32.xlu1 %v904_v13, %s5425_s9 }
  0x7b   : > { %844 = vrot.lane.b32.xlu0 %v779_v43, %s5426_s10 }
  0x7d   : > { %959 = vrot.lane.b32.xlu1 %v906_v47, %s5425_s9 }
  0x7f   : > { %846 = vrot.lane.b32.xlu0 %v787_v50, %s5426_s10 }
  0x81   : > { %961 = vrot.lane.b32.xlu1 %v908_v18, %s5425_s9 }
  0x83   : > { %848 = vrot.lane.b32.xlu0 %v5707_v63, %s5426_s10 }
  0x88   : > { %v914_v52 = vpop.permute.xlu0 %913 }
  0x8b   : > { %v910_v54 = vpop.permute.xlu1 %909 }
  0x8f   : > { %v912_v56 = vpop.permute.xlu1 %911 }
  0x91   : > { %v797_v44 = vpop.permute.xlu0 %796 }
  0x92   : > { %v965_v46 = vsel %vm963_vm3, %v5514_v12, %v797_v44 }
  0x93   : > { %v1020_v57 = vsel %vm1018_vm4, %v965_v46, %v910_v54  ;;  %v916_v62 = vpop.permute.xlu1 %915 }
  0x94   : > { %v4308_v58 = vcombine.low %v1020_v57, %v1020_v57  ;;  %v4309_v60 = vcombine.high %v1020_v57, %v1020_v57 }
  0x95   : > { %v799_v2 = vpop.permute.xlu0 %798 }
  0x96   : > { %1263 = vst.msk [vmem:[#allocation2] sm:$0xf] %vm1262_vm5, %v4308_v58  ;;  %1264 = vst.msk [vmem:[#allocation2 + $0x4] sm:$0xf] %vm1262_vm5, %v4309_v60  ;;  %v967_v63 = vsel %vm963_vm3, %v5506_v6, %v799_v2 }
  0x97   : > { %v1022_v4 = vsel %vm1018_vm4, %v967_v63, %v912_v56  ;;  %v803_v8 = vpop.permute.xlu1 %802 }
  0x98   : > { %v4310_v31 = vcombine.low %v1022_v4, %v1022_v4  ;;  %v4311_v51 = vcombine.high %v1022_v4, %v1022_v4  ;;  %v971_v12 = vsel %vm963_vm3, %v5499_v1, %v803_v8 }
  0x99   : > { %v801_v5 = vpop.permute.xlu0 %800  ;;  %v1026_v15 = vsel %vm1018_vm4, %v971_v12, %v916_v62 }
  0x9a   : > { %1265 = vst.msk [vmem:[#allocation2 + $0x8] sm:$0xf] %vm1262_vm5, %v4310_v31  ;;  %1266 = vst.msk [vmem:[#allocation2 + $0xc] sm:$0xf] %vm1262_vm5, %v4311_v51  ;;  %v969_v16 = vsel %vm963_vm3, %v5496_v0, %v801_v5  ;;  %v4314_v20 = vcombine.low %v1026_v15, %v1026_v15  ;;  %v4315_v6 = vcombine.high %v1026_v15, %v1026_v15 }
  0x9b   : > { %v1024_v21 = vsel %vm1018_vm4, %v969_v16, %v914_v52  ;;  %v807_v42 = vpop.permute.xlu1 %806 }
  0x9c   : > { %v4312_v25 = vcombine.low %v1024_v21, %v1024_v21  ;;  %v4313_v27 = vcombine.high %v1024_v21, %v1024_v21  ;;  %1269 = vst.msk [vmem:[#allocation2 + $0x18] sm:$0xf] %vm1262_vm5, %v4314_v20  ;;  %1270 = vst.msk [vmem:[#allocation2 + $0x1c] sm:$0xf] %vm1262_vm5, %v4315_v6  ;;  %v975_v0 = vsel %vm963_vm3, %v5523_v19, %v807_v42 }
  0x9d   : > { %v805_v1 = vpop.permute.xlu0 %804  ;;  %v5130_v28 = vld [vmem:[#allocation2] sm:$0xff]  }
  0x9e   : > { %1267 = vst.msk [vmem:[#allocation2 + $0x10] sm:$0xf] %vm1262_vm5, %v4312_v25  ;;  %1268 = vst.msk [vmem:[#allocation2 + $0x14] sm:$0xf] %vm1262_vm5, %v4313_v27  ;;  %4778 = vmatprep.mubr.msk.bf16.mxu0 %vm1492_vm6, %v5130_v28  ;;  %v973_v33 = vsel %vm963_vm3, %v5509_v7, %v805_v1 }
  0x9f   : > { %v920_v32 = vpop.permute.xlu1 %919 }
  0xa0   : > { %v1030_v35 = vsel %vm1018_vm4, %v975_v0, %v920_v32 }
  0xa1   : > { %v918_v36 = vpop.permute.xlu0 %917  ;;  %v5131_v13 = vld [vmem:[#allocation2 + $0x8] sm:$0xff]   ;;  %v4318_v43 = vcombine.low %v1030_v35, %v1030_v35  ;;  %v4319_v45 = vcombine.high %v1030_v35, %v1030_v35 }
  0xa2   : > { %v1028_v47 = vsel %vm1018_vm4, %v973_v33, %v918_v36  ;;  %4779 = vmatmul.mubr.msk.bf16.vlgmr.msra.gmra.mxu0 %vm1492_vm6, %v5131_v13 }
  0xa3   : > { %v4316_v48 = vcombine.low %v1028_v47, %v1028_v47  ;;  %v4317_v50 = vcombine.high %v1028_v47, %v1028_v47  ;;  %1273 = vst.msk [vmem:[#allocation2 + $0x28] sm:$0xf] %vm1262_vm5, %v4318_v43  ;;  %1274 = vst.msk [vmem:[#allocation2 + $0x2c] sm:$0xf] %vm1262_vm5, %v4319_v45  ;;  %v811_v7 = vpop.permute.xlu1 %810  ;;  %4877 = vmatpush3.bf16.msra.mxu0 %v2759_v40  ;;  %v5133_v46 = vld [vmem:[#allocation2 + $0x18] sm:$0xff]  }
  0xa4   : > { %v979_v18 = vsel %vm963_vm3, %v5541_v38, %v811_v7 }
  0xa5   : > { %1271 = vst.msk [vmem:[#allocation2 + $0x20] sm:$0xf] %vm1262_vm5, %v4316_v48  ;;  %1272 = vst.msk [vmem:[#allocation2 + $0x24] sm:$0xf] %vm1262_vm5, %v4317_v50  ;;  %v809_v19 = vpop.permute.xlu0 %808  ;;  %v5132_v26 = vld [vmem:[#allocation2 + $0x10] sm:$0xff]  }
  0xa6   : > { %4782 = vmatprep.mubr.msk.bf16.mxu0 %vm1492_vm6, %v5132_v26  ;;  %v977_v54 = vsel %vm963_vm3, %v5533_v29, %v809_v19 }
  0xa7   : > { %v924_v52 = vpop.permute.xlu1 %923 }
  0xa8   : > { %v1034_v56 = vsel %vm1018_vm4, %v979_v18, %v924_v52 }
  0xa9   : > { %v922_v44 = vpop.permute.xlu0 %921  ;;  %v4322_v57 = vcombine.low %v1034_v56, %v1034_v56  ;;  %v4323_v58 = vcombine.high %v1034_v56, %v1034_v56 }
  0xaa   : > { %v1032_v60 = vsel %vm1018_vm4, %v977_v54, %v922_v44  ;;  %4783 = vmatmul.mubr.msk.bf16.gmra.mxu0 %vm1492_vm6, %v5133_v46  ;;  %v5135_v5 = vld [vmem:[#allocation2 + $0x28] sm:$0xff]  }
  0xab   : > { %v4320_v62 = vcombine.low %v1032_v60, %v1032_v60  ;;  %v4321_v2 = vcombine.high %v1032_v60, %v1032_v60  ;;  %1277 = vst.msk [vmem:[#allocation2 + $0x38] sm:$0xf] %vm1262_vm5, %v4322_v57  ;;  %1278 = vst.msk [vmem:[#allocation2 + $0x3c] sm:$0xf] %vm1262_vm5, %v4323_v58  ;;  %v815_v38 = vpop.permute.xlu1 %814 }
  0xac   : > { %v5134_v63 = vld [vmem:[#allocation2 + $0x20] sm:$0xff]   ;;  %v983_v4 = vsel %vm963_vm3, %v5564_v59, %v815_v38 }
  0xad   : > { %1275 = vst.msk [vmem:[#allocation2 + $0x30] sm:$0xf] %vm1262_vm5, %v4320_v62  ;;  %1276 = vst.msk [vmem:[#allocation2 + $0x34] sm:$0xf] %vm1262_vm5, %v4321_v2  ;;  %v813_v29 = vpop.permute.xlu0 %812  ;;  %4786 = vmatprep.mubr.msk.bf16.mxu0 %vm1492_vm6, %v5134_v63 }
  0xae   : > { %v981_v51 = vsel %vm963_vm3, %v5552_v49, %v813_v29 }
  0xaf   : > { %v928_v31 = vpop.permute.xlu1 %927 }
  0xb0   : > { %v1038_v8 = vsel %vm1018_vm4, %v983_v4, %v928_v31 }
  0xb1   : > { %v926_v12 = vpop.permute.xlu0 %925  ;;  %v4326_v15 = vcombine.low %v1038_v8, %v1038_v8  ;;  %v4327_v16 = vcombine.high %v1038_v8, %v1038_v8 }
  0xb2   : > { %v1036_v20 = vsel %vm1018_vm4, %v981_v51, %v926_v12  ;;  %4787 = vmatmul.mubr.msk.bf16.gmra.mxu0 %vm1492_vm6, %v5135_v5  ;;  %v5137_v32 = vld [vmem:[#allocation2 + $0x38] sm:$0xff]  }
  0xb3   : > { %v4324_v6 = vcombine.low %v1036_v20, %v1036_v20  ;;  %v4325_v21 = vcombine.high %v1036_v20, %v1036_v20  ;;  %1281 = vst.msk [vmem:[#allocation2 + $0x48] sm:$0xf] %vm1262_vm5, %v4326_v15  ;;  %1282 = vst.msk [vmem:[#allocation2 + $0x4c] sm:$0xf] %vm1262_vm5, %v4327_v16  ;;  %v819_v59 = vpop.permute.xlu1 %818 }
  0xb4   : > { %v5136_v25 = vld [vmem:[#allocation2 + $0x30] sm:$0xff]   ;;  %v987_v27 = vsel %vm963_vm3, %v5578_v10, %v819_v59 }
  0xb5   : > { %1279 = vst.msk [vmem:[#allocation2 + $0x40] sm:$0xf] %vm1262_vm5, %v4324_v6  ;;  %1280 = vst.msk [vmem:[#allocation2 + $0x44] sm:$0xf] %vm1262_vm5, %v4325_v21  ;;  %v817_v49 = vpop.permute.xlu0 %816  ;;  %4790 = vmatprep.mubr.msk.bf16.mxu0 %vm1492_vm6, %v5136_v25 }
  0xb6   : > { %v985_v1 = vsel %vm963_vm3, %v5572_v3, %v817_v49 }
  0xb7   : > { %v932_v42 = vpop.permute.xlu1 %931 }
  0xb8   : > { %v1042_v28 = vsel %vm1018_vm4, %v987_v27, %v932_v42 }
  0xb9   : > { %v930_v0 = vpop.permute.xlu0 %929  ;;  %v4330_v33 = vcombine.low %v1042_v28, %v1042_v28  ;;  %v4331_v35 = vcombine.high %v1042_v28, %v1042_v28 }
  0xba   : > { %v1040_v36 = vsel %vm1018_vm4, %v985_v1, %v930_v0  ;;  %4791 = vmatmul.mubr.msk.bf16.gmra.mxu0 %vm1492_vm6, %v5137_v32  ;;  %v5139_v19 = vld [vmem:[#allocation2 + $0x48] sm:$0xff]  }
  0xbb   : > { %v4328_v13 = vcombine.low %v1040_v36, %v1040_v36  ;;  %v4329_v40 = vcombine.high %v1040_v36, %v1040_v36  ;;  %1285 = vst.msk [vmem:[#allocation2 + $0x58] sm:$0xf] %vm1262_vm5, %v4330_v33  ;;  %1286 = vst.msk [vmem:[#allocation2 + $0x5c] sm:$0xf] %vm1262_vm5, %v4331_v35  ;;  %v823_v10 = vpop.permute.xlu1 %822 }
  0xbc   : > { %v5138_v43 = vld [vmem:[#allocation2 + $0x40] sm:$0xff]   ;;  %v991_v45 = vsel %vm963_vm3, %v5604_v34, %v823_v10 }
  0xbd   : > { %1283 = vst.msk [vmem:[#allocation2 + $0x50] sm:$0xf] %vm1262_vm5, %v4328_v13  ;;  %1284 = vst.msk [vmem:[#allocation2 + $0x54] sm:$0xf] %vm1262_vm5, %v4329_v40  ;;  %v821_v3 = vpop.permute.xlu0 %820  ;;  %4794 = vmatprep.mubr.msk.bf16.mxu0 %vm1492_vm6, %v5138_v43 }
  0xbe   : > { %v989_v48 = vsel %vm963_vm3, %v5592_v23, %v821_v3 }
  0xbf   : > { %v936_v47 = vpop.permute.xlu1 %935 }
  0xc0   : > { %v1046_v50 = vsel %vm1018_vm4, %v991_v45, %v936_v47 }
  0xc1   : > { %v934_v7 = vpop.permute.xlu0 %933  ;;  %v4334_v26 = vcombine.low %v1046_v50, %v1046_v50  ;;  %v4335_v18 = vcombine.high %v1046_v50, %v1046_v50 }
  0xc2   : > { %v1044_v52 = vsel %vm1018_vm4, %v989_v48, %v934_v7  ;;  %4795 = vmatmul.mubr.msk.bf16.gmra.mxu0 %vm1492_vm6, %v5139_v19  ;;  %v5141_v2 = vld [vmem:[#allocation2 + $0x58] sm:$0xff]  }
  0xc3   : > { %v4332_v54 = vcombine.low %v1044_v52, %v1044_v52  ;;  %v4333_v56 = vcombine.high %v1044_v52, %v1044_v52  ;;  %1289 = vst.msk [vmem:[#allocation2 + $0x68] sm:$0xf] %vm1262_vm5, %v4334_v26  ;;  %1290 = vst.msk [vmem:[#allocation2 + $0x6c] sm:$0xf] %vm1262_vm5, %v4335_v18  ;;  %v827_v34 = vpop.permute.xlu1 %826 }
  0xc4   : > { %v5140_v44 = vld [vmem:[#allocation2 + $0x50] sm:$0xff]   ;;  %v995_v46 = vsel %vm963_vm3, %v5627_v53, %v827_v34 }
  0xc5   : > { %1287 = vst.msk [vmem:[#allocation2 + $0x60] sm:$0xf] %vm1262_vm5, %v4332_v54  ;;  %1288 = vst.msk [vmem:[#allocation2 + $0x64] sm:$0xf] %vm1262_vm5, %v4333_v56  ;;  %v825_v23 = vpop.permute.xlu0 %824  ;;  %4798 = vmatprep.mubr.msk.bf16.mxu0 %vm1492_vm6, %v5140_v44 }
  0xc6   : > { %v993_v58 = vsel %vm963_vm3, %v5612_v41, %v825_v23 }
  0xc7   : > { %v940_v57 = vpop.permute.xlu1 %939 }
  0xc8   : > { %v1050_v60 = vsel %vm1018_vm4, %v995_v46, %v940_v57 }
  0xc9   : > { %v938_v62 = vpop.permute.xlu0 %937  ;;  %v4338_v38 = vcombine.low %v1050_v60, %v1050_v60  ;;  %v4339_v63 = vcombine.high %v1050_v60, %v1050_v60 }
  0xca   : > { %v1048_v29 = vsel %vm1018_vm4, %v993_v58, %v938_v62  ;;  %4799 = vmatmul.mubr.msk.bf16.gmra.mxu0 %vm1492_vm6, %v5141_v2  ;;  %v5144_v15 = vld [vmem:[#allocation2 + $0x68] sm:$0xff]  }
  0xcb   : > { %v4336_v4 = vcombine.low %v1048_v29, %v1048_v29  ;;  %v4337_v31 = vcombine.high %v1048_v29, %v1048_v29  ;;  %1293 = vst.msk [vmem:[#allocation2 + $0x78] sm:$0xf] %vm1262_vm5, %v4338_v38  ;;  %1294 = vst.msk [vmem:[#allocation2 + $0x7c] sm:$0xf] %vm1262_vm5, %v4339_v63  ;;  %v839_v53 = vpop.permute.xlu1 %838 }
  0xcc   : > { %v5142_v51 = vld [vmem:[#allocation2 + $0x60] sm:$0xff]   ;;  %v1007_v25 = vsel %vm963_vm3, %v5650_v14, %v839_v53 }
  0xcd   : > { %1291 = vst.msk [vmem:[#allocation2 + $0x70] sm:$0xf] %vm1262_vm5, %v4336_v4  ;;  %1292 = vst.msk [vmem:[#allocation2 + $0x74] sm:$0xf] %vm1262_vm5, %v4337_v31  ;;  %v837_v41 = vpop.permute.xlu0 %836  ;;  %4802 = vmatprep.mubr.msk.bf16.mxu0 %vm1492_vm6, %v5142_v51 }
  0xce   : > { %v1005_v12 = vsel %vm963_vm3, %v5655_v17, %v837_v41 }
  0xcf   : > { %v829_v8 = vpop.permute.xlu1 %828 }
  0xd0   : > { %v997_v0 = vsel %vm963_vm3, %v5637_v61, %v829_v8  ;;  %v5155_v8 = vld [vmem:[#allocation2 + $0xc] sm:$0xff]  }
  0xd1   : > { %v950_v5 = vpop.permute.xlu0 %949 }
  0xd2   : > { %v1060_v16 = vsel %vm1018_vm4, %v1005_v12, %v950_v5  ;;  %4803 = vmatmul.mubr.msk.bf16.gmra.mxu0 %vm1492_vm6, %v5144_v15  ;;  %v5147_v33 = vld [vmem:[#allocation2 + $0x78] sm:$0xff]  }
  0xd3   : > { %v4348_v20 = vcombine.low %v1060_v16, %v1060_v16  ;;  %v4349_v6 = vcombine.high %v1060_v16, %v1060_v16  ;;  %v831_v21 = vpop.permute.xlu1 %830 }
  0xd4   : > { %v5146_v59 = vld [vmem:[#allocation2 + $0x70] sm:$0xff]   ;;  %v999_v1 = vsel %vm963_vm3, %v5678_v39, %v831_v21 }
  0xd5   : > { %1303 = vst.msk [vmem:[#allocation2 + $0xa0] sm:$0xf] %vm1262_vm5, %v4348_v20  ;;  %1304 = vst.msk [vmem:[#allocation2 + $0xa4] sm:$0xf] %vm1262_vm5, %v4349_v6  ;;  %v952_v49 = vpop.permute.xlu0 %951  ;;  %4806 = vmatprep.mubr.msk.bf16.mxu0 %vm1492_vm6, %v5146_v59 }
  0xd6   : > { %v1062_v17 = vsel %vm1018_vm4, %v1007_v25, %v952_v49  ;;  %v5159_v25 = vld [vmem:[#allocation2 + $0x18] sm:$0xff]   ;;  %v5400_v49 = vld [vmem:[%s5493_s8 + $0xd0] sm:$0xff]  }
  0xd7   : > { %v4350_v27 = vcombine.low %v1062_v17, %v1062_v17  ;;  %v4351_v42 = vcombine.high %v1062_v17, %v1062_v17  ;;  %v944_v28 = vpop.permute.xlu1 %943 }
  0xd8   : > { %v1054_v14 = vsel %vm1018_vm4, %v999_v1, %v944_v28  ;;  %v5161_v28 = vld [vmem:[#allocation2 + $0x1c] sm:$0xff]  }
  0xd9   : > { %1305 = vst.msk [vmem:[#allocation2 + $0xa8] sm:$0xf] %vm1262_vm5, %v4350_v27  ;;  %1306 = vst.msk [vmem:[#allocation2 + $0xac] sm:$0xf] %vm1262_vm5, %v4351_v42  ;;  %v942_v32 = vpop.permute.xlu0 %941  ;;  %v4342_v35 = vcombine.low %v1054_v14, %v1054_v14  ;;  %v4343_v36 = vcombine.high %v1054_v14, %v1054_v14  ;;  %v5160_v27 = vld [vmem:[#allocation2 + $0x14] sm:$0xff]   ;;  %v5163_v14 = vld [vmem:[#allocation2 + $0x28] sm:$0xff]  }
  0xda   : > { %v1052_v13 = vsel %vm1018_vm4, %v997_v0, %v942_v32  ;;  %4807 = vmatmul.mubr.msk.bf16.gmra.mxu0 %vm1492_vm6, %v5147_v33  ;;  %v5162_v0 = vld [vmem:[#allocation2 + $0x20] sm:$0xff]   ;;  %v5165_v33 = vld [vmem:[#allocation2 + $0x2c] sm:$0xff]  }
  0xdb   : > { %v4340_v40 = vcombine.low %v1052_v13, %v1052_v13  ;;  %v4341_v10 = vcombine.high %v1052_v13, %v1052_v13  ;;  %1297 = vst.msk [vmem:[#allocation2 + $0x88] sm:$0xf] %vm1262_vm5, %v4342_v35  ;;  %1298 = vst.msk [vmem:[#allocation2 + $0x8c] sm:$0xf] %vm1262_vm5, %v4343_v36  ;;  %v843_v61 = vpop.permute.xlu1 %842  ;;  %v5164_v32 = vld [vmem:[#allocation2 + $0x24] sm:$0xff]   ;;  %v5166_v35 = vld [vmem:[#allocation2 + $0x30] sm:$0xff]  }
  0xdc   : > { %v5148_v39 = vld [vmem:[#allocation2 + $0xa0] sm:$0xff]   ;;  %v1011_v54 = vsel %vm963_vm3, %v5713_v9, %v843_v61  ;;  %v5167_v36 = vld [vmem:[#allocation2 + $0x38] sm:$0xff]   ;;  %v5171_v61 = vld [vmem:[#allocation2 + $0x48] sm:$0xff]  }
  0xdd   : > { %1295 = vst.msk [vmem:[#allocation2 + $0x80] sm:$0xf] %vm1262_vm5, %v4340_v40  ;;  %1296 = vst.msk [vmem:[#allocation2 + $0x84] sm:$0xf] %vm1262_vm5, %v4341_v10  ;;  %v841_v43 = vpop.permute.xlu0 %840  ;;  %4818 = vmatprep.mubr.msk.bf16.mxu1 %vm1492_vm6, %v5148_v39  ;;  %v5168_v13 = vld [vmem:[#allocation2 + $0x34] sm:$0xff]   ;;  %v5169_v40 = vld [vmem:[#allocation2 + $0x3c] sm:$0xff]  }
  0xde   : > { %v1009_v47 = vsel %vm963_vm3, %v5664_v24, %v841_v43  ;;  %v5170_v10 = vld [vmem:[#allocation2 + $0x40] sm:$0xff]   ;;  %v5173_v43 = vld [vmem:[#allocation2 + $0x4c] sm:$0xff]  }
  0xdf   : > { %v833_v3 = vpop.permute.xlu1 %832  ;;  %v5172_v39 = vld [vmem:[#allocation2 + $0x44] sm:$0xff]  }
  0xe0   : > { %v5149_v45 = vld [vmem:[#allocation2 + $0xa8] sm:$0xff]   ;;  %v1001_v9 = vsel %vm963_vm3, %v5699_v55, %v833_v3  ;;  %v5174_v3 = vld [vmem:[#allocation2 + $0x50] sm:$0xff]  }
  0xe1   : > { %v954_v48 = vpop.permute.xlu0 %953  ;;  %4819 = vmatmul.mubr.msk.bf16.vlgmr.msra.gmra.mxu1 %vm1492_vm6, %v5149_v45  ;;  %v5175_v45 = vld [vmem:[#allocation2 + $0x58] sm:$0xff]  }
  0xe2   : > { %v1064_v50 = vsel %vm1018_vm4, %v1009_v47, %v954_v48  ;;  %v5151_v26 = vld [vmem:[#allocation2 + $0x88] sm:$0xff]   ;;  %4827 = vmatpush3.bf16.msra.mxu1 %v5791_v30  ;;  %v5176_v47 = vld [vmem:[#allocation2 + $0x54] sm:$0xff]   ;;  %v5177_v48 = vld [vmem:[#allocation2 + $0x5c] sm:$0xff]  }
  0xe3   : > { %v4352_v7 = vcombine.low %v1064_v50, %v1064_v50  ;;  %v4353_v19 = vcombine.high %v1064_v50, %v1064_v50  ;;  %v835_v18 = vpop.permute.xlu1 %834  ;;  %v5178_v50 = vld [vmem:[#allocation2 + $0x60] sm:$0xff]  }
  0xe4   : > { %v5150_v52 = vld [vmem:[#allocation2 + $0x80] sm:$0xff]   ;;  %v1003_v30 = vsel %vm963_vm3, %v5735_v37, %v835_v18  ;;  %v5182_v18 = vld [vmem:[#allocation2 + $0x70] sm:$0xff]  }
  0xe5   : > { %1307 = vst.msk [vmem:[#allocation2 + $0xb0] sm:$0xf] %vm1262_vm5, %v4352_v7  ;;  %1308 = vst.msk [vmem:[#allocation2 + $0xb4] sm:$0xf] %vm1262_vm5, %v4353_v19  ;;  %v956_v24 = vpop.permute.xlu0 %955  ;;  %4810 = vmatprep.mubr.msk.bf16.mxu0 %vm1492_vm6, %v5150_v52  ;;  %v5179_v7 = vld [vmem:[#allocation2 + $0x68] sm:$0xff]   ;;  %v5183_v52 = vld [vmem:[#allocation2 + $0x78] sm:$0xff]  }
  0xe6   : > { %v1066_v56 = vsel %vm1018_vm4, %v1011_v54, %v956_v24  ;;  %4811 = vmatmul.mubr.msk.bf16.gmra.mxu0 %vm1492_vm6, %v5151_v26  ;;  %v5180_v19 = vld [vmem:[#allocation2 + $0x64] sm:$0xff]   ;;  %v5181_v26 = vld [vmem:[#allocation2 + $0x6c] sm:$0xff]   ;;  %v5184_v54 = vld [vmem:[#allocation2 + $0x74] sm:$0xff]  }
  0xe7   : > { %v4354_v34 = vcombine.low %v1066_v56, %v1066_v56  ;;  %v4355_v44 = vcombine.high %v1066_v56, %v1066_v56  ;;  %v948_v23 = vpop.permute.xlu1 %947  ;;  %v5185_v24 = vld [vmem:[#allocation2 + $0x7c] sm:$0xff]  }
  0xe8   : > { %v1058_v46 = vsel %vm1018_vm4, %v1003_v30, %v948_v23  ;;  %v5186_v56 = vld [vmem:[#allocation2 + $0x80] sm:$0xff]  }
  0xe9   : > { %1309 = vst.msk [vmem:[#allocation2 + $0xb8] sm:$0xf] %vm1262_vm5, %v4354_v34  ;;  %1310 = vst.msk [vmem:[#allocation2 + $0xbc] sm:$0xf] %vm1262_vm5, %v4355_v44  ;;  %v946_v57 = vpop.permute.xlu0 %945  ;;  %v4346_v58 = vcombine.low %v1058_v46, %v1058_v46  ;;  %v4347_v60 = vcombine.high %v1058_v46, %v1058_v46  ;;  %v5187_v34 = vld [vmem:[#allocation2 + $0x88] sm:$0xff]  }
  0xea   : > { %v1056_v62 = vsel %vm1018_vm4, %v1001_v9, %v946_v57  ;;  %v5188_v44 = vld [vmem:[#allocation2 + $0x84] sm:$0xff]  }
  0xeb   : > { %v4344_v2 = vcombine.low %v1056_v62, %v1056_v62  ;;  %v4345_v38 = vcombine.high %v1056_v62, %v1056_v62  ;;  %1301 = vst.msk [vmem:[#allocation2 + $0x98] sm:$0xf] %vm1262_vm5, %v4346_v58  ;;  %1302 = vst.msk [vmem:[#allocation2 + $0x9c] sm:$0xf] %vm1262_vm5, %v4347_v60  ;;  %v958_v37 = vpop.permute.xlu1 %957  ;;  %v5194_v58 = vld [vmem:[#allocation2 + $0xa0] sm:$0xff]   ;;  %v5195_v60 = vld [vmem:[#allocation2 + $0xa8] sm:$0xff]  }
  0xec   : > { %v5152_v63 = vld [vmem:[#allocation2 + $0xb0] sm:$0xff]   ;;  %v5196_v62 = vld [vmem:[#allocation2 + $0xa4] sm:$0xff]  }
  0xed   : > { %1299 = vst.msk [vmem:[#allocation2 + $0x90] sm:$0xf] %vm1262_vm5, %v4344_v2  ;;  %1300 = vst.msk [vmem:[#allocation2 + $0x94] sm:$0xf] %vm1262_vm5, %v4345_v38  ;;  %v845_v55 = vpop.permute.xlu0 %844  ;;  %4822 = vmatprep.mubr.msk.bf16.mxu1 %vm1492_vm6, %v5152_v63  ;;  %v5197_v2 = vld [vmem:[#allocation2 + $0xac] sm:$0xff]  }
  0xee   : > { %v1013_v29 = vsel %vm963_vm3, %v5722_v22, %v845_v55  ;;  %v5198_v38 = vld [vmem:[#allocation2 + $0xb0] sm:$0xff]  }
  0xef   : > { %v1068_v4 = vsel %vm1018_vm4, %v1013_v29, %v958_v37  ;;  %v960_v41 = vpop.permute.xlu1 %959 }
  0xf0   : > { %v4356_v31 = vcombine.low %v1068_v4, %v1068_v4  ;;  %v4357_v53 = vcombine.high %v1068_v4, %v1068_v4  ;;  %v5154_v51 = vld [vmem:[#allocation2 + $0xb8] sm:$0xff]  }
  0xf1   : > { %v847_v12 = vpop.permute.xlu0 %846  ;;  %4823 = vmatmul.mubr.msk.bf16.gmra.mxu1 %vm1492_vm6, %v5154_v51  ;;  %v5199_v37 = vld [vmem:[#allocation2 + $0xb8] sm:$0xff]  }
  0xf2   : > { %1311 = vst.msk [vmem:[#allocation2 + $0xc0] sm:$0xf] %vm1262_vm5, %v4356_v31  ;;  %1312 = vst.msk [vmem:[#allocation2 + $0xc4] sm:$0xf] %vm1262_vm5, %v4357_v53  ;;  %v1015_v22 = vsel %vm963_vm3, %v5759_v11, %v847_v12  ;;  %4828 = vmatprep.mubr.msk.bf16.mxu1 %vm1492_vm6, %v5155_v8  ;;  %v5158_v5 = vld [vmem:[#allocation2 + $0x98] sm:$0xff]  }
  0xf3   : > { %v1070_v15 = vsel %vm1018_vm4, %v1015_v22, %v960_v41  ;;  %v962_v21 = vpop.permute.xlu1 %961  ;;  %v5191_v9 = vld [vmem:[#allocation2 + $0x98] sm:$0xff]  }
  0xf4   : > { %v5156_v16 = vld [vmem:[#allocation2 + $0x90] sm:$0xff]   ;;  %v4358_v20 = vcombine.low %v1070_v15, %v1070_v15  ;;  %v4359_v6 = vcombine.high %v1070_v15, %v1070_v15  ;;  %v5193_v57 = vld [vmem:[#allocation2 + $0x9c] sm:$0xff]  }
  0xf5   : > { %v849_v59 = vpop.permute.xlu0 %848  ;;  %4814 = vmatprep.mubr.msk.bf16.mxu0 %vm1492_vm6, %v5156_v16  ;;  %v5189_v30 = vld [vmem:[#allocation2 + $0x8c] sm:$0xff]   ;;  %v5192_v46 = vld [vmem:[#allocation2 + $0x94] sm:$0xff]  }
  0xf6   : > { %1313 = vst.msk [vmem:[#allocation2 + $0xc8] sm:$0xf] %vm1262_vm5, %v4358_v20  ;;  %1314 = vst.msk [vmem:[#allocation2 + $0xcc] sm:$0xf] %vm1262_vm5, %v4359_v6  ;;  %v1017_v11 = vsel %vm963_vm3, %v5400_v49, %v849_v59  ;;  %4815 = vmatmul.mubr.msk.bf16.gmra.mxu0 %vm1492_vm6, %v5158_v5  ;;  %v5190_v23 = vld [vmem:[#allocation2 + $0x90] sm:$0xff]  }
  0xf7   : > { %v1072_v17 = vsel %vm1018_vm4, %v1017_v11, %v962_v21  ;;  %4878 = vmatprep.mubr.msk.bf16.mxu0 %vm1492_vm6, %v5159_v25  ;;  %v5200_v63 = vld [vmem:[#allocation2 + $0xb4] sm:$0xff]  }
  0xf8   : > { %v4360_v42 = vcombine.low %v1072_v17, %v1072_v17  ;;  %v4361_v1 = vcombine.high %v1072_v17, %v1072_v17 }
  0xf9   : > { %4829 = vmatmul.mubr.msk.bf16.vlgmr.msra.gmra.mxu1 %vm1492_vm6, %v5160_v27  ;;  %v5201_v55 = vld [vmem:[#allocation2 + $0xbc] sm:$0xff]  }
  0xfa   : > { %1315 = vst.msk [vmem:[#allocation2 + $0xd0] sm:$0xf] %vm1262_vm5, %v4360_v42  ;;  %1316 = vst.msk [vmem:[#allocation2 + $0xd4] sm:$0xf] %vm1262_vm5, %v4361_v1  ;;  %4832 = vmatprep.mubr.msk.bf16.mxu1 %vm1492_vm6, %v5161_v28  ;;  %v5202_v29 = vld [vmem:[#allocation2 + $0xc0] sm:$0xff]  }
  0xfd   : > { %v5204_v4 = vld [vmem:[#allocation2 + $0xc8] sm:$0xff]  }
  0xfe   : > { %4879 = vmatmul.mubr.msk.bf16.vlgmr.msra.gmra.mxu0 %vm1492_vm6, %v5162_v0  ;;  %v5203_v31 = vld [vmem:[#allocation2 + $0xc4] sm:$0xff]  }
  0xff   : > { %4882 = vmatprep.mubr.msk.bf16.mxu0 %vm1492_vm6, %v5163_v14 }
 0x101   : > { %4833 = vmatmul.mubr.msk.bf16.gmra.mxu1 %vm1492_vm6, %v5164_v32  ;;  %v5205_v53 = vld [vmem:[#allocation2 + $0xd0] sm:$0xff]  }
 0x102   : > { %4836 = vmatprep.mubr.msk.bf16.mxu1 %vm1492_vm6, %v5165_v33 }
 0x106   : > { %4883 = vmatmul.mubr.msk.bf16.gmra.mxu0 %vm1492_vm6, %v5166_v35 }
 0x107   : > { %4886 = vmatprep.mubr.msk.bf16.mxu0 %vm1492_vm6, %v5167_v36 }
 0x109   : > { %4837 = vmatmul.mubr.msk.bf16.gmra.mxu1 %vm1492_vm6, %v5168_v13 }
 0x10a   : > { %4840 = vmatprep.mubr.msk.bf16.mxu1 %vm1492_vm6, %v5169_v40 }
 0x10e   : > { %4887 = vmatmul.mubr.msk.bf16.gmra.mxu0 %vm1492_vm6, %v5170_v10  ;;  %v3132_v10 = vlaneseq }
 0x10f   : > { %4890 = vmatprep.mubr.msk.bf16.mxu0 %vm1492_vm6, %v5171_v61 }
 0x111   : > { %4841 = vmatmul.mubr.msk.bf16.gmra.mxu1 %vm1492_vm6, %v5172_v39  ;;  %v6072_v39 = vshrl.u32 %v3132_v10, 7 }
 0x112   : > { %4844 = vmatprep.mubr.msk.bf16.mxu1 %vm1492_vm6, %v5173_v43 }
 0x113   : > { %7399 = vst [vmem:[#allocation9_spill] sm:$0xff] %v6072_v39  ;;  %v3138_v43 = vsub.s32 1, %v6072_v39 }
 0x116   : > { %4891 = vmatmul.mubr.msk.bf16.gmra.mxu0 %vm1492_vm6, %v5174_v3 }
 0x117   : > { %4894 = vmatprep.mubr.msk.bf16.mxu0 %vm1492_vm6, %v5175_v45  ;;  %v6080_v45 = vld [vmem:[%s7328_s3] sm:$0x7] }
 0x118   : > { %7400 = vst [vmem:[#allocation10_spill] sm:$0xff] %v6080_v45 }
 0x119   : > { %4845 = vmatmul.mubr.msk.bf16.gmra.mxu1 %vm1492_vm6, %v5176_v47  ;;  %v6083_v47 = vrot.slane %v6080_v45, %v3138_v43 }
 0x11a   : > { %4848 = vmatprep.mubr.msk.bf16.mxu1 %vm1492_vm6, %v5177_v48  ;;  %v7334_v48 = vmov 0.0  }
 0x11b   : > { %7401 = vst [vmem:[#allocation11_spill] sm:$0xff] %v6083_v47  ;;  %4961 = vmatprep.subr.mxu0 %v7334_v48 }
 0x11e   : > { %4895 = vmatmul.mubr.msk.bf16.gmra.mxu0 %vm1492_vm6, %v5178_v50 }
 0x11f   : > { %4898 = vmatprep.mubr.msk.bf16.mxu0 %vm1492_vm6, %v5179_v7 }
 0x121   : > { %4849 = vmatmul.mubr.msk.bf16.gmra.mxu1 %vm1492_vm6, %v5180_v19 }
 0x122   : > { %4852 = vmatprep.mubr.msk.bf16.mxu1 %vm1492_vm6, %v5181_v26 }
 0x126   : > { %4899 = vmatmul.mubr.msk.bf16.gmra.mxu0 %vm1492_vm6, %v5182_v18 }
 0x127   : > { %4902 = vmatprep.mubr.msk.bf16.mxu0 %vm1492_vm6, %v5183_v52 }
 0x129   : > { %4853 = vmatmul.mubr.msk.bf16.gmra.mxu1 %vm1492_vm6, %v5184_v54 }
 0x12a   : > { %4856 = vmatprep.mubr.msk.bf16.mxu1 %vm1492_vm6, %v5185_v24 }
 0x12e   : > { %4903 = vmatmul.mubr.msk.bf16.gmra.mxu0 %vm1492_vm6, %v5186_v56 }
 0x12f   : > { %4906 = vmatprep.mubr.msk.bf16.mxu0 %vm1492_vm6, %v5187_v34 }
 0x131   : > { %4857 = vmatmul.mubr.msk.bf16.gmra.mxu1 %vm1492_vm6, %v5188_v44 }
 0x132   : > { %4860 = vmatprep.mubr.msk.bf16.mxu1 %vm1492_vm6, %v5189_v30 }
 0x136   : > { %4907 = vmatmul.mubr.msk.bf16.gmra.mxu0 %vm1492_vm6, %v5190_v23 }
 0x137   : > { %4910 = vmatprep.mubr.msk.bf16.mxu0 %vm1492_vm6, %v5191_v9 }
 0x139   : > { %4861 = vmatmul.mubr.msk.bf16.gmra.mxu1 %vm1492_vm6, %v5192_v46 }
 0x13a   : > { %4864 = vmatprep.mubr.msk.bf16.mxu1 %vm1492_vm6, %v5193_v57 }
 0x13e   : > { %4911 = vmatmul.mubr.msk.bf16.gmra.mxu0 %vm1492_vm6, %v5194_v58 }
 0x13f   : > { %4914 = vmatprep.mubr.msk.bf16.mxu0 %vm1492_vm6, %v5195_v60 }
 0x141   : > { %4865 = vmatmul.mubr.msk.bf16.gmra.mxu1 %vm1492_vm6, %v5196_v62 }
 0x142   : > { %4868 = vmatprep.mubr.msk.bf16.mxu1 %vm1492_vm6, %v5197_v2 }
 0x146   : > { %4915 = vmatmul.mubr.msk.bf16.gmra.mxu0 %vm1492_vm6, %v5198_v38 }
 0x147   : > { %4918 = vmatprep.mubr.msk.bf16.mxu0 %vm1492_vm6, %v5199_v37 }
 0x149   : > { %4869 = vmatmul.mubr.msk.bf16.gmra.mxu1 %vm1492_vm6, %v5200_v63  ;;  %v3142_v63 = vsub.s32 2, %v6072_v39 }
 0x14a   : > { %4872 = vmatprep.mubr.msk.bf16.mxu1 %vm1492_vm6, %v5201_v55 }
 0x14e   : > { %4919 = vmatmul.mubr.msk.bf16.gmra.mxu0 %vm1492_vm6, %v5202_v29 }
 0x14f   : > { %4922 = vmatprep.mubr.msk.bf16.mxu0 %vm1492_vm6, %v5204_v4 }
 0x151   : > { %4873 = vmatmul.mubr.msk.bf16.gmra.mxu1 %vm1492_vm6, %v5203_v31 }
 0x152   : > { %3211 = vmatprep.mubr.f32.mxu1 %v6083_v47 }
 0x156   : > { %4923 = vmatmul.mubr.msk.bf16.gmra.mxu0 %vm1492_vm6, %v5205_v53  ;;  %v6130_v53 = vrot.slane %v6080_v45, %v3142_v63 }
 0x157   : > { %4993 = vmatprep.mubr.msk.f32.mxu0 %vm5428_vm7, %v7334_v48 }
 0x158   : > { %7419 = vst [vmem:[#allocation29_spill] sm:$0xff] %v6130_v53 }
 0x162   : > { %v4780_v51 = vpop.f32.mrf.mxu0 }
 0x164   : > { %v6016_v41 = vpop.f32.mrf.mxu0 }
 0x166   : > { %v6018_v8 = vpop.f32.mrf.mxu0 }
 0x168   : > { %v6020_v12 = vpop.f32.mrf.mxu0 }
 0x16a   : > { %v6022_v22 = vpop.f32.mrf.mxu0 }
 0x16c   : > { %v6024_v5 = vpop.f32.mrf.mxu0 }
 0x16e   : > { %v6026_v15 = vpop.f32.mrf.mxu0 }
 0x170   : > { %v6028_v16 = vpop.f32.mrf.mxu0 }
 0x172   : > { %v6030_v20 = vpop.f32.mrf.mxu0 }
 0x174   : > { %v6032_v6 = vpop.f32.mrf.mxu0 }
 0x176   : > { %v6034_v21 = vpop.f32.mrf.mxu0 }
 0x178   : > { %v6036_v59 = vpop.f32.mrf.mxu0 }
 0x17a   : > { %v6038_v25 = vpop.f32.mrf.mxu0 }
 0x17c   : > { %v6040_v49 = vpop.f32.mrf.mxu0 }
 0x17e   : > { %v6042_v11 = vpop.f32.mrf.mxu0 }
 0x180   : > { %v6044_v17 = vpop.f32.mrf.mxu0 }
 0x182   : > { %v6046_v27 = vpop.f32.mrf.mxu0 }
 0x183   : > { %7394 = vst [vmem:[#allocation4_spill] sm:$0xff] %v6046_v27 }
 0x184   : > { %v6048_v42 = vpop.f32.mrf.mxu0 }
 0x185   : > { %7395 = vst [vmem:[#allocation5_spill] sm:$0xff] %v6048_v42 }
 0x186   : > { %v6050_v1 = vpop.f32.mrf.mxu0 }
 0x187   : > { %7396 = vst [vmem:[#allocation6_spill] sm:$0xff] %v6050_v1 }
 0x188   : > { %v6052_v28 = vpop.f32.mrf.mxu0 }
 0x189   : > { %7397 = vst [vmem:[#allocation7_spill] sm:$0xff] %v6052_v28 }
 0x18a   : > { %v6054_v0 = vpop.f32.mrf.mxu0 }
 0x18c   : > { %v6056_v14 = vpop.f32.mrf.mxu0 }
 0x18d   : > { %7398 = vst [vmem:[#allocation8_spill] sm:$0xff] %v6056_v14 }
 0x18e   : > { %v6058_v32 = vpop.f32.mrf.mxu0 }
 0x190   : > { %v6060_v33 = vpop.f32.mrf.mxu0 }
 0x192   : > { %v6062_v35 = vpop.f32.mrf.mxu0 }
 0x194   : > { %v6064_v36 = vpop.f32.mrf.mxu0 }
 0x196   : > { %v6066_v13 = vpop.f32.mrf.mxu0 }
 0x198   : > { %v6068_v40 = vpop.f32.mrf.mxu0 }
 0x19a   : > { %v6070_v61 = vpop.f32.mrf.mxu0 }
 0x19c   : > { %v6075_v3 = vpop.f32.mrf.mxu0 }
 0x19e   : > { %v6087_v50 = vpop.f32.mrf.mxu0 }
 0x1a0   : > { %v6091_v19 = vpop.f32.mrf.mxu0 }
 0x1a1   : > { %v6089_v7 = vpop.f32.mrf.mxu1 }
 0x1a2   : > { %7402 = vst [vmem:[#allocation12_spill] sm:$0xff] %v6089_v7 }
 0x1a3   : > { %v6093_v26 = vpop.f32.mrf.mxu1 }
 0x1a4   : > { %7403 = vst [vmem:[#allocation13_spill] sm:$0xff] %v6093_v26 }
 0x1a5   : > { %v6097_v52 = vpop.f32.mrf.mxu1 }
 0x1a6   : > { %v6095_v18 = vpop.f32.mrf.mxu0  ;;  %7405 = vst [vmem:[#allocation15_spill] sm:$0xff] %v6097_v52 }
 0x1a7   : > { %7404 = vst [vmem:[#allocation14_spill] sm:$0xff] %v6095_v18  ;;  %v6101_v24 = vpop.f32.mrf.mxu1 }
 0x1a8   : > { %v6099_v54 = vpop.f32.mrf.mxu0  ;;  %7407 = vst [vmem:[#allocation17_spill] sm:$0xff] %v6101_v24 }
 0x1a9   : > { %7406 = vst [vmem:[#allocation16_spill] sm:$0xff] %v6099_v54 }
 0x1aa   : > { %v6103_v56 = vpop.f32.mrf.mxu0 }
 0x1ab   : > { %7408 = vst [vmem:[#allocation18_spill] sm:$0xff] %v6103_v56 }
 0x1ac   : > { %v6109_v30 = vpop.f32.mrf.mxu0 }
 0x1ad   : > { %7411 = vst [vmem:[#allocation21_spill] sm:$0xff] %v6109_v30 }
 0x1b1   : > { %v6105_v34 = vpop.f32.mrf.mxu1 }
 0x1b2   : > { %7409 = vst [vmem:[#allocation19_spill] sm:$0xff] %v6105_v34 }
 0x1b3   : > { %v6107_v44 = vpop.f32.mrf.mxu1 }
 0x1b4   : > { %7410 = vst [vmem:[#allocation20_spill] sm:$0xff] %v6107_v44 }
 0x1b5   : > { %v6111_v23 = vpop.f32.mrf.mxu1 }
 0x1b6   : > { %7412 = vst [vmem:[#allocation22_spill] sm:$0xff] %v6111_v23  ;;  %v6113_v9 = vpop.f32.mrf.mxu0 }
 0x1b7   : > { %7413 = vst [vmem:[#allocation23_spill] sm:$0xff] %v6113_v9  ;;  %v6115_v46 = vpop.f32.mrf.mxu1 }
 0x1b8   : > { %7414 = vst [vmem:[#allocation24_spill] sm:$0xff] %v6115_v46  ;;  %v6117_v57 = vpop.f32.mrf.mxu0 }
 0x1b9   : > { %7415 = vst [vmem:[#allocation25_spill] sm:$0xff] %v6117_v57  ;;  %v4830_v58 = vpop.f32.mrf.mxu1 }
 0x1ba   : > { %v6119_v60 = vpop.f32.mrf.mxu0  ;;  %v2368_v38 = vadd.f32 %v4830_v58, %v4780_v51 }
 0x1bb   : > { %7416 = vst [vmem:[#allocation26_spill] sm:$0xff] %v6119_v60  ;;  %v2175_v62 = vpop.f32.mrf.mxu1 }
 0x1bc   : > { %v6121_v2 = vpop.f32.mrf.mxu0  ;;  %v2366_v29 = vadd.f32 %v2175_v62, %v6016_v41 }
 0x1bd   : > { %7417 = vst [vmem:[#allocation27_spill] sm:$0xff] %v6121_v2  ;;  %v4831_v37 = vpop.f32.mrf.mxu1 }
 0x1be   : > { %v4880_v55 = vpop.f32.mrf.mxu0  ;;  %v2369_v43 = vadd.f32 %v4831_v37, %v6018_v8 }
 0x1bf   : > { %v6127_v4 = vadd.f32 %v4880_v55, %v2368_v38  ;;  %v2178_v31 = vpop.f32.mrf.mxu1 }
 0x1c0   : > { %v2795_v10 = vpop.f32.mrf.mxu0  ;;  %v2367_v54 = vadd.f32 %v2178_v31, %v6020_v12 }
 0x1c1   : > { %7418 = vst [vmem:[#allocation28_spill] sm:$0xff] %v6127_v4  ;;  %v6133_v51 = vadd.f32 %v2795_v10, %v2366_v29  ;;  %v4834_v58 = vpop.f32.mrf.mxu1 }
 0x1c2   : > { %v4881_v47 = vpop.f32.mrf.mxu0  ;;  %v2372_v41 = vadd.f32 %v4834_v58, %v6022_v22 }
 0x1c3   : > { %7420 = vst [vmem:[#allocation30_spill] sm:$0xff] %v6133_v51  ;;  %v6136_v30 = vadd.f32 %v4881_v47, %v2369_v43  ;;  %v2191_v48 = vpop.f32.mrf.mxu1 }
 0x1c4   : > { %v2798_v18 = vpop.f32.mrf.mxu0  ;;  %v2370_v55 = vadd.f32 %v2191_v48, %v6024_v5 }
 0x1c5   : > { %7421 = vst [vmem:[#allocation31_spill] sm:$0xff] %v6136_v30  ;;  %v6139_v62 = vadd.f32 %v2798_v18, %v2367_v54  ;;  %v4835_v38 = vpop.f32.mrf.mxu1 }
 0x1c6   : > { %v4884_v63 = vpop.f32.mrf.mxu0  ;;  %v2373_v29 = vadd.f32 %v4835_v38, %v6026_v15 }
 0x1c7   : > { %7422 = vst [vmem:[#allocation32_spill] sm:$0xff] %v6139_v62  ;;  %v6142_v53 = vadd.f32 %v4884_v63, %v2372_v41  ;;  %v2194_v8 = vpop.f32.mrf.mxu1 }
 0x1c8   : > { %v2811_v37 = vpop.f32.mrf.mxu0  ;;  %v2371_v31 = vadd.f32 %v2194_v8, %v6028_v16 }
 0x1c9   : > { %7423 = vst [vmem:[#allocation33_spill] sm:$0xff] %v6142_v53  ;;  %v6145_v10 = vadd.f32 %v2811_v37, %v2370_v55  ;;  %v6147_v12 = vpop.f32.mrf.mxu1 }
 0x1ca   : > { %v4885_v47 = vpop.f32.mrf.mxu0 }
 0x1cb   : > { %7424 = vst [vmem:[#allocation34_spill] sm:$0xff] %v6145_v10  ;;  %v6150_v22 = vadd.f32 %v4885_v47, %v2373_v29  ;;  %v6152_v18 = vpop.f32.mrf.mxu1 }
 0x1cc   : > { %v2814_v54 = vpop.f32.mrf.mxu0 }
 0x1cd   : > { %7425 = vst [vmem:[#allocation35_spill] sm:$0xff] %v6150_v22  ;;  %v6154_v43 = vadd.f32 %v2814_v54, %v2371_v31  ;;  %v6156_v5 = vpop.f32.mrf.mxu1 }
 0x1ce   : > { %v6158_v48 = vpop.f32.mrf.mxu0 }
 0x1cf   : > { %7426 = vst [vmem:[#allocation36_spill] sm:$0xff] %v6154_v43  ;;  %v6160_v58 = vpop.f32.mrf.mxu1 }
 0x1d0   : > { %v6162_v15 = vpop.f32.mrf.mxu0 }
 0x1d1   : > { %v4842_v41 = vpop.f32.mrf.mxu1 }
 0x1d2   : > { %v6164_v38 = vpop.f32.mrf.mxu0 }
 0x1d3   : > { %v2223_v63 = vpop.f32.mrf.mxu1 }
 0x1d4   : > { %v6166_v16 = vpop.f32.mrf.mxu0 }
 0x1d5   : > { %v4843_v55 = vpop.f32.mrf.mxu1 }
 0x1d6   : > { %v4892_v8 = vpop.f32.mrf.mxu0 }
 0x1d7   : > { %v2226_v37 = vpop.f32.mrf.mxu1 }
 0x1d8   : > { %v6168_v29 = vpop.f32.mrf.mxu0 }
 0x1d9   : > { %v6170_v47 = vpop.f32.mrf.mxu1 }
 0x1da   : > { %7427 = vst [vmem:[#allocation37_spill] sm:$0xff] %v6170_v47  ;;  %v4893_v31 = vpop.f32.mrf.mxu0 }
 0x1db   : > { %v6172_v54 = vpop.f32.mrf.mxu1 }
 0x1dc   : > { %7428 = vst [vmem:[#allocation38_spill] sm:$0xff] %v6172_v54  ;;  %v2846_v56 = vpop.f32.mrf.mxu0 }
 0x1dd   : > { %v6174_v57 = vpop.f32.mrf.mxu1 }
 0x1de   : > { %7429 = vst [vmem:[#allocation39_spill] sm:$0xff] %v6174_v57  ;;  %v6176_v2 = vpop.f32.mrf.mxu0 }
 0x1df   : > { %7430 = vst [vmem:[#allocation40_spill] sm:$0xff] %v6176_v2  ;;  %v6178_v9 = vpop.f32.mrf.mxu1 }
 0x1e0   : > { %7431 = vst [vmem:[#allocation41_spill] sm:$0xff] %v6178_v9  ;;  %v6180_v60 = vpop.f32.mrf.mxu0 }
 0x1e1   : > { %7432 = vst [vmem:[#allocation42_spill] sm:$0xff] %v6180_v60  ;;  %v6182_v26 = vpop.f32.mrf.mxu1 }
 0x1e2   : > { %v6184_v24 = vpop.f32.mrf.mxu0 }
 0x1e3   : > { %7433 = vst [vmem:[#allocation43_spill] sm:$0xff] %v6184_v24  ;;  %v6186_v7 = vpop.f32.mrf.mxu1 }
 0x1e4   : > { %7434 = vst [vmem:[#allocation44_spill] sm:$0xff] %v6186_v7  ;;  %v6188_v52 = vpop.f32.mrf.mxu0  ;;  %v2380_v7 = vadd.f32 %v4842_v41, %v6038_v25 }
 0x1e5   : > { %7435 = vst [vmem:[#allocation45_spill] sm:$0xff] %v6188_v52  ;;  %v6190_v44 = vpop.f32.mrf.mxu1 }
 0x1e6   : > { %v6192_v51 = vpop.f32.mrf.mxu0 }
 0x1e7   : > { %v6194_v46 = vpop.f32.mrf.mxu1 }
 0x1e8   : > { %7436 = vst [vmem:[#allocation46_spill] sm:$0xff] %v6194_v46  ;;  %v6196_v62 = vpop.f32.mrf.mxu0 }
 0x1e9   : > { %7437 = vst [vmem:[#allocation47_spill] sm:$0xff] %v6196_v62  ;;  %v4854_v45 = vpop.f32.mrf.mxu1  ;;  %v2381_v62 = vadd.f32 %v4843_v55, %v6042_v11  ;;  %v6224_v11 = vadd.f32 %v4892_v8, %v2380_v7 }
 0x1ea   : > { %v6198_v23 = vpop.f32.mrf.mxu0 }
 0x1eb   : > { %v6200_v34 = vpop.f32.mrf.mxu1  ;;  %v6216_v14 = vadd.f32 %v4893_v31, %v2381_v62  ;;  %v7443_v8 = vld [vmem:[#allocation44_spill] sm:$0xff] }
 0x1ec   : > { %v6202_v60 = vpop.f32.mrf.mxu0  ;;  %v2390_v41 = vadd.f32 %v6200_v34, %v6064_v36 }
 0x1ed   : > { %7438 = vst [vmem:[#allocation48_spill] sm:$0xff] %v6202_v60  ;;  %v4855_v4 = vpop.f32.mrf.mxu1 }
 0x1ee   : > { %v4904_v54 = vpop.f32.mrf.mxu0 }
 0x1ef   : > { %v2274_v42 = vpop.f32.mrf.mxu1 }
 0x1f0   : > { %v6204_v30 = vpop.f32.mrf.mxu0 }
 0x1f1   : > { %v4858_v52 = vpop.f32.mrf.mxu1 }
 0x1f2   : > { %v4905_v39 = vpop.f32.mrf.mxu0  ;;  %v2396_v1 = vadd.f32 %v4858_v52, %v6070_v61 }
 0x1f3   : > { %v2287_v9 = vpop.f32.mrf.mxu1 }
 0x1f4   : > { %v2894_v28 = vpop.f32.mrf.mxu0  ;;  %v2394_v25 = vadd.f32 %v2287_v9, %v6075_v3  ;;  %v2377_v3 = vadd.f32 %v6156_v5, %v6034_v21 }
 0x1f5   : > { %v4859_v2 = vpop.f32.mrf.mxu1 }
 0x1f6   : > { %v4908_v10 = vpop.f32.mrf.mxu0  ;;  %v2397_v27 = vadd.f32 %v4859_v2, %v6087_v50  ;;  %v6265_v21 = vadd.f32 %v6164_v38, %v2377_v3 }
 0x1f7   : > { %v2290_v24 = vpop.f32.mrf.mxu1  ;;  %v6218_v46 = vadd.f32 %v4908_v10, %v2396_v1 }
 0x1f8   : > { %v2907_v47 = vpop.f32.mrf.mxu0  ;;  %v2395_v50 = vadd.f32 %v2290_v24, %v6091_v19  ;;  %v2378_v19 = vadd.f32 %v2223_v63, %v6040_v49 }
 0x1f9   : > { %v6207_v43 = vpop.f32.mrf.mxu1 }
 0x1fa   : > { %v4909_v57 = vpop.f32.mrf.mxu0  ;;  %v6251_v9 = vadd.f32 %v6168_v29, %v2378_v19  ;;  %v7444_v29 = vld [vmem:[#allocation48_spill] sm:$0xff] }
 0x1fb   : > { %v6211_v53 = vadd.f32 %v4909_v57, %v2397_v27  ;;  %v6213_v60 = vpop.f32.mrf.mxu1  ;;  %v2379_v27 = vadd.f32 %v2226_v37, %v6044_v17  ;;  %v2393_v17 = vadd.f32 %v4855_v4, %v6066_v13  ;;  %v6243_v57 = vadd.f32 %v2907_v47, %v2394_v25  ;;  %v7449_v25 = vld [vmem:[#allocation47_spill] sm:$0xff] }
 0x1fc   : > { %v2910_v22 = vpop.f32.mrf.mxu0  ;;  %v2376_v4 = vadd.f32 %v6147_v12, %v6030_v20  ;;  %v2375_v20 = vadd.f32 %v6160_v58, %v6036_v59  ;;  %v2389_v58 = vadd.f32 %v6190_v44, %v6058_v32 }
 0x1fd   : > { %v6221_v2 = vpop.f32.mrf.mxu1  ;;  %4638 = vmatprep.subr.mxu1 %v6211_v53  ;;  %v6231_v52 = vadd.f32 %v2910_v22, %v2395_v50  ;;  %v6237_v24 = vadd.f32 %v2846_v56, %v2379_v27  ;;  %v2392_v56 = vadd.f32 %v4854_v45, %v6062_v35  ;;  %v6257_v10 = vadd.f32 %v4905_v39, %v2393_v17  ;;  %v7448_v50 = vld [vmem:[#allocation39_spill] sm:$0xff] }
 0x1fe   : > { %v6227_v61 = vpop.f32.mrf.mxu0  ;;  %4639 = vmatpush3.msra.mxu1 %v6216_v14  ;;  %v2391_v35 = vadd.f32 %v2274_v42, %v6068_v40  ;;  %v6277_v45 = vadd.f32 %v6158_v48, %v2376_v4  ;;  %v2374_v40 = vadd.f32 %v6152_v18, %v6032_v6  ;;  %v6294_v48 = vadd.f32 %v6166_v16, %v2375_v20  ;;  %v7452_v4 = vld [vmem:[#allocation4_spill] sm:$0xff] }
 0x1ff   : > { %v6233_v1 = vpop.f32.mrf.mxu1  ;;  %4640 = vmatprep.subr.mxu1 %v6218_v46  ;;  %v6270_v5 = vadd.f32 %v4904_v54, %v2392_v56  ;;  %v2388_v18 = vadd.f32 %v6182_v26, %v6054_v0  ;;  %v6316_v63 = vadd.f32 %v6198_v23, %v2389_v58  ;;  %v7441_v26 = vld [vmem:[#allocation35_spill] sm:$0xff]  ;;  %v7442_v23 = vld [vmem:[#allocation8_spill] sm:$0xff]  ;;  %v7447_v54 = vld [vmem:[#allocation6_spill] sm:$0xff] }
 0x200   : > { %v6239_v7 = vpop.f32.mrf.mxu0  ;;  %4641 = vmatpush3.msra.mxu1 %v6224_v11  ;;  %v6286_v38 = vadd.f32 %v2894_v28, %v2391_v35  ;;  %v6302_v28 = vadd.f32 %v6204_v30, %v2390_v41  ;;  %v6308_v34 = vadd.f32 %v6162_v15, %v2374_v40  ;;  %v7440_v15 = vld [vmem:[#allocation46_spill] sm:$0xff]  ;;  %v2386_v37 = vadd.f32 %v7443_v8, %v7442_v23  ;;  %v7451_v56 = vld [vmem:[#allocation36_spill] sm:$0xff]  ;;  %v7453_v35 = vld [vmem:[#allocation37_spill] sm:$0xff] }
 0x201   : > { %v6245_v62 = vpop.f32.mrf.mxu1  ;;  %4642 = vmatprep.subr.mxu1 %v6231_v52  ;;  %v6325_v30 = vadd.f32 %v6192_v51, %v2388_v18  ;;  %v2387_v16 = vadd.f32 %v7440_v15, %v6060_v33  ;;  %v7446_v33 = vld [vmem:[#allocation33_spill] sm:$0xff]  ;;  %v2385_v27 = vadd.f32 %v7448_v50, %v7447_v54  ;;  %v2384_v20 = vadd.f32 %v7453_v35, %v7452_v4  ;;  %v7454_v41 = vld [vmem:[#allocation43_spill] sm:$0xff]  ;;  %v7456_v15 = vld [vmem:[#allocation34_spill] sm:$0xff] }
 0x202   : > { %v6253_v49 = vpop.f32.mrf.mxu0  ;;  %4643 = vmatpush3.msra.mxu1 %v6237_v24  ;;  %v6347_v19 = vadd.f32 %v7449_v25, %v2386_v37  ;;  %v7459_v8 = vld [vmem:[#allocation7_spill] sm:$0xff]  ;;  %v7460_v37 = vld [vmem:[#allocation41_spill] sm:$0xff] }
 0x203   : > { %v6259_v13 = vpop.f32.mrf.mxu1  ;;  %4644 = vmatprep.subr.mxu1 %v6243_v57  ;;  %7439 = vst [vmem:[#allocation49_spill] sm:$0xff] %v6325_v30  ;;  %v6336_v47 = vadd.f32 %v7444_v29, %v2387_v16  ;;  %v6354_v40 = vadd.f32 %v7454_v41, %v2385_v27  ;;  %v7457_v16 = vld [vmem:[#allocation40_spill] sm:$0xff]  ;;  %v2383_v29 = vadd.f32 %v7460_v37, %v7459_v8  ;;  %v7461_v50 = vld [vmem:[#allocation9_spill] sm:$0xff]  ;;  %v7462_v4 = vld [vmem:[#allocation31_spill] sm:$0xff] }
 0x204   : > { %v6267_v22 = vpop.f32.mrf.mxu0  ;;  %4645 = vmatpush3.msra.mxu1 %v6251_v9  ;;  %7450 = vst [vmem:[#allocation8_spill] sm:$0xff] %v6347_v19  ;;  %v6359_v23 = vadd.f32 %v7457_v16, %v2384_v20  ;;  %v6365_v25 = vsub.s32 0, %v7461_v50  ;;  %v7463_v35 = vld [vmem:[#allocation5_spill] sm:$0xff]  ;;  %v7464_v41 = vld [vmem:[#allocation38_spill] sm:$0xff]  ;;  %v7466_v8 = vld [vmem:[#allocation28_spill] sm:$0xff] }
 0x205   : > { %v6273_v39 = vpop.f32.mrf.mxu1  ;;  %4646 = vmatprep.subr.mxu1 %v6257_v10  ;;  %7445 = vst [vmem:[#allocation46_spill] sm:$0xff] %v6336_v47  ;;  %7455 = vst [vmem:[#allocation44_spill] sm:$0xff] %v6354_v40  ;;  %v7467_v37 = vld [vmem:[#allocation42_spill] sm:$0xff]  ;;  %v7468_v50 = vld [vmem:[#allocation19_spill] sm:$0xff] }
 0x206   : > { %v6281_v12 = vpop.f32.mrf.mxu0  ;;  %4647 = vmatpush3.msra.mxu1 %v6265_v21  ;;  %7458 = vst [vmem:[#allocation48_spill] sm:$0xff] %v6359_v23 }
 0x207   : > { %v6288_v42 = vpop.f32.mrf.mxu1  ;;  %4648 = vmatprep.subr.mxu1 %v6270_v5 }
 0x208   : > { %v6296_v59 = vpop.f32.mrf.mxu0  ;;  %4649 = vmatpush3.msra.mxu1 %v6277_v45 }
 0x209   : > { %v6304_v36 = vpop.f32.mrf.mxu1  ;;  %4650 = vmatprep.subr.mxu1 %v6286_v38 }
 0x20a   : > { %v6310_v6 = vpop.f32.mrf.mxu0  ;;  %4651 = vmatpush3.msra.mxu1 %v6294_v48 }
 0x20b   : > { %v6318_v32 = vpop.f32.mrf.mxu1  ;;  %4652 = vmatprep.subr.mxu1 %v6302_v28 }
 0x20c   : > { %v6321_v44 = vpop.f32.mrf.mxu0  ;;  %4653 = vmatpush3.msra.mxu1 %v6308_v34 }
 0x20d   : > { %v4871_v55 = vpop.f32.mrf.mxu1  ;;  %4654 = vmatprep.subr.mxu1 %v6316_v63 }
 0x20e   : > { %v6330_v0 = vpop.f32.mrf.mxu0  ;;  %4655 = vmatpush3.msra.mxu1 %v7441_v26 }
 0x20f   : > { %v6338_v31 = vpop.f32.mrf.mxu1  ;;  %4656 = vmatprep.subr.mxu1 %v6325_v30 }
 0x210   : > { %v6341_v51 = vpop.f32.mrf.mxu0  ;;  %4657 = vmatpush3.msra.mxu1 %v7446_v33  ;;  %v7469_v33 = vld [vmem:[#allocation22_spill] sm:$0xff] }
 0x211   : > { %v4874_v17 = vpop.f32.mrf.mxu1  ;;  %4658 = vmatprep.subr.mxu1 %v6336_v47 }
 0x212   : > { %v4921_v3 = vpop.f32.mrf.mxu0  ;;  %4659 = vmatpush3.msra.mxu1 %v7451_v56  ;;  %v7465_v56 = vld [vmem:[#allocation45_spill] sm:$0xff]  ;;  %v2412_v47 = vadd.f32 %v4874_v17, %v7468_v50  ;;  %v7475_v17 = vld [vmem:[#allocation30_spill] sm:$0xff] }
 0x213   : > { %v2351_v58 = vpop.f32.mrf.mxu1  ;;  %4660 = vmatprep.subr.mxu1 %v6347_v19  ;;  %v2382_v19 = vadd.f32 %v7464_v41, %v7463_v35  ;;  %v7470_v35 = vld [vmem:[#allocation10_spill] sm:$0xff] }
 0x214   : > { %v2958_v18 = vpop.f32.mrf.mxu0  ;;  %4661 = vmatpush3.msra.mxu1 %v7456_v15  ;;  %v6371_v15 = vadd.f32 %v7465_v56, %v2383_v29  ;;  %v6383_v41 = vrot.slane %v7470_v35, %v6365_v25  ;;  %v7471_v29 = vld [vmem:[#allocation32_spill] sm:$0xff]  ;;  %v7478_v35 = vmov 0.0  }
 0x215   : > { %v4875_v54 = vpop.f32.mrf.mxu1  ;;  %4662 = vmatprep.subr.mxu1 %v6354_v40  ;;  %v6376_v40 = vadd.f32 %v7467_v37, %v2382_v19 }
 0x216   : > { %v4924_v27 = vpop.f32.mrf.mxu0  ;;  %4663 = vmatpush3.msra.mxu1 %v7462_v4  ;;  %v2413_v30 = vadd.f32 %v4875_v54, %v7469_v33  ;;  %v7473_v4 = vld [vmem:[#allocation24_spill] sm:$0xff] }
 0x217   : > { %4664 = vmatprep.subr.mxu1 %v6359_v23  ;;  %v2354_v20 = vpop.f32.mrf.mxu1  ;;  %v6386_v23 = vadd.f32 %v4924_v27, %v2412_v47  ;;  %v7476_v33 = vld [vmem:[#allocation20_spill] sm:$0xff] }
 0x218   : > { %v2971_v16 = vpop.f32.mrf.mxu0  ;;  %4665 = vmatpush3.msra.mxu1 %v7466_v8  ;;  %v2411_v8 = vadd.f32 %v2354_v20, %v7473_v4  ;;  %v2410_v54 = vadd.f32 %v2351_v58, %v7476_v33  ;;  %v7481_v4 = vld [vmem:[#allocation12_spill] sm:$0xff] }
 0x219   : > { %4666 = vmatprep.subr.mxu1 %v6371_v15  ;;  %7472 = vst [vmem:[#allocation6_spill] sm:$0xff] %v6386_v23  ;;  %v3333_v27 = vmul.f32 %v6386_v23, %v6386_v23  ;;  %v2408_v20 = vadd.f32 %v6304_v36, %v7481_v4  ;;  %v7490_v4 = vld [vmem:[#allocation27_spill] sm:$0xff] }
 0x21a   : > { %v4925_v56 = vpop.f32.mrf.mxu0  ;;  %4667 = vmatpush3.msra.mxu1 %v7471_v29  ;;  %v6406_v58 = vadd.f32 %v2971_v16, %v2410_v54 }
 0x21b   : > { %v6389_v26 = vadd.f32 %v4925_v56, %v2413_v30  ;;  %4668 = vmatprep.subr.mxu1 %v6376_v40  ;;  %v7479_v30 = vld [vmem:[#allocation15_spill] sm:$0xff]  ;;  %v6421_v16 = vadd.f32 %v6330_v0, %v2408_v20  ;;  %v7484_v56 = vld [vmem:[#allocation17_spill] sm:$0xff]  ;;  %v2403_v20 = vadd.f32 %v6288_v42, %v7490_v4  ;;  %v7492_v42 = vld [vmem:[#allocation18_spill] sm:$0xff]  ;;  %v3317_v4 = vmul.f32 %v6218_v46, %v6218_v46 }
 0x21c   : > { %v2974_v19 = vpop.f32.mrf.mxu0  ;;  %4669 = vmatpush3.msra.mxu1 %v7475_v17  ;;  %v2409_v47 = vadd.f32 %v4871_v55, %v7479_v30  ;;  %7480 = vst [vmem:[#allocation4_spill] sm:$0xff] %v6406_v58  ;;  %v3331_v36 = vmul.f32 %v6406_v58, %v6406_v58 }
 0x21d   : > { %7474 = vst [vmem:[#allocation39_spill] sm:$0xff] %v6389_v26  ;;  %v3334_v37 = vmul.f32 %v6389_v26, %v6389_v26  ;;  %v6396_v50 = vadd.f32 %v2974_v19, %v2411_v8  ;;  %4926 = vmatprep.subr.mxu1 %v7478_v35  ;;  %3212 = vmatmul.mubr.f32.vlgmr.msra.gmra.mxu1 %v6383_v41  ;;  %7483 = vst [vmem:[#allocation43_spill] sm:$0xff] %v6421_v16 }
 0x21e   : > { %4927 = vmatpush3.msra.mxu1 %v6389_v26  ;;  %4958 = vmatprep.mubr.msk.f32.mxu1 %vm5428_vm7, %v7478_v35  ;;  %v6413_v8 = vadd.f32 %v4921_v3, %v2409_v47  ;;  %v2407_v19 = vadd.f32 %v6338_v31, %v7484_v56  ;;  %v7485_v3 = vld [vmem:[#allocation13_spill] sm:$0xff]  ;;  %v7487_v31 = vld [vmem:[#allocation26_spill] sm:$0xff]  ;;  %v3329_v30 = vmul.f32 %v6421_v16, %v6421_v16 }
 0x21f   : > { %7477 = vst [vmem:[#allocation47_spill] sm:$0xff] %v6396_v50  ;;  %4928 = vmatprep.subr.mxu1 %v7478_v35  ;;  %4962 = vmatpush3.msra.mxu0 %v3334_v37  ;;  %v3332_v55 = vmul.f32 %v6396_v50, %v6396_v50  ;;  %v2406_v33 = vadd.f32 %v6318_v32, %v7485_v3 }
 0x220   : > { %4929 = vmatpush3.msra.mxu1 %v6386_v23  ;;  %4963 = vmatprep.subr.mxu0 %v7478_v35  ;;  %7482 = vst [vmem:[#allocation37_spill] sm:$0xff] %v6413_v8  ;;  %v3330_v0 = vmul.f32 %v6413_v8, %v6413_v8  ;;  %v6434_v54 = vadd.f32 %v2958_v18, %v2407_v19  ;;  %v7489_v18 = vld [vmem:[#allocation23_spill] sm:$0xff]  ;;  %v7508_v23 = vld [vmem:[#allocation28_spill] sm:$0xff] }
 0x221   : > { %4930 = vmatprep.subr.mxu1 %v7478_v35  ;;  %4964 = vmatpush3.msra.mxu0 %v3333_v27  ;;  %v2405_v37 = vadd.f32 %v6273_v39, %v7487_v31  ;;  %v6444_v32 = vadd.f32 %v6341_v51, %v2406_v33  ;;  %v2404_v47 = vadd.f32 %v6245_v62, %v7489_v18 }
 0x222   : > { %4931 = vmatpush3.msra.mxu1 %v6396_v50  ;;  %4965 = vmatprep.subr.mxu0 %v7478_v35  ;;  %7486 = vst [vmem:[#allocation40_spill] sm:$0xff] %v6434_v54  ;;  %v3328_v39 = vmul.f32 %v6434_v54, %v6434_v54  ;;  %v6474_v56 = vadd.f32 %v6321_v44, %v2403_v20  ;;  %v7493_v44 = vld [vmem:[#allocation14_spill] sm:$0xff] }
 0x223   : > { %4932 = vmatprep.subr.mxu1 %v7478_v35  ;;  %4966 = vmatpush3.msra.mxu0 %v3332_v55  ;;  %7488 = vst [vmem:[#allocation7_spill] sm:$0xff] %v6444_v32  ;;  %v6452_v27 = vadd.f32 %v6310_v6, %v2405_v37  ;;  %v6460_v51 = vadd.f32 %v6281_v12, %v2404_v47  ;;  %v7491_v6 = vld [vmem:[#allocation25_spill] sm:$0xff] }
 0x224   : > { %4933 = vmatpush3.msra.mxu1 %v6406_v58  ;;  %4967 = vmatprep.subr.mxu0 %v7478_v35  ;;  %v3327_v62 = vmul.f32 %v6444_v32, %v6444_v32  ;;  %v2402_v55 = vadd.f32 %v6259_v13, %v7491_v6  ;;  %v2401_v19 = vadd.f32 %v6221_v2, %v7492_v42 }
 0x225   : > { %4934 = vmatprep.subr.mxu1 %v7478_v35  ;;  %4968 = vmatpush3.msra.mxu0 %v3331_v36  ;;  %v3326_v12 = vmul.f32 %v6452_v27, %v6452_v27  ;;  %v3325_v36 = vmul.f32 %v6460_v51, %v6460_v51  ;;  %v2400_v3 = vadd.f32 %v6207_v43, %v7493_v44 }
 0x226   : > { %4935 = vmatpush3.msra.mxu1 %v6413_v8  ;;  %4969 = vmatprep.subr.mxu0 %v7478_v35  ;;  %v6484_v13 = vadd.f32 %v6296_v59, %v2402_v55  ;;  %v6492_v33 = vadd.f32 %v6253_v49, %v2401_v19  ;;  %v3324_v2 = vmul.f32 %v6474_v56, %v6474_v56  ;;  %v7495_v49 = vld [vmem:[#allocation16_spill] sm:$0xff]  ;;  %v6564_v19 = vld [vmem:[%s7329_s4 + $0x70] sm:$0xff] }
 0x227   : > { %4936 = vmatprep.subr.mxu1 %v7478_v35  ;;  %4970 = vmatpush3.msra.mxu0 %v3330_v0  ;;  %v6500_v59 = vadd.f32 %v6227_v61, %v2400_v3  ;;  %v7494_v0 = vld [vmem:[#allocation21_spill] sm:$0xff]  ;;  %v2398_v37 = vadd.f32 %v6213_v60, %v7495_v49  ;;  %v3302_v47 = vmul.f32 %v6216_v14, %v6216_v14  ;;  %v6553_v55 = vld [vmem:[%s7329_s4 + $0x78] sm:$0xff]  ;;  %v6575_v3 = vld [vmem:[%s7329_s4 + $0x68] sm:$0xff] }
 0x228   : > { %4937 = vmatpush3.msra.mxu1 %v6421_v16  ;;  %4971 = vmatprep.subr.mxu0 %v7478_v35  ;;  %v2399_v31 = vadd.f32 %v6233_v1, %v7494_v0  ;;  %v3323_v43 = vmul.f32 %v6484_v13, %v6484_v13  ;;  %v3322_v61 = vmul.f32 %v6492_v33, %v6492_v33 }
 0x229   : > { %4938 = vmatprep.subr.mxu1 %v7478_v35  ;;  %4972 = vmatpush3.msra.mxu0 %v3329_v30  ;;  %v3321_v1 = vmul.f32 %v6500_v59, %v6500_v59  ;;  %v6522_v18 = vadd.f32 %v6239_v7, %v2398_v37  ;;  %v3301_v20 = vmul.f32 %v6224_v11, %v6224_v11  ;;  %v6597_v37 = vld [vmem:[%s7329_s4 + $0x58] sm:$0xff] }
 0x22a   : > { %4939 = vmatpush3.msra.mxu1 %v6434_v54  ;;  %4973 = vmatprep.subr.mxu0 %v7478_v35  ;;  %v6514_v30 = vadd.f32 %v6267_v22, %v2399_v31  ;;  %v3318_v22 = vmul.f32 %v6211_v53, %v6211_v53  ;;  %v3316_v6 = vmul.f32 %v6231_v52, %v6231_v52  ;;  %v6586_v31 = vld [vmem:[%s7329_s4 + $0x60] sm:$0xff] }
 0x22b   : > { %4940 = vmatprep.subr.mxu1 %v7478_v35  ;;  %4974 = vmatpush3.msra.mxu0 %v3328_v39  ;;  %v3319_v7 = vmul.f32 %v6522_v18, %v6522_v18  ;;  %v7496_v39 = vld [vmem:[#allocation29_spill] sm:$0xff]  ;;  %v3315_v42 = vmul.f32 %v6243_v57, %v6243_v57  ;;  %v3314_v44 = vmul.f32 %v6257_v10, %v6257_v10 }
 0x22c   : > { %4941 = vmatpush3.msra.mxu1 %v6444_v32  ;;  %4975 = vmatprep.subr.mxu0 %v7478_v35  ;;  %v3320_v60 = vmul.f32 %v6514_v30, %v6514_v30  ;;  %v3313_v0 = vmul.f32 %v6270_v5, %v6270_v5  ;;  %v3312_v49 = vmul.f32 %v6286_v38, %v6286_v38 }
 0x22d   : > { %4942 = vmatprep.subr.mxu1 %v7478_v35  ;;  %4976 = vmatpush3.msra.mxu0 %v3327_v62  ;;  %v7497_v62 = vld [vmem:[#allocation11_spill] sm:$0xff]  ;;  %v3289_v50 = vmul.f32 %v7508_v23, %v7508_v23 }
 0x22e   : > { %4943 = vmatpush3.msra.mxu1 %v6452_v27  ;;  %4977 = vmatprep.subr.mxu0 %v7478_v35 }
 0x22f   : > { %4944 = vmatprep.subr.mxu1 %v7478_v35  ;;  %4978 = vmatpush3.msra.mxu0 %v3326_v12  ;;  %v3300_v12 = vmul.f32 %v6237_v24, %v6237_v24 }
 0x230   : > { %4945 = vmatpush3.msra.mxu1 %v6460_v51  ;;  %4979 = vmatprep.subr.mxu0 %v7478_v35 }
 0x231   : > { %4946 = vmatprep.subr.mxu1 %v7478_v35  ;;  %4980 = vmatpush3.msra.mxu0 %v3325_v36  ;;  %v3299_v36 = vmul.f32 %v6251_v9, %v6251_v9 }
 0x232   : > { %4947 = vmatpush3.msra.mxu1 %v6474_v56  ;;  %4981 = vmatprep.subr.mxu0 %v7478_v35 }
 0x233   : > { %4948 = vmatprep.subr.mxu1 %v7478_v35  ;;  %4982 = vmatpush3.msra.mxu0 %v3324_v2  ;;  %v3298_v2 = vmul.f32 %v6265_v21, %v6265_v21 }
 0x234   : > { %4949 = vmatpush3.msra.mxu1 %v6484_v13  ;;  %4983 = vmatprep.subr.mxu0 %v7478_v35 }
 0x235   : > { %4950 = vmatprep.subr.mxu1 %v7478_v35  ;;  %4984 = vmatpush3.msra.mxu0 %v3323_v43  ;;  %v3297_v43 = vmul.f32 %v6277_v45, %v6277_v45 }
 0x236   : > { %4951 = vmatpush3.msra.mxu1 %v6492_v33  ;;  %4985 = vmatprep.subr.mxu0 %v7478_v35 }
 0x237   : > { %4952 = vmatprep.subr.mxu1 %v7478_v35  ;;  %4986 = vmatpush3.msra.mxu0 %v3322_v61  ;;  %v3296_v61 = vmul.f32 %v6294_v48, %v6294_v48 }
 0x238   : > { %4953 = vmatpush3.msra.mxu1 %v6500_v59  ;;  %4987 = vmatprep.subr.mxu0 %v7478_v35 }
 0x239   : > { %4954 = vmatprep.subr.mxu1 %v7478_v35  ;;  %4988 = vmatpush3.msra.mxu0 %v3321_v1  ;;  %v3311_v1 = vmul.f32 %v6302_v28, %v6302_v28 }
 0x23a   : > { %4955 = vmatpush3.msra.mxu1 %v6514_v30  ;;  %4989 = vmatprep.subr.mxu0 %v7478_v35 }
 0x23b   : > { %4956 = vmatprep.subr.mxu1 %v7478_v35  ;;  %4990 = vmatpush3.msra.mxu0 %v3320_v60  ;;  %v6608_v60 = vld [vmem:[%s7329_s4 + $0x50] sm:$0xff] }
 0x23c   : > { %4957 = vmatpush3.msra.mxu1 %v6522_v18  ;;  %4991 = vmatprep.subr.mxu0 %v7478_v35 }
 0x23d   : > { %4690 = vmatprep.subr.mxu1 %v3318_v22  ;;  %4992 = vmatpush3.msra.mxu0 %v3319_v7  ;;  %v3295_v7 = vmul.f32 %v6308_v34, %v6308_v34  ;;  %v3310_v22 = vmul.f32 %v6316_v63, %v6316_v63 }
 0x23e   : > { %4959 = vmatmul.mubr.f32.vlgmr.msra.gmra.mxu1 %v7496_v39  ;;  %4994 = vmatmul.mubr.f32.vlgmr.msra.gmra.mxu0 %v7496_v39  ;;  %v7498_v39 = vld [vmem:[#allocation35_spill] sm:$0xff] }
 0x23f   : > { %4691 = vmatpush3.msra.mxu1 %v3302_v47  ;;  %3404 = vmatprep.mubr.f32.mxu1 %v7497_v62  ;;  %v6619_v47 = vld [vmem:[%s7329_s4 + $0x48] sm:$0xff] }
 0x240   : > { %4692 = vmatprep.subr.mxu1 %v3317_v4  ;;  %5031 = vmatprep.subr.mxu0 %v7478_v35  ;;  %v3294_v4 = vmul.f32 %v7498_v39, %v7498_v39 }
 0x241   : > { %4693 = vmatpush3.msra.mxu1 %v3301_v20  ;;  %5032 = vmatpush3.msra.mxu0 %v6553_v55  ;;  %v7499_v20 = vld [vmem:[#allocation49_spill] sm:$0xff] }
 0x242   : > { %4694 = vmatprep.subr.mxu1 %v3316_v6  ;;  %5033 = vmatprep.subr.mxu0 %v7478_v35  ;;  %v3309_v62 = vmul.f32 %v7499_v20, %v7499_v20  ;;  %v3490_v6 = vld [vmem:[%s7329_s4 + $0x40] sm:$0xff] }
 0x243   : > { %4695 = vmatpush3.msra.mxu1 %v3300_v12  ;;  %5034 = vmatpush3.msra.mxu0 %v6564_v19  ;;  %v7500_v12 = vld [vmem:[#allocation33_spill] sm:$0xff] }
 0x244   : > { %4696 = vmatprep.subr.mxu1 %v3315_v42  ;;  %5035 = vmatprep.subr.mxu0 %v7478_v35  ;;  %v3293_v42 = vmul.f32 %v7500_v12, %v7500_v12 }
 0x245   : > { %4697 = vmatpush3.msra.mxu1 %v3299_v36  ;;  %5036 = vmatpush3.msra.mxu0 %v6575_v3  ;;  %v7501_v36 = vld [vmem:[#allocation46_spill] sm:$0xff] }
 0x246   : > { %4698 = vmatprep.subr.mxu1 %v3314_v44  ;;  %5037 = vmatprep.subr.mxu0 %v7478_v35  ;;  %v3308_v44 = vmul.f32 %v7501_v36, %v7501_v36 }
 0x247   : > { %4699 = vmatpush3.msra.mxu1 %v3298_v2  ;;  %5038 = vmatpush3.msra.mxu0 %v6586_v31  ;;  %v3489_v2 = vld [vmem:[%s7329_s4 + $0x38] sm:$0xff] }
 0x248   : > { %4700 = vmatprep.subr.mxu1 %v3313_v0  ;;  %5039 = vmatprep.subr.mxu0 %v7478_v35  ;;  %v7502_v0 = vld [vmem:[#allocation36_spill] sm:$0xff] }
 0x249   : > { %4701 = vmatpush3.msra.mxu1 %v3297_v43  ;;  %5040 = vmatpush3.msra.mxu0 %v6597_v37  ;;  %v3292_v43 = vmul.f32 %v7502_v0, %v7502_v0 }
 0x24a   : > { %4702 = vmatprep.subr.mxu1 %v3312_v49  ;;  %5041 = vmatprep.subr.mxu0 %v7478_v35  ;;  %v7503_v49 = vld [vmem:[#allocation8_spill] sm:$0xff] }
 0x24b   : > { %4703 = vmatpush3.msra.mxu1 %v3296_v61  ;;  %5042 = vmatpush3.msra.mxu0 %v6608_v60  ;;  %v3307_v61 = vmul.f32 %v7503_v49, %v7503_v49 }
 0x24c   : > { %4704 = vmatprep.subr.mxu1 %v3311_v1  ;;  %5043 = vmatprep.subr.mxu0 %v7478_v35  ;;  %v7504_v1 = vld [vmem:[#allocation34_spill] sm:$0xff] }
 0x24d   : > { %4705 = vmatpush3.msra.mxu1 %v3295_v7  ;;  %5044 = vmatpush3.msra.mxu0 %v6619_v47  ;;  %v3291_v7 = vmul.f32 %v7504_v1, %v7504_v1 }
 0x24e   : > { %4706 = vmatprep.subr.mxu1 %v3310_v22  ;;  %5045 = vmatprep.subr.mxu0 %v7478_v35  ;;  %v7505_v22 = vld [vmem:[#allocation44_spill] sm:$0xff] }
 0x24f   : > { %4707 = vmatpush3.msra.mxu1 %v3294_v4  ;;  %5046 = vmatpush3.msra.mxu0 %v3490_v6  ;;  %v3306_v4 = vmul.f32 %v7505_v22, %v7505_v22 }
 0x250   : > { %4708 = vmatprep.subr.mxu1 %v3309_v62  ;;  %5047 = vmatprep.subr.mxu0 %v7478_v35  ;;  %v7506_v62 = vld [vmem:[#allocation31_spill] sm:$0xff] }
 0x251   : > { %4709 = vmatpush3.msra.mxu1 %v3293_v42  ;;  %5048 = vmatpush3.msra.mxu0 %v3489_v2  ;;  %v3290_v42 = vmul.f32 %v7506_v62, %v7506_v62 }
 0x252   : > { %4710 = vmatprep.subr.mxu1 %v3308_v44  ;;  %5049 = vmatprep.subr.mxu0 %v7478_v35  ;;  %v7507_v44 = vld [vmem:[#allocation48_spill] sm:$0xff] }
 0x253   : > { %4711 = vmatpush3.msra.mxu1 %v3292_v43  ;;  %5063 = vmatprep.mubr.msk.f32.mxu0 %vm5428_vm7, %v7478_v35  ;;  %v3305_v26 = vmul.f32 %v7507_v44, %v7507_v44  ;;  %v3304_v43 = vmul.f32 %v6371_v15, %v6371_v15 }
 0x254   : > { %4712 = vmatprep.subr.mxu1 %v3307_v61  ;;  %v3288_v61 = vmul.f32 %v7471_v29, %v7471_v29 }
 0x255   : > { %4713 = vmatpush3.msra.mxu1 %v3291_v7  ;;  %v3303_v7 = vmul.f32 %v6376_v40, %v6376_v40 }
 0x256   : > { %4714 = vmatprep.subr.mxu1 %v3306_v4  ;;  %v3287_v4 = vmul.f32 %v7475_v17, %v7475_v17 }
 0x257   : > { %4715 = vmatpush3.msra.mxu1 %v3290_v42 }
 0x258   : > { %4716 = vmatprep.subr.mxu1 %v3305_v26  ;;  %v3488_v26 = vld [vmem:[%s7329_s4 + $0x30] sm:$0xff] }
 0x259   : > { %4717 = vmatpush3.msra.mxu1 %v3289_v50  ;;  %5050 = vmatpush3.msra.mxu0 %v3488_v26  ;;  %v3487_v50 = vld [vmem:[%s7329_s4 + $0x28] sm:$0xff] }
 0x25a   : > { %4718 = vmatprep.subr.mxu1 %v3304_v43  ;;  %5051 = vmatprep.subr.mxu0 %v7478_v35 }
 0x25b   : > { %4719 = vmatpush3.msra.mxu1 %v3288_v61  ;;  %5052 = vmatpush3.msra.mxu0 %v3487_v50 }
 0x25c   : > { %4720 = vmatprep.subr.mxu1 %v3303_v7  ;;  %5053 = vmatprep.subr.mxu0 %v7478_v35 }
 0x25d   : > { %4721 = vmatpush3.msra.mxu1 %v3287_v4 }
 0x25e   : > { %3405 = vmatmul.mubr.f32.vlgmr.msra.gmra.mxu1 %v6383_v41  ;;  %4996 = vmatprep.subr.mxu1 %v7478_v35  ;;  %v3486_v41 = vld [vmem:[%s7329_s4 + $0x20] sm:$0xff] }
 0x25f   : > { %4997 = vmatpush3.msra.mxu1 %v6553_v55  ;;  %5028 = vmatprep.mubr.msk.f32.mxu1 %vm5428_vm7, %v7478_v35  ;;  %v3485_v55 = vld [vmem:[%s7329_s4 + $0x18] sm:$0xff] }
 0x260   : > { %4998 = vmatprep.subr.mxu1 %v7478_v35  ;;  %5054 = vmatpush3.msra.mxu0 %v3486_v41 }
 0x261   : > { %4999 = vmatpush3.msra.mxu1 %v6564_v19  ;;  %5055 = vmatprep.subr.mxu0 %v7478_v35  ;;  %v3484_v19 = vld [vmem:[%s7329_s4 + $0x10] sm:$0xff] }
 0x262   : > { %5000 = vmatprep.subr.mxu1 %v7478_v35  ;;  %5056 = vmatpush3.msra.mxu0 %v3485_v55 }
 0x263   : > { %5001 = vmatpush3.msra.mxu1 %v6575_v3  ;;  %5057 = vmatprep.subr.mxu0 %v7478_v35  ;;  %v3483_v3 = vld [vmem:[%s7329_s4 + $0x8] sm:$0xff] }
 0x264   : > { %5002 = vmatprep.subr.mxu1 %v7478_v35  ;;  %5058 = vmatpush3.msra.mxu0 %v3484_v19 }
 0x265   : > { %5003 = vmatpush3.msra.mxu1 %v6586_v31  ;;  %5059 = vmatprep.subr.mxu0 %v7478_v35  ;;  %v3482_v31 = vld [vmem:[%s7329_s4] sm:$0xff] }
 0x266   : > { %5004 = vmatprep.subr.mxu1 %v7478_v35  ;;  %5060 = vmatpush3.msra.mxu0 %v3483_v3 }
 0x267   : > { %5005 = vmatpush3.msra.mxu1 %v6597_v37  ;;  %5061 = vmatprep.subr.mxu0 %v7478_v35 }
 0x268   : > { %5006 = vmatprep.subr.mxu1 %v7478_v35  ;;  %5062 = vmatpush3.msra.mxu0 %v3482_v31 }
 0x269   : > { %5007 = vmatpush3.msra.mxu1 %v6608_v60 }
 0x26a   : > { %5008 = vmatprep.subr.mxu1 %v7478_v35 }
 0x26b   : > { %5009 = vmatpush3.msra.mxu1 %v6619_v47  ;;  %v3335_v47 = vld [vmem:[%s7327_s2] sm:$0x1] }
 0x26c   : > { %5010 = vmatprep.subr.mxu1 %v7478_v35 }
 0x26d   : > { %5011 = vmatpush3.msra.mxu1 %v3490_v6 }
 0x26e   : > { %5012 = vmatprep.subr.mxu1 %v7478_v35 }
 0x26f   : > { %5013 = vmatpush3.msra.mxu1 %v3489_v2  ;;  %v3336_v2 = vmul.f32 256.0, %v3335_v47 }
 0x270   : > { %5014 = vmatprep.subr.mxu1 %v7478_v35 }
 0x271   : > { %5015 = vmatpush3.msra.mxu1 %v3488_v26 }
 0x272   : > { %5016 = vmatprep.subr.mxu1 %v7478_v35 }
 0x273   : > { %5017 = vmatpush3.msra.mxu1 %v3487_v50  ;;  %v3338_v50 = vmul.f32 2.0, %v3335_v47 }
 0x274   : > { %5018 = vmatprep.subr.mxu1 %v7478_v35 }
 0x275   : > { %5019 = vmatpush3.msra.mxu1 %v3486_v41 }
 0x276   : > { %5020 = vmatprep.subr.mxu1 %v7478_v35 }
 0x277   : > { %5021 = vmatpush3.msra.mxu1 %v3485_v55 }
 0x278   : > { %5022 = vmatprep.subr.mxu1 %v7478_v35 }
 0x279   : > { %5023 = vmatpush3.msra.mxu1 %v3484_v19 }
 0x27a   : > { %5024 = vmatprep.subr.mxu1 %v7478_v35 }
 0x27b   : > { %5025 = vmatpush3.msra.mxu1 %v3483_v3 }
 0x27c   : > { %5026 = vmatprep.subr.mxu1 %v7478_v35 }
 0x27d   : > { %5027 = vmatpush3.msra.mxu1 %v3482_v31  ;;  %v3480_v31 = vmul.f32 %v3336_v2, %v3335_v47 }
 0x2dd   : > { %v4670_v37 = vpop.f32.mrf.mxu1 }
 0x2df   : > { %v4671_v60 = vpop.f32.mrf.mxu1 }
 0x2e0   : > { %v4672_v6 = vadd.f32 %v4671_v60, %v4670_v37 }
 0x2fe   : > { %v3283_v42 = vpop.f32.mrf.mxu1  ;;  %v3476_v43 = vpop.f32.mrf.mxu0 }
 0x2ff   : > { %v3284_v61 = vadd.f32 %v4672_v6, %v3283_v42 }
 0x300   : > { %v4960_v7 = vpop.f32.mrf.mxu1  ;;  %v4995_v4 = vpop.f32.mrf.mxu0 }
 0x301   : > { %v3337_v26 = vadd.f32 %v3336_v2, %v3284_v61  ;;  %v3339_v55 = vmul.f32 %v3338_v50, %v3284_v61  ;;  %v3649_v50 = vld [vmem:[%s371_s20] sm:$0x1] }
 0x303   : > { %5029 = vmatmul.mubr.f32.vlgmr.msra.gmra.mxu1 %v3337_v26 }
 0x31e   : > { %v4722_v41 = vpop.f32.mrf.mxu1 }
 0x320   : > { %v4723_v35 = vpop.f32.mrf.mxu1 }
 0x321   : > { %v4724_v19 = vadd.f32 %v4723_v35, %v4722_v41 }
 0x323   : > { %v3407_v3 = vadd.f32 %v4724_v19, %v3339_v55 }
 0x325   : > { %v3477_v58 = vadd.f32 %v3476_v43, %v3407_v3  ;;  %v3645_v43 = vld [vmem:[%s365_s17] sm:$0x1] }
 0x327   : > { %v3481_v8 = vadd.f32 %v3480_v31, %v3477_v58 }
 0x329   : > { %5064 = vmatmul.mubr.f32.vlgmr.msra.gmra.mxu0 %v3481_v8 }
 0x3c3   : > { %v3564_v37 = vpop.f32.mrf.mxu1 }
 0x3c4   : > { %v3568_v16 = vmul.f32 0.001953125, %v3564_v37 }
 0x3c5   : > { %v5030_v60 = vpop.f32.mrf.mxu1 }
 0x3c6   : > { %v3640_v4 = vmul.f32 %v3568_v16, %v3568_v16  ;;  %v3647_v8 = vsub.f32 %v3335_v47, %v3568_v16 }
 0x3e9   : > { %v3635_v6 = vpop.f32.mrf.mxu0 }
 0x3ea   : > { %v3639_v42 = vmul.f32 0.001953125, %v3635_v6 }
 0x3eb   : > { %v5065_v7 = vpop.f32.mrf.mxu0 }
 0x3ec   : > { %v3641_v26 = vsub.f32 %v3639_v42, %v3640_v4 }
 0x3ee   : > { %v3642_v54 = vmax.f32 %v3641_v26, 0.0 }
 0x3f0   : > { %v3643_v32 = vadd.f32 1e-05, %v3642_v54 }
 0x3f2   : > { %5206 = vrsqrt.f32 %v3643_v32 }
 0x3ff   : > { %v5207_v2 = vpop.eup %5206 }
 0x400   : > { %v3646_v58 = vmul.f32 %v5207_v2, %v3645_v43 }
 0x402   : > { %v3648_v61 = vmul.f32 %v3647_v8, %v3646_v58  ;;  %v6729_v35 = vrot.slane %v3646_v58, %v6365_v25 }
 0x404   : > { %v3650_v41 = vadd.f32 %v3649_v50, %v3648_v61  ;;  %v3655_v32 = vmul.f32 %v6729_v35, %v7475_v17  ;;  %v3656_v55 = vmul.f32 %v6729_v35, %v7471_v29  ;;  %v3657_v16 = vmul.f32 %v6729_v35, %v7508_v23 }
 0x405   : > { %v3658_v47 = vmul.f32 %v6729_v35, %v7506_v62  ;;  %v3659_v19 = vmul.f32 %v6729_v35, %v7504_v1  ;;  %v3660_v29 = vmul.f32 %v6729_v35, %v7502_v0  ;;  %v3661_v62 = vmul.f32 %v6729_v35, %v7500_v12 }
 0x406   : > { %v6732_v54 = vrot.slane %v3650_v41, %v6365_v25  ;;  %v3662_v31 = vmul.f32 %v6729_v35, %v7498_v39  ;;  %v3663_v37 = vmul.f32 %v6729_v35, %v6308_v34  ;;  %v3664_v7 = vmul.f32 %v6729_v35, %v6294_v48 }
 0x407   : > { %v3665_v4 = vmul.f32 %v6729_v35, %v6277_v45  ;;  %v3666_v43 = vmul.f32 %v6729_v35, %v6265_v21  ;;  %v3667_v8 = vmul.f32 %v6729_v35, %v6251_v9  ;;  %v3668_v50 = vmul.f32 %v6729_v35, %v6237_v24 }
 0x408   : > { %v6745_v3 = vadd.f32 %v6732_v54, %v3655_v32  ;;  %v6748_v25 = vadd.f32 %v6732_v54, %v3656_v55  ;;  %v6751_v17 = vadd.f32 %v6732_v54, %v3657_v16  ;;  %v6756_v23 = vadd.f32 %v6732_v54, %v3658_v47 }
 0x409   : > { %v6761_v1 = vadd.f32 %v6732_v54, %v3659_v19  ;;  %v6768_v60 = vadd.f32 %v6732_v54, %v3660_v29  ;;  %v6771_v0 = vadd.f32 %v6732_v54, %v3661_v62  ;;  %v6779_v39 = vadd.f32 %v6732_v54, %v3662_v31 }
 0x40a   : > { %v4513_v6 = vmul.f32 -1.442695, %v6745_v3  ;;  %v4514_v42 = vmul.f32 -1.442695, %v6748_v25  ;;  %v4515_v12 = vmul.f32 -1.442695, %v6751_v17  ;;  %v6785_v26 = vadd.f32 %v6732_v54, %v3663_v37 }
 0x40b   : > { %v4516_v34 = vmul.f32 -1.442695, %v6756_v23  ;;  %v4517_v2 = vmul.f32 -1.442695, %v6761_v1  ;;  %v6791_v58 = vadd.f32 %v6732_v54, %v3664_v7  ;;  %v4518_v48 = vmul.f32 -1.442695, %v6768_v60 }
 0x40c   : > { %5208 = vpow2.f32 %v4513_v6  ;;  %v6797_v45 = vadd.f32 %v6732_v54, %v3665_v4  ;;  %v4519_v61 = vmul.f32 -1.442695, %v6771_v0  ;;  %v6803_v21 = vadd.f32 %v6732_v54, %v3666_v43 }
 0x40d   : > { %5210 = vpow2.f32 %v4514_v42  ;;  %v4520_v41 = vmul.f32 -1.442695, %v6779_v39  ;;  %v3669_v32 = vmul.f32 %v6729_v35, %v6224_v11  ;;  %v6809_v9 = vadd.f32 %v6732_v54, %v3667_v8 }
 0x40e   : > { %5212 = vpow2.f32 %v4515_v12  ;;  %v4521_v55 = vmul.f32 -1.442695, %v6785_v26  ;;  %v3670_v16 = vmul.f32 %v6729_v35, %v6216_v14  ;;  %v6815_v24 = vadd.f32 %v6732_v54, %v3668_v50 }
 0x40f   : > { %5214 = vpow2.f32 %v4516_v34  ;;  %v4522_v47 = vmul.f32 -1.442695, %v6791_v58  ;;  %v3671_v19 = vmul.f32 %v6729_v35, %v6376_v40  ;;  %v6821_v11 = vadd.f32 %v6732_v54, %v3669_v32 }
 0x410   : > { %5216 = vpow2.f32 %v4517_v2  ;;  %v4523_v29 = vmul.f32 -1.442695, %v6797_v45  ;;  %v3672_v62 = vmul.f32 %v6729_v35, %v6371_v15  ;;  %v6827_v14 = vadd.f32 %v6732_v54, %v3670_v16 }
 0x411   : > { %5218 = vpow2.f32 %v4518_v48  ;;  %v4524_v31 = vmul.f32 -1.442695, %v6803_v21  ;;  %v3673_v37 = vmul.f32 %v6729_v35, %v7507_v44  ;;  %v6833_v40 = vadd.f32 %v6732_v54, %v3671_v19 }
 0x412   : > { %5220 = vpow2.f32 %v4519_v61  ;;  %v4525_v6 = vmul.f32 -1.442695, %v6809_v9  ;;  %v3674_v42 = vmul.f32 %v6729_v35, %v7505_v22  ;;  %v6839_v15 = vadd.f32 %v6732_v54, %v3672_v62 }
 0x413   : > { %5222 = vpow2.f32 %v4520_v41  ;;  %v4526_v12 = vmul.f32 -1.442695, %v6815_v24  ;;  %v3675_v7 = vmul.f32 %v6729_v35, %v7503_v49  ;;  %v6845_v44 = vadd.f32 %v6732_v54, %v3673_v37 }
 0x414   : > { %5224 = vpow2.f32 %v4521_v55  ;;  %v4527_v34 = vmul.f32 -1.442695, %v6821_v11  ;;  %v3676_v4 = vmul.f32 %v6729_v35, %v7501_v36  ;;  %v6851_v22 = vadd.f32 %v6732_v54, %v3674_v42 }
 0x415   : > { %5226 = vpow2.f32 %v4522_v47  ;;  %7509 = vst [vmem:[#allocation41_spill] sm:$0xff] %v6845_v44  ;;  %v4528_v2 = vmul.f32 -1.442695, %v6827_v14  ;;  %v3677_v43 = vmul.f32 %v6729_v35, %v7499_v20  ;;  %v6857_v49 = vadd.f32 %v6732_v54, %v3675_v7 }
 0x416   : > { %5228 = vpow2.f32 %v4523_v29  ;;  %7510 = vst [vmem:[#allocation9_spill] sm:$0xff] %v6851_v22  ;;  %v4529_v48 = vmul.f32 -1.442695, %v6833_v40  ;;  %v3678_v36 = vmul.f32 %v6729_v35, %v6316_v63  ;;  %v6865_v61 = vadd.f32 %v6732_v54, %v3676_v4 }
 0x417   : > { %5230 = vpow2.f32 %v4524_v31  ;;  %7511 = vst [vmem:[#allocation5_spill] sm:$0xff] %v6857_v49  ;;  %v4530_v50 = vmul.f32 -1.442695, %v6839_v15  ;;  %v3679_v20 = vmul.f32 %v6729_v35, %v6302_v28  ;;  %v6873_v32 = vadd.f32 %v6732_v54, %v3677_v43 }
 0x418   : > { %5232 = vpow2.f32 %v4525_v6  ;;  %7512 = vst [vmem:[#allocation38_spill] sm:$0xff] %v6865_v61  ;;  %v4531_v55 = vmul.f32 -1.442695, %v6845_v44  ;;  %v3680_v63 = vmul.f32 %v6729_v35, %v6286_v38  ;;  %v6881_v47 = vadd.f32 %v6732_v54, %v3678_v36 }
 0x419   : > { %v6860_v8 = vpop.eup %5208  ;;  %5234 = vpow2.f32 %v4526_v12  ;;  %7513 = vst [vmem:[#allocation45_spill] sm:$0xff] %v6873_v32  ;;  %v4532_v19 = vmul.f32 -1.442695, %v6851_v22  ;;  %v3681_v28 = vmul.f32 %v6729_v35, %v6270_v5  ;;  %v6889_v62 = vadd.f32 %v6732_v54, %v3679_v20 }
 0x41a   : > { %v6868_v41 = vpop.eup %5210  ;;  %5236 = vpow2.f32 %v4527_v34  ;;  %7514 = vst [vmem:[#allocation42_spill] sm:$0xff] %v6881_v47  ;;  %v4533_v31 = vmul.f32 -1.442695, %v6857_v49  ;;  %v3682_v38 = vmul.f32 %v6729_v35, %v6257_v10  ;;  %v6897_v6 = vadd.f32 %v6732_v54, %v3680_v63 }
 0x41b   : > { %v6876_v16 = vpop.eup %5212  ;;  %5238 = vpow2.f32 %v4528_v2  ;;  %7515 = vst [vmem:[#allocation19_spill] sm:$0xff] %v6889_v62  ;;  %v4534_v42 = vmul.f32 -1.442695, %v6865_v61  ;;  %v3683_v5 = vmul.f32 %v6729_v35, %v6243_v57  ;;  %v6905_v7 = vadd.f32 %v6732_v54, %v3681_v28 }
 0x41c   : > { %v6884_v29 = vpop.eup %5214  ;;  %5240 = vpow2.f32 %v4529_v48  ;;  %7516 = vst [vmem:[#allocation22_spill] sm:$0xff] %v6897_v6  ;;  %v4535_v34 = vmul.f32 -1.442695, %v6873_v32  ;;  %v3684_v10 = vmul.f32 %v6729_v35, %v6231_v52  ;;  %v6913_v2 = vadd.f32 %v6732_v54, %v3682_v38 }
 0x41d   : > { %v6892_v37 = vpop.eup %5216  ;;  %5242 = vpow2.f32 %v4530_v50  ;;  %7517 = vst [vmem:[#allocation10_spill] sm:$0xff] %v6905_v7  ;;  %v4536_v43 = vmul.f32 -1.442695, %v6881_v47  ;;  %v3685_v57 = vmul.f32 %v6729_v35, %v6218_v46  ;;  %v6921_v36 = vadd.f32 %v6732_v54, %v3683_v5 }
 0x41e   : > { %v6900_v12 = vpop.eup %5218  ;;  %5244 = vpow2.f32 %v4531_v55  ;;  %7518 = vst [vmem:[#allocation32_spill] sm:$0xff] %v6913_v2  ;;  %v4537_v50 = vmul.f32 -1.442695, %v6889_v62  ;;  %v3686_v52 = vmul.f32 %v6729_v35, %v6211_v53  ;;  %v6929_v55 = vadd.f32 %v6732_v54, %v3684_v10 }
 0x41f   : > { %v6908_v4 = vpop.eup %5220  ;;  %5246 = vpow2.f32 %v4532_v19  ;;  %7519 = vst [vmem:[#allocation24_spill] sm:$0xff] %v6921_v36  ;;  %v4538_v63 = vmul.f32 -1.442695, %v6897_v6  ;;  %v3687_v46 = vmul.f32 %v6729_v35, %v6522_v18  ;;  %v6937_v28 = vadd.f32 %v6732_v54, %v3685_v57 }
 0x420   : > { %v6916_v48 = vpop.eup %5222  ;;  %5248 = vpow2.f32 %v4533_v31  ;;  %7520 = vst [vmem:[#allocation30_spill] sm:$0xff] %v6929_v55  ;;  %v4539_v31 = vmul.f32 -1.442695, %v6905_v7  ;;  %v3688_v53 = vmul.f32 %v6729_v35, %v6514_v30  ;;  %v4540_v5 = vmul.f32 -1.442695, %v6913_v2 }
 0x421   : > { %v6924_v20 = vpop.eup %5224  ;;  %5250 = vpow2.f32 %v4534_v42  ;;  %7521 = vst [vmem:[#allocation20_spill] sm:$0xff] %v6937_v28  ;;  %v6945_v42 = vadd.f32 %v6732_v54, %v3686_v52  ;;  %v3689_v18 = vmul.f32 %v6729_v35, %v6500_v59  ;;  %v4541_v57 = vmul.f32 -1.442695, %v6921_v36 }
 0x422   : > { %v6932_v19 = vpop.eup %5226  ;;  %5252 = vpow2.f32 %v4535_v34  ;;  %v6953_v34 = vadd.f32 %v6732_v54, %v3687_v46  ;;  %v3690_v30 = vmul.f32 %v6729_v35, %v6492_v33  ;;  %v4542_v52 = vmul.f32 -1.442695, %v6929_v55 }
 0x423   : > { %v6940_v38 = vpop.eup %5228  ;;  %7522 = vst [vmem:[#allocation15_spill] sm:$0xff] %v6945_v42  ;;  %5254 = vpow2.f32 %v4536_v43  ;;  %v6961_v43 = vadd.f32 %v6732_v54, %v3688_v53  ;;  %v3691_v59 = vmul.f32 %v6729_v35, %v6484_v13  ;;  %v4543_v46 = vmul.f32 -1.442695, %v6937_v28 }
 0x424   : > { %v6948_v10 = vpop.eup %5230  ;;  %7523 = vst [vmem:[#allocation12_spill] sm:$0xff] %v6953_v34  ;;  %5256 = vpow2.f32 %v4537_v50  ;;  %v6969_v50 = vadd.f32 %v6732_v54, %v3689_v18  ;;  %v3692_v33 = vmul.f32 %v6729_v35, %v6474_v56  ;;  %v4544_v53 = vmul.f32 -1.442695, %v6945_v42 }
 0x425   : > { %v6956_v7 = vpop.eup %5232  ;;  %7524 = vst [vmem:[#allocation17_spill] sm:$0xff] %v6961_v43  ;;  %5258 = vpow2.f32 %v4538_v63  ;;  %v6977_v63 = vadd.f32 %v6732_v54, %v3690_v30  ;;  %v3693_v13 = vmul.f32 %v6729_v35, %v6460_v51  ;;  %v4545_v18 = vmul.f32 -1.442695, %v6953_v34  ;;  %v7529_v51 = vld [vmem:[#allocation7_spill] sm:$0xff] }
 0x426   : > { %v6964_v2 = vpop.eup %5234  ;;  %7525 = vst [vmem:[#allocation13_spill] sm:$0xff] %v6969_v50  ;;  %5260 = vpow2.f32 %v4539_v31  ;;  %v6985_v31 = vadd.f32 %v6732_v54, %v3691_v59  ;;  %v3694_v56 = vmul.f32 %v6729_v35, %v6452_v27  ;;  %v4546_v30 = vmul.f32 -1.442695, %v6961_v43  ;;  %v7531_v27 = vld [vmem:[#allocation40_spill] sm:$0xff] }
 0x427   : > { %v6972_v36 = vpop.eup %5236  ;;  %7526 = vst [vmem:[#allocation26_spill] sm:$0xff] %v6977_v63  ;;  %5262 = vpow2.f32 %v4540_v5  ;;  %v6993_v5 = vadd.f32 %v6732_v54, %v3692_v33  ;;  %v3695_v59 = vmul.f32 %v6729_v35, %v7529_v51  ;;  %v4547_v34 = vmul.f32 -1.442695, %v6969_v50  ;;  %v7533_v51 = vld [vmem:[#allocation43_spill] sm:$0xff] }
 0x428   : > { %v6980_v55 = vpop.eup %5238  ;;  %7527 = vst [vmem:[#allocation23_spill] sm:$0xff] %v6985_v31  ;;  %5264 = vpow2.f32 %v4541_v57  ;;  %v7001_v57 = vadd.f32 %v6732_v54, %v3693_v13  ;;  %v3696_v33 = vmul.f32 %v6729_v35, %v7531_v27  ;;  %v4548_v43 = vmul.f32 -1.442695, %v6977_v63  ;;  %v7535_v27 = vld [vmem:[#allocation37_spill] sm:$0xff] }
 0x429   : > { %v6988_v28 = vpop.eup %5240  ;;  %7528 = vst [vmem:[#allocation27_spill] sm:$0xff] %v6993_v5  ;;  %5266 = vpow2.f32 %v4542_v52  ;;  %v7009_v52 = vadd.f32 %v6732_v54, %v3694_v56  ;;  %v3697_v13 = vmul.f32 %v6729_v35, %v7533_v51  ;;  %v4549_v50 = vmul.f32 -1.442695, %v6985_v31  ;;  %v7536_v51 = vld [vmem:[#allocation4_spill] sm:$0xff] }
 0x42a   : > { %v6996_v42 = vpop.eup %5242  ;;  %7530 = vst [vmem:[#allocation25_spill] sm:$0xff] %v7001_v57  ;;  %5268 = vpow2.f32 %v4543_v46  ;;  %v7017_v46 = vadd.f32 %v6732_v54, %v3695_v59  ;;  %v3698_v56 = vmul.f32 %v6729_v35, %v7535_v27  ;;  %v4550_v63 = vmul.f32 -1.442695, %v6993_v5  ;;  %v7538_v27 = vld [vmem:[#allocation47_spill] sm:$0xff] }
 0x42b   : > { %v7004_v6 = vpop.eup %5244  ;;  %7532 = vst [vmem:[#allocation18_spill] sm:$0xff] %v7009_v52  ;;  %5270 = vpow2.f32 %v4544_v53  ;;  %v7025_v53 = vadd.f32 %v6732_v54, %v3696_v33  ;;  %v3699_v59 = vmul.f32 %v6729_v35, %v7536_v51  ;;  %v4551_v31 = vmul.f32 -1.442695, %v7001_v57  ;;  %v7540_v51 = vld [vmem:[#allocation6_spill] sm:$0xff] }
 0x42c   : > { %v7012_v62 = vpop.eup %5246  ;;  %7534 = vst [vmem:[#allocation14_spill] sm:$0xff] %v7017_v46  ;;  %5272 = vpow2.f32 %v4545_v18  ;;  %v7033_v18 = vadd.f32 %v6732_v54, %v3697_v13  ;;  %v3700_v33 = vmul.f32 %v6729_v35, %v7538_v27  ;;  %v4552_v5 = vmul.f32 -1.442695, %v7009_v52  ;;  %v7542_v27 = vld [vmem:[#allocation39_spill] sm:$0xff] }
 0x42d   : > { %v7020_v47 = vpop.eup %5248  ;;  %5274 = vpow2.f32 %v4546_v30  ;;  %v7041_v30 = vadd.f32 %v6732_v54, %v3698_v56  ;;  %v3701_v13 = vmul.f32 %v6729_v35, %v7540_v51  ;;  %v4553_v57 = vmul.f32 -1.442695, %v7017_v46 }
 0x42e   : > { %v7028_v32 = vpop.eup %5250  ;;  %7537 = vst [vmem:[#allocation21_spill] sm:$0xff] %v7033_v18  ;;  %5276 = vpow2.f32 %v4547_v34  ;;  %v7049_v34 = vadd.f32 %v6732_v54, %v3699_v59  ;;  %v3702_v56 = vmul.f32 %v6729_v35, %v7542_v27  ;;  %v4554_v52 = vmul.f32 -1.442695, %v7025_v53 }
 0x42f   : > { %v7036_v61 = vpop.eup %5252  ;;  %7539 = vst [vmem:[#allocation16_spill] sm:$0xff] %v7041_v30  ;;  %5278 = vpow2.f32 %v4548_v43  ;;  %v7057_v43 = vadd.f32 %v6732_v54, %v3700_v33  ;;  %v7063_v51 = vadd.f32 %v6732_v54, %v3701_v13  ;;  %v4556_v35 = vmul.f32 -1.442695, %v7041_v30 }
 0x430   : > { %v7044_v49 = vpop.eup %5254  ;;  %7541 = vst [vmem:[#allocation29_spill] sm:$0xff] %v7049_v34  ;;  %5280 = vpow2.f32 %v4549_v50  ;;  %v4555_v50 = vmul.f32 -1.442695, %v7033_v18  ;;  %v7069_v46 = vadd.f32 %v6732_v54, %v3702_v56  ;;  %v3921_v30 = vadd.f32 1.0, %v7020_v47 }
 0x431   : > { %v7052_v22 = vpop.eup %5256  ;;  %7543 = vst [vmem:[#allocation11_spill] sm:$0xff] %v7057_v43  ;;  %5282 = vpow2.f32 %v4550_v63  ;;  %7544 = vst [vmem:[#allocation35_spill] sm:$0xff] %v7063_v51  ;;  %v4557_v63 = vmul.f32 -1.442695, %v7049_v34  ;;  %v4559_v18 = vmul.f32 -1.442695, %v7063_v51 }
 0x432   : > { %v7060_v44 = vpop.eup %5258  ;;  %5284 = vpow2.f32 %v4551_v31  ;;  %7545 = vst [vmem:[#allocation49_spill] sm:$0xff] %v7069_v46  ;;  %v4558_v31 = vmul.f32 -1.442695, %v7057_v43 }
 0x433   : > { %v7066_v59 = vpop.eup %5260  ;;  %5286 = vpow2.f32 %v4552_v5  ;;  %v4560_v5 = vmul.f32 -1.442695, %v7069_v46 }
 0x434   : > { %v7072_v33 = vpop.eup %5262  ;;  %5288 = vpow2.f32 %v4553_v57  ;;  %v3901_v57 = vadd.f32 1.0, %v6860_v8 }
 0x435   : > { %v7075_v27 = vpop.eup %5264  ;;  %5290 = vpow2.f32 %v4554_v52  ;;  %v3902_v52 = vadd.f32 1.0, %v6868_v41 }
 0x436   : > { %v7078_v13 = vpop.eup %5266  ;;  %5292 = vpow2.f32 %v4555_v50  ;;  %v3903_v50 = vadd.f32 1.0, %v6876_v16 }
 0x437   : > { %v7081_v54 = vpop.eup %5268  ;;  %5294 = vpow2.f32 %v4556_v35  ;;  %v3904_v35 = vadd.f32 1.0, %v6884_v29 }
 0x438   : > { %v7084_v56 = vpop.eup %5270  ;;  %5296 = vpow2.f32 %v4557_v63  ;;  %v3905_v63 = vadd.f32 1.0, %v6892_v37  ;;  %v3909_v37 = vadd.f32 1.0, %v6924_v20  ;;  %v3913_v20 = vadd.f32 1.0, %v6956_v7 }
 0x439   : > { %v7087_v34 = vpop.eup %5272  ;;  %5298 = vpow2.f32 %v4558_v31  ;;  %v3906_v31 = vadd.f32 1.0, %v6900_v12  ;;  %v3910_v12 = vadd.f32 1.0, %v6932_v19  ;;  %v3914_v19 = vadd.f32 1.0, %v6964_v2 }
 0x43a   : > { %v7090_v43 = vpop.eup %5274  ;;  %5300 = vpow2.f32 %v4559_v18  ;;  %v3907_v18 = vadd.f32 1.0, %v6908_v4  ;;  %v3911_v4 = vadd.f32 1.0, %v6940_v38  ;;  %v3915_v38 = vadd.f32 1.0, %v6972_v36 }
 0x43b   : > { %v7093_v51 = vpop.eup %5276  ;;  %5302 = vpow2.f32 %v4560_v5  ;;  %v3908_v5 = vadd.f32 1.0, %v6916_v48  ;;  %v3912_v48 = vadd.f32 1.0, %v6948_v10  ;;  %v3916_v10 = vadd.f32 1.0, %v6980_v55 }
 0x43c   : > { %v7096_v46 = vpop.eup %5278  ;;  %5304 = vrcp.f32 %v3901_v57  ;;  %v3917_v7 = vadd.f32 1.0, %v6988_v28  ;;  %v3918_v2 = vadd.f32 1.0, %v6996_v42  ;;  %v3920_v28 = vadd.f32 1.0, %v7012_v62 }
 0x43d   : > { %v7099_v8 = vpop.eup %5280  ;;  %5306 = vrcp.f32 %v3902_v52 }
 0x43e   : > { %v7102_v41 = vpop.eup %5282  ;;  %5308 = vrcp.f32 %v3903_v50 }
 0x43f   : > { %v7105_v16 = vpop.eup %5284  ;;  %5310 = vrcp.f32 %v3904_v35 }
 0x440   : > { %v7108_v29 = vpop.eup %5286  ;;  %5312 = vrcp.f32 %v3905_v63 }
 0x441   : > { %v7111_v57 = vpop.eup %5288  ;;  %5314 = vrcp.f32 %v3906_v31 }
 0x442   : > { %v7114_v52 = vpop.eup %5290  ;;  %5316 = vrcp.f32 %v3907_v18 }
 0x443   : > { %v7117_v50 = vpop.eup %5292  ;;  %5318 = vrcp.f32 %v3908_v5 }
 0x444   : > { %v7120_v35 = vpop.eup %5294  ;;  %5320 = vrcp.f32 %v3909_v37 }
 0x445   : > { %v7123_v63 = vpop.eup %5296  ;;  %5322 = vrcp.f32 %v3910_v12  ;;  %v3919_v12 = vadd.f32 1.0, %v7004_v6 }
 0x446   : > { %v7127_v31 = vpop.eup %5298  ;;  %5324 = vrcp.f32 %v3911_v4 }
 0x447   : > { %v7130_v18 = vpop.eup %5300  ;;  %5326 = vrcp.f32 %v3912_v48 }
 0x448   : > { %v7133_v5 = vpop.eup %5302  ;;  %5328 = vrcp.f32 %v3913_v20 }
 0x449   : > { %v5305_v37 = vpop.eup %5304  ;;  %5330 = vrcp.f32 %v3914_v19  ;;  %v3922_v19 = vadd.f32 1.0, %v7028_v32 }
 0x44a   : > { %v5307_v36 = vpop.eup %5306  ;;  %5332 = vrcp.f32 %v3915_v38  ;;  %v4045_v55 = vmul.f32 %v5305_v37, %v6745_v3  ;;  %v3924_v38 = vadd.f32 1.0, %v7044_v49  ;;  %v3927_v37 = vadd.f32 1.0, %v7066_v59 }
 0x44b   : > { %v5309_v4 = vpop.eup %5308  ;;  %5334 = vrcp.f32 %v3916_v10  ;;  %v4046_v48 = vmul.f32 %v5307_v36, %v6748_v25  ;;  %v3923_v25 = vadd.f32 1.0, %v7036_v61  ;;  %v3925_v10 = vadd.f32 1.0, %v7052_v22 }
 0x44c   : > { %v5311_v20 = vpop.eup %5310  ;;  %5336 = vrcp.f32 %v3917_v7  ;;  %v4047_v42 = vmul.f32 %v5309_v4, %v6751_v17  ;;  %4093 = vst.msk [vmem:[%s7139_s23] sm:$0xff] %vm1018_vm4, %v4045_v55  ;;  %v3926_v7 = vadd.f32 1.0, %v7060_v44  ;;  %v3930_v36 = vadd.f32 1.0, %v7078_v13 }
 0x44d   : > { %v5313_v6 = vpop.eup %5312  ;;  %5338 = vrcp.f32 %v3918_v2  ;;  %v4048_v3 = vmul.f32 %v5311_v20, %v6756_v23  ;;  %4094 = vst.msk [vmem:[%s7139_s23 + $0x8] sm:$0xff] %vm1018_vm4, %v4046_v48  ;;  %v3929_v2 = vadd.f32 1.0, %v7075_v27  ;;  %v3932_v55 = vadd.f32 1.0, %v7084_v56 }
 0x44e   : > { %v5315_v62 = vpop.eup %5314  ;;  %5340 = vrcp.f32 %v3919_v12  ;;  %v4049_v47 = vmul.f32 %v5313_v6, %v6761_v1  ;;  %4095 = vst.msk [vmem:[%s7139_s23 + $0x10] sm:$0xff] %vm1018_vm4, %v4047_v42  ;;  %v3931_v12 = vadd.f32 1.0, %v7081_v54  ;;  %v3933_v4 = vadd.f32 1.0, %v7087_v34 }
 0x44f   : > { %v5317_v17 = vpop.eup %5316  ;;  %5342 = vrcp.f32 %v3920_v28  ;;  %v4050_v32 = vmul.f32 %v5315_v62, %v6768_v60  ;;  %4096 = vst.msk [vmem:[%s7139_s23 + $0x18] sm:$0xff] %vm1018_vm4, %v4048_v3  ;;  %v3934_v28 = vadd.f32 1.0, %v7090_v43  ;;  %v3935_v48 = vadd.f32 1.0, %v7093_v51  ;;  %v7546_v51 = vld [vmem:[#allocation41_spill] sm:$0xff] }
 0x450   : > { %v5319_v23 = vpop.eup %5318  ;;  %5344 = vrcp.f32 %v3921_v30  ;;  %v4051_v61 = vmul.f32 %v5317_v17, %v6771_v0  ;;  %4097 = vst.msk [vmem:[%s7139_s23 + $0x20] sm:$0xff] %vm1018_vm4, %v4049_v47  ;;  %v3928_v30 = vadd.f32 1.0, %v7072_v33  ;;  %v3936_v20 = vadd.f32 1.0, %v7096_v46  ;;  %v7547_v46 = vld [vmem:[#allocation9_spill] sm:$0xff] }
 0x451   : > { %v5321_v1 = vpop.eup %5320  ;;  %5346 = vrcp.f32 %v3922_v19  ;;  %v4052_v49 = vmul.f32 %v5319_v23, %v6779_v39  ;;  %4098 = vst.msk [vmem:[%s7139_s23 + $0x28] sm:$0xff] %vm1018_vm4, %v4050_v32  ;;  %v3937_v42 = vadd.f32 1.0, %v7099_v8  ;;  %v3938_v19 = vadd.f32 1.0, %v7102_v41  ;;  %v7548_v8 = vld [vmem:[#allocation5_spill] sm:$0xff]  ;;  %v7549_v41 = vld [vmem:[#allocation38_spill] sm:$0xff] }
 0x452   : > { %v5323_v60 = vpop.eup %5322  ;;  %5348 = vrcp.f32 %v3923_v25  ;;  %v4053_v22 = vmul.f32 %v5321_v1, %v6785_v26  ;;  %4099 = vst.msk [vmem:[%s7139_s23 + $0x30] sm:$0xff] %vm1018_vm4, %v4051_v61  ;;  %v3939_v62 = vadd.f32 1.0, %v7105_v16  ;;  %v3940_v17 = vadd.f32 1.0, %v7108_v29  ;;  %v7550_v16 = vld [vmem:[#allocation45_spill] sm:$0xff]  ;;  %v7551_v29 = vld [vmem:[#allocation42_spill] sm:$0xff] }
 0x453   : > { %v5325_v0 = vpop.eup %5324  ;;  %5350 = vrcp.f32 %v3924_v38  ;;  %v4054_v44 = vmul.f32 %v5323_v60, %v6791_v58  ;;  %4100 = vst.msk [vmem:[%s7139_s23 + $0x38] sm:$0xff] %vm1018_vm4, %v4052_v49  ;;  %v3941_v23 = vadd.f32 1.0, %v7111_v57  ;;  %v3942_v1 = vadd.f32 1.0, %v7114_v52  ;;  %v7552_v57 = vld [vmem:[#allocation19_spill] sm:$0xff]  ;;  %v7553_v52 = vld [vmem:[#allocation22_spill] sm:$0xff] }
 0x454   : > { %v5327_v39 = vpop.eup %5326  ;;  %5352 = vrcp.f32 %v3925_v10  ;;  %v4055_v59 = vmul.f32 %v5325_v0, %v6797_v45  ;;  %4101 = vst.msk [vmem:[%s7139_s23 + $0x40] sm:$0xff] %vm1018_vm4, %v4053_v22  ;;  %v3943_v60 = vadd.f32 1.0, %v7117_v50  ;;  %v3944_v0 = vadd.f32 1.0, %v7120_v35  ;;  %v7554_v50 = vld [vmem:[#allocation10_spill] sm:$0xff]  ;;  %v7555_v35 = vld [vmem:[#allocation32_spill] sm:$0xff] }
 0x455   : > { %v5329_v26 = vpop.eup %5328  ;;  %5354 = vrcp.f32 %v3926_v7  ;;  %v4056_v33 = vmul.f32 %v5327_v39, %v6803_v21  ;;  %4102 = vst.msk [vmem:[%s7139_s23 + $0x48] sm:$0xff] %vm1018_vm4, %v4054_v44  ;;  %v3945_v39 = vadd.f32 1.0, %v7123_v63  ;;  %v7556_v63 = vld [vmem:[#allocation24_spill] sm:$0xff] }
 0x456   : > { %v5331_v58 = vpop.eup %5330  ;;  %5356 = vrcp.f32 %v3927_v37  ;;  %v4057_v27 = vmul.f32 %v5329_v26, %v6809_v9  ;;  %4103 = vst.msk [vmem:[%s7139_s23 + $0x50] sm:$0xff] %vm1018_vm4, %v4055_v59  ;;  %v3946_v26 = vadd.f32 1.0, %v7127_v31  ;;  %v7557_v31 = vld [vmem:[#allocation30_spill] sm:$0xff] }
 0x457   : > { %v5333_v45 = vpop.eup %5332  ;;  %5358 = vrcp.f32 %v3928_v30  ;;  %v4058_v13 = vmul.f32 %v5331_v58, %v6815_v24  ;;  %4104 = vst.msk [vmem:[%s7139_s23 + $0x58] sm:$0xff] %vm1018_vm4, %v4056_v33  ;;  %v3947_v58 = vadd.f32 1.0, %v7130_v18 }
 0x458   : > { %v5335_v21 = vpop.eup %5334  ;;  %5360 = vrcp.f32 %v3929_v2  ;;  %v4059_v54 = vmul.f32 %v5333_v45, %v6821_v11  ;;  %4105 = vst.msk [vmem:[%s7139_s23 + $0x60] sm:$0xff] %vm1018_vm4, %v4057_v27  ;;  %v3948_v45 = vadd.f32 1.0, %v7133_v5 }
 0x459   : > { %v5337_v9 = vpop.eup %5336  ;;  %5362 = vrcp.f32 %v3930_v36  ;;  %v4060_v56 = vmul.f32 %v5335_v21, %v6827_v14  ;;  %4106 = vst.msk [vmem:[%s7139_s23 + $0x68] sm:$0xff] %vm1018_vm4, %v4058_v13  ;;  %v7558_v21 = vld [vmem:[#allocation20_spill] sm:$0xff] }
 0x45a   : > { %v5339_v24 = vpop.eup %5338  ;;  %5364 = vrcp.f32 %v3931_v12  ;;  %v4061_v34 = vmul.f32 %v5337_v9, %v6833_v40  ;;  %4107 = vst.msk [vmem:[%s7139_s23 + $0x70] sm:$0xff] %vm1018_vm4, %v4059_v54  ;;  %v7559_v54 = vld [vmem:[#allocation15_spill] sm:$0xff] }
 0x45b   : > { %v5341_v11 = vpop.eup %5340  ;;  %5366 = vrcp.f32 %v3932_v55  ;;  %v4062_v43 = vmul.f32 %v5339_v24, %v6839_v15  ;;  %4108 = vst.msk [vmem:[%s7139_s23 + $0x78] sm:$0xff] %vm1018_vm4, %v4060_v56 }
 0x45c   : > { %v5343_v14 = vpop.eup %5342  ;;  %5368 = vrcp.f32 %v3933_v4  ;;  %v4063_v6 = vmul.f32 %v5341_v11, %v7546_v51  ;;  %4109 = vst.msk [vmem:[%s7139_s23 + $0x80] sm:$0xff] %vm1018_vm4, %v4061_v34 }
 0x45d   : > { %v5345_v40 = vpop.eup %5344  ;;  %5370 = vrcp.f32 %v3934_v28  ;;  %v4064_v3 = vmul.f32 %v5343_v14, %v7547_v46  ;;  %4110 = vst.msk [vmem:[%s7139_s23 + $0x88] sm:$0xff] %vm1018_vm4, %v4062_v43  ;;  %v7560_v28 = vld [vmem:[#allocation12_spill] sm:$0xff] }
 0x45e   : > { %v5347_v15 = vpop.eup %5346  ;;  %5372 = vrcp.f32 %v3935_v48  ;;  %v4065_v25 = vmul.f32 %v5345_v40, %v7548_v8  ;;  %4111 = vst.msk [vmem:[%s7139_s23 + $0x90] sm:$0xff] %vm1018_vm4, %v4063_v6  ;;  %v7561_v48 = vld [vmem:[#allocation17_spill] sm:$0xff]  ;;  %v7564_v40 = vld [vmem:[#allocation23_spill] sm:$0xff] }
 0x45f   : > { %v5349_v47 = vpop.eup %5348  ;;  %5374 = vrcp.f32 %v3936_v20  ;;  %v4066_v38 = vmul.f32 %v5347_v15, %v7549_v41  ;;  %4112 = vst.msk [vmem:[%s7139_s23 + $0x98] sm:$0xff] %vm1018_vm4, %v4064_v3  ;;  %v7562_v20 = vld [vmem:[#allocation13_spill] sm:$0xff]  ;;  %v7565_v3 = vld [vmem:[#allocation27_spill] sm:$0xff] }
 0x460   : > { %v5351_v32 = vpop.eup %5350  ;;  %5376 = vrcp.f32 %v3937_v42  ;;  %v4067_v10 = vmul.f32 %v5349_v47, %v7550_v16  ;;  %4113 = vst.msk [vmem:[%s7139_s23 + $0xa0] sm:$0xff] %vm1018_vm4, %v4065_v25  ;;  %v7563_v42 = vld [vmem:[#allocation26_spill] sm:$0xff]  ;;  %v7566_v8 = vld [vmem:[#allocation25_spill] sm:$0xff] }
 0x461   : > { %v5353_v61 = vpop.eup %5352  ;;  %5378 = vrcp.f32 %v3938_v19  ;;  %v4068_v7 = vmul.f32 %v5351_v32, %v7551_v29  ;;  %4114 = vst.msk [vmem:[%s7139_s23 + $0xa8] sm:$0xff] %vm1018_vm4, %v4066_v38  ;;  %v7568_v32 = vld [vmem:[#allocation14_spill] sm:$0xff] }
 0x462   : > { %v5355_v49 = vpop.eup %5354  ;;  %5380 = vrcp.f32 %v3939_v62  ;;  %v4069_v37 = vmul.f32 %v5353_v61, %v7552_v57  ;;  %4115 = vst.msk [vmem:[%s7139_s23 + $0xb0] sm:$0xff] %vm1018_vm4, %v4067_v10 }
 0x463   : > { %v5357_v22 = vpop.eup %5356  ;;  %5382 = vrcp.f32 %v3940_v17  ;;  %v4070_v30 = vmul.f32 %v5355_v49, %v7553_v52  ;;  %4116 = vst.msk [vmem:[%s7139_s23 + $0xb8] sm:$0xff] %vm1018_vm4, %v4068_v7  ;;  %v7567_v17 = vld [vmem:[#allocation18_spill] sm:$0xff]  ;;  %v7570_v49 = vld [vmem:[#allocation16_spill] sm:$0xff] }
 0x464   : > { %v5359_v44 = vpop.eup %5358  ;;  %5384 = vrcp.f32 %v3941_v23  ;;  %v4071_v2 = vmul.f32 %v5357_v22, %v7554_v50  ;;  %4117 = vst.msk [vmem:[%s7139_s23 + $0xc0] sm:$0xff] %vm1018_vm4, %v4069_v37  ;;  %v7571_v37 = vld [vmem:[#allocation29_spill] sm:$0xff] }
 0x465   : > { %v5361_v59 = vpop.eup %5360  ;;  %5386 = vrcp.f32 %v3942_v1  ;;  %v4072_v36 = vmul.f32 %v5359_v44, %v7555_v35  ;;  %4118 = vst.msk [vmem:[%s7139_s23 + $0xc8] sm:$0xff] %vm1018_vm4, %v4070_v30  ;;  %v7569_v1 = vld [vmem:[#allocation21_spill] sm:$0xff]  ;;  %v7573_v44 = vld [vmem:[#allocation35_spill] sm:$0xff] }
 0x466   : > { %v5363_v33 = vpop.eup %5362  ;;  %5388 = vrcp.f32 %v3943_v60  ;;  %v4073_v12 = vmul.f32 %v5361_v59, %v7556_v63  ;;  %4119 = vst.msk [vmem:[%s7139_s23 + $0xd0] sm:$0xff] %vm1018_vm4, %v4071_v2  ;;  %v7574_v50 = vld [vmem:[#allocation49_spill] sm:$0xff] }
 0x467   : > { %v5365_v27 = vpop.eup %5364  ;;  %5390 = vrcp.f32 %v3944_v0  ;;  %v4074_v55 = vmul.f32 %v5363_v33, %v7557_v31  ;;  %4120 = vst.msk [vmem:[%s7139_s23 + $0xd8] sm:$0xff] %vm1018_vm4, %v4072_v36  ;;  %v7572_v0 = vld [vmem:[#allocation11_spill] sm:$0xff] }
 0x468   : > { %v5367_v13 = vpop.eup %5366  ;;  %5392 = vrcp.f32 %v3945_v39  ;;  %v4075_v18 = vmul.f32 %v5365_v27, %v7558_v21  ;;  %4121 = vst.msk [vmem:[%s7139_s23 + $0xe0] sm:$0xff] %vm1018_vm4, %v4073_v12 }
 0x469   : > { %v5369_v4 = vpop.eup %5368  ;;  %5394 = vrcp.f32 %v3946_v26  ;;  %v4076_v9 = vmul.f32 %v5367_v13, %v7559_v54  ;;  %4122 = vst.msk [vmem:[%s7139_s23 + $0xe8] sm:$0xff] %vm1018_vm4, %v4074_v55 }
 0x46a   : > { %v5371_v5 = vpop.eup %5370  ;;  %5396 = vrcp.f32 %v3947_v58  ;;  %v4077_v56 = vmul.f32 %v5369_v4, %v7560_v28  ;;  %4123 = vst.msk [vmem:[%s7139_s23 + $0xf0] sm:$0xff] %vm1018_vm4, %v4075_v18 }
 0x46b   : > { %v5373_v24 = vpop.eup %5372  ;;  %5398 = vrcp.f32 %v3948_v45  ;;  %v4078_v34 = vmul.f32 %v5371_v5, %v7561_v48  ;;  %4124 = vst.msk [vmem:[%s7139_s23 + $0xf8] sm:$0xff] %vm1018_vm4, %v4076_v9 }
 0x46c   : > { %v5375_v11 = vpop.eup %5374  ;;  %v4079_v43 = vmul.f32 %v5373_v24, %v7562_v20  ;;  %4125 = vst.msk [vmem:[%s7139_s23 + $0x100] sm:$0xff] %vm1018_vm4, %v4077_v56 }
 0x46d   : > { %v5377_v14 = vpop.eup %5376  ;;  %v4080_v51 = vmul.f32 %v5375_v11, %v7563_v42  ;;  %4126 = vst.msk [vmem:[%s7139_s23 + $0x108] sm:$0xff] %vm1018_vm4, %v4078_v34 }
 0x46e   : > { %v5379_v6 = vpop.eup %5378  ;;  %v4081_v19 = vmul.f32 %v5377_v14, %v7564_v40  ;;  %4127 = vst.msk [vmem:[%s7139_s23 + $0x110] sm:$0xff] %vm1018_vm4, %v4079_v43 }
 0x46f   : > { %v5381_v46 = vpop.eup %5380  ;;  %v4082_v15 = vmul.f32 %v5379_v6, %v7565_v3  ;;  %4128 = vst.msk [vmem:[%s7139_s23 + $0x118] sm:$0xff] %vm1018_vm4, %v4080_v51 }
 0x470   : > { %v5383_v62 = vpop.eup %5382  ;;  %v4083_v25 = vmul.f32 %v5381_v46, %v7566_v8  ;;  %4129 = vst.msk [vmem:[%s7139_s23 + $0x120] sm:$0xff] %vm1018_vm4, %v4081_v19 }
 0x471   : > { %v5385_v47 = vpop.eup %5384  ;;  %v4084_v41 = vmul.f32 %v5383_v62, %v7567_v17  ;;  %4130 = vst.msk [vmem:[%s7139_s23 + $0x128] sm:$0xff] %vm1018_vm4, %v4082_v15 }
 0x472   : > { %v5387_v38 = vpop.eup %5386  ;;  %v4085_v23 = vmul.f32 %v5385_v47, %v7568_v32  ;;  %4131 = vst.msk [vmem:[%s7139_s23 + $0x130] sm:$0xff] %vm1018_vm4, %v4083_v25 }
 0x473   : > { %v5389_v16 = vpop.eup %5388  ;;  %v4086_v10 = vmul.f32 %v5387_v38, %v7025_v53  ;;  %4132 = vst.msk [vmem:[%s7139_s23 + $0x138] sm:$0xff] %vm1018_vm4, %v4084_v41 }
 0x474   : > { %v5391_v61 = vpop.eup %5390  ;;  %v4087_v29 = vmul.f32 %v5389_v16, %v7569_v1  ;;  %4133 = vst.msk [vmem:[%s7139_s23 + $0x140] sm:$0xff] %vm1018_vm4, %v4085_v23 }
 0x475   : > { %v5393_v7 = vpop.eup %5392  ;;  %v4088_v60 = vmul.f32 %v5391_v61, %v7570_v49  ;;  %4134 = vst.msk [vmem:[%s7139_s23 + $0x148] sm:$0xff] %vm1018_vm4, %v4086_v10 }
 0x476   : > { %v5395_v57 = vpop.eup %5394  ;;  %v4089_v22 = vmul.f32 %v5393_v7, %v7571_v37  ;;  %4135 = vst.msk [vmem:[%s7139_s23 + $0x150] sm:$0xff] %vm1018_vm4, %v4087_v29 }
 0x477   : > { %v5397_v53 = vpop.eup %5396  ;;  %v4090_v52 = vmul.f32 %v5395_v57, %v7572_v0  ;;  %4136 = vst.msk [vmem:[%s7139_s23 + $0x158] sm:$0xff] %vm1018_vm4, %v4088_v60 }
 0x478   : > { %v5399_v30 = vpop.eup %5398  ;;  %v4091_v39 = vmul.f32 %v5397_v53, %v7573_v44  ;;  %4137 = vst.msk [vmem:[%s7139_s23 + $0x160] sm:$0xff] %vm1018_vm4, %v4089_v22 }
 0x479   : > { %v4092_v2 = vmul.f32 %v5399_v30, %v7574_v50  ;;  %4138 = vst.msk [vmem:[%s7139_s23 + $0x168] sm:$0xff] %vm1018_vm4, %v4090_v52 }
 0x47a   : > { %4139 = vst.msk [vmem:[%s7139_s23 + $0x170] sm:$0xff] %vm1018_vm4, %v4091_v39 }
 0x47b   : > { %4140 = vst.msk [vmem:[%s7139_s23 + $0x178] sm:$0xff] %vm1018_vm4, %v4092_v2 }
 0x47c PF: > { %s17_s26 = sadd.s32 1, %s5423_s26   ;;  %s7575_s24 = smov %s5419_s25 }
 0x47d   : > { %p14_p5 = scmp.ge.s32.totalorder %s17_s26, 4   ;;  %s7576_s25 = smov %s7578_s27 }
 0x47f   :  { %16 = sbr.rel (!%p14_p5) target bundleno = 2 (0x2), region = 92 }

</bundles_post_ra>
